<compile_context>
chip_gen: v6e
topology: v6e:2x2x1
jax: 0.10.0
libtpu: 0.0.40
codegen_flags: <defaults>
</compile_context>

<pallas_src>
import functools
import math

import jax
import jax.numpy as jnp
from jax.experimental import pallas as pl
from jax.experimental.pallas import tpu as pltpu


_LANE = 128        # lane width: padded-N GEMM outputs are a multiple of this
_MAX_TM = 1024     # max rows per GEMM tile (double-buffered worst case < 16 MiB VMEM)
# Set to jnp.bfloat16 on v6e/v7x for ~2x MXU rate and half the HBM/VMEM traffic
# (accumulation stays f32). Kept f32 here so the in-script 2e-2 check stays comfortably tight.
_MXU_DTYPE = jnp.float32


def _round_up(x, m):
    return (x + m - 1) // m * m


def _cdiv(a, b):
    return (a + b - 1) // b


def _pick_tm(m):
    """Balanced row tile: <= _MAX_TM, multiple of 8, last tile not mostly padding."""
    m8 = _round_up(m, 8)
    if m8 <= _MAX_TM:
        return m8
    return _round_up(_cdiv(m8, _cdiv(m8, _MAX_TM)), 8)


def _pad_last(a, n):
    if a.shape[-1] == n:
        return a
    pad = [(0, 0)] * (a.ndim - 1) + [(0, n - a.shape[-1])]
    return jnp.pad(a, pad)


def _pad_rows(w, k):
    if w.shape[0] == k:
        return w
    return jnp.pad(w, ((0, k - w.shape[0]), (0, 0)))


# ---------------------------------------------------------------------------
# Pallas kernel bodies
# ---------------------------------------------------------------------------
def _ln_rows(x, gamma, beta, n_real, eps):
    """TF-style LayerNorm over the first n_real lanes of x:(tm, n_pad) (padded lanes are 0).

    gamma/beta are (1, n_pad) with zero-padded lanes, so padded output lanes stay exactly 0.
    """
    inv_n = 1.0 / n_real
    mu = jnp.sum(x, axis=-1, keepdims=True) * inv_n          # padded lanes contribute 0
    xc = x - mu
    if x.shape[-1] != n_real:
        lane = jax.lax.broadcasted_iota(jnp.int32, x.shape, x.ndim - 1)
        xc = jnp.where(lane < n_real, xc, 0.0)
    var = jnp.sum(xc * xc, axis=-1, keepdims=True) * inv_n
    return xc * jax.lax.rsqrt(var + eps) * gamma + beta


def _gemm_kernel(x_ref, w_ref, b_ref, o_ref, *, act):
    """o = act(x @ w + b); f32 accumulation on the MXU, epilogue on the VPU/EUP."""
    acc = jnp.dot(x_ref[...], w_ref[...], preferred_element_type=jnp.float32)
    acc = acc + b_ref[...]
    if act == "relu":
        acc = jnp.maximum(acc, 0.0)
    elif act == "gelu":
        acc = jax.nn.gelu(acc, approximate=True)
    o_ref[...] = acc.astype(o_ref.dtype)


def _gemm_res_ln_kernel(x_ref, w_ref, b_ref, r_ref, g_ref, bb_ref, o_ref, *, n_real, eps):
    """o = LayerNorm(x @ w + b + residual) fused in the GEMM epilogue (lane-padded rows)."""
    acc = jnp.dot(x_ref[...], w_ref[...], preferred_element_type=jnp.float32)
    acc = acc + b_ref[...] + r_ref[...].astype(jnp.float32)
    acc = _ln_rows(acc, g_ref[...], bb_ref[...], n_real, eps)
    o_ref[...] = acc.astype(o_ref.dtype)


def _gemm_emb_kernel(x_ref, w_ref, b_ref, pos_ref, g_ref, bb_ref, o_ref,
                     *, n_real, eps, emb_norm):
    """dense1 epilogue of EmbeddingsMineV2: [optional LN] -> + pos_embed -> LN."""
    acc = jnp.dot(x_ref[...], w_ref[...], preferred_element_type=jnp.float32)
    acc = acc + b_ref[...]
    if emb_norm:
        acc = _ln_rows(acc, g_ref[...], bb_ref[...], n_real, eps)
    acc = acc + pos_ref[...].astype(jnp.float32)
    acc = _ln_rows(acc, g_ref[...], bb_ref[...], n_real, eps)
    o_ref[...] = acc.astype(o_ref.dtype)


def _attn_kernel(q_ref, k_ref, v_ref, o_ref, *, scale):
    """softmax(q k^T * scale) v for one batch element, all heads batched per grid step."""
    q = q_ref[...].astype(jnp.float32) * scale                # (nh, S, D), scale folded into q
    k = k_ref[...].astype(jnp.float32)
    v = v_ref[...].astype(jnp.float32)
    s = jax.lax.dot_general(q, k, (((2,), (2,)), ((0,), (0,))),
                            preferred_element_type=jnp.float32)        # (nh, S, S)
    m = jnp.max(s, axis=-1, keepdims=True)
    p = jnp.exp(s - m)
    denom = jnp.sum(p, axis=-1, keepdims=True)
    p = p * pl.reciprocal(denom, approx=True)                 # divide on the EUP slot
    o = jax.lax.dot_general(p, v, (((2,), (1,)), ((0,), (0,))),
                            preferred_element_type=jnp.float32)        # (nh, S, D)
    o_ref[...] = o.astype(o_ref.dtype)


# ---------------------------------------------------------------------------
# Pallas wrappers
# ---------------------------------------------------------------------------
def _gemm_call(kernel, x, w_p, b_p, row_extras=(), par_extras=(), transcendentals=0):
    """M-tiled GEMM: x:(M,K) @ w_p:(K,n_pad) + epilogue inputs. Returns (M, n_pad) f32."""
    M, K = x.shape
    assert w_p.shape[0] == K, (x.shape, w_p.shape)
    n_pad = w_p.shape[1]
    tm = _pick_tm(M)
    m_pad = _round_up(M, tm)
    if m_pad != M:
        x = jnp.pad(x, ((0, m_pad - M), (0, 0)))
        row_extras = tuple(jnp.pad(r, ((0, m_pad - M), (0, 0))) for r in row_extras)

    x = x.astype(_MXU_DTYPE)
    w_p = w_p.astype(_MXU_DTYPE)

    x_spec = pl.BlockSpec((tm, K), lambda i: (i, 0))          # streamed row tiles
    w_spec = pl.BlockSpec((K, n_pad), lambda i: (0, 0))       # resident weight
    par_spec = pl.BlockSpec((1, n_pad), lambda i: (0, 0))     # resident bias/gamma/beta
    row_spec = pl.BlockSpec((tm, n_pad), lambda i: (i, 0))    # streamed residual / output

    in_specs = [x_spec, w_spec, par_spec]
    in_specs += [row_spec] * len(row_extras)
    in_specs += [par_spec] * len(par_extras)

    out = pl.pallas_call(
        kernel,
        out_shape=jax.ShapeDtypeStruct((m_pad, n_pad), jnp.float32),
        grid_spec=pltpu.PrefetchScalarGridSpec(
            num_scalar_prefetch=0,
            grid=(m_pad // tm,),
            in_specs=in_specs,
            out_specs=row_spec,
        ),
        compiler_params=pltpu.CompilerParams(
            dimension_semantics=("parallel",),                # shard row tiles across TCs
        ),
        cost_estimate=pl.CostEstimate(
            flops=2 * m_pad * K * n_pad,
            transcendentals=int(transcendentals),
            bytes_accessed=4 * (m_pad * K + K * n_pad + m_pad * n_pad
                                + sum(int(r.size) for r in row_extras)),
        ),
    )(x, w_p, b_p, *row_extras, *par_extras)
    return out if m_pad == M else out[:M]


def pallas_linear(x, w, b, *, act="none", out_pad=False):
    """act(x @ w + b). If out_pad, the output N is lane-padded to a multiple of 128
    (extra weight columns / bias lanes are zero, so padded output lanes are exactly 0)."""
    K, N = w.shape
    n_pad = _round_up(N, _LANE) if out_pad else N
    w_p = _pad_last(w, n_pad)
    b_p = _pad_last(b.reshape(1, N), n_pad)
    kernel = functools.partial(_gemm_kernel, act=act)
    return _gemm_call(kernel, x, w_p, b_p,
                      transcendentals=(x.shape[0] * n_pad if act == "gelu" else 0))


def pallas_linear_res_ln(x, w, b, residual, gamma, beta, *, n_real, eps):
    """LayerNorm(x @ w + b + residual) with the add+LN fused into the GEMM epilogue.
    `residual` is already lane-padded; output keeps the same padded width."""
    K, N = w.shape
    n_pad = residual.shape[1]
    w_p = _pad_last(w, n_pad)
    b_p = _pad_last(b.reshape(1, N), n_pad)
    g_p = _pad_last(gamma.reshape(1, -1), n_pad)
    bb_p = _pad_last(beta.reshape(1, -1), n_pad)
    kernel = functools.partial(_gemm_res_ln_kernel, n_real=n_real, eps=eps)
    return _gemm_call(kernel, x, w_p, b_p, row_extras=(residual,), par_extras=(g_p, bb_p))


def pallas_linear_emb(x, w, b, pos_pad, gamma, beta, *, n_real, eps, emb_norm):
    """dense1 + [optional LN] + pos_embed + LN fused into one GEMM call."""
    K, N = w.shape
    n_pad = pos_pad.shape[1]
    w_p = _pad_last(w, n_pad)
    b_p = _pad_last(b.reshape(1, N), n_pad)
    g_p = _pad_last(gamma.reshape(1, -1), n_pad)
    bb_p = _pad_last(beta.reshape(1, -1), n_pad)
    kernel = functools.partial(_gemm_emb_kernel, n_real=n_real, eps=eps, emb_norm=emb_norm)
    return _gemm_call(kernel, x, w_p, b_p, row_extras=(pos_pad,), par_extras=(g_p, bb_p))


def pallas_attention(q, k, v, *, n_heads, scale):
    """q,k,v:(B*nh, S, D). One grid step per batch element, all heads batched per step."""
    BH, S, D = q.shape
    B = BH // n_heads
    spec = pl.BlockSpec((n_heads, S, D), lambda i: (i, 0, 0))
    return pl.pallas_call(
        functools.partial(_attn_kernel, scale=scale),
        out_shape=jax.ShapeDtypeStruct((BH, S, D), q.dtype),
        grid_spec=pltpu.PrefetchScalarGridSpec(
            num_scalar_prefetch=0,
            grid=(B,),
            in_specs=[spec, spec, spec],
            out_specs=spec,
        ),
        compiler_params=pltpu.CompilerParams(dimension_semantics=("parallel",)),
        cost_estimate=pl.CostEstimate(
            flops=4 * BH * S * S * D,
            transcendentals=BH * S * S,
            bytes_accessed=4 * 4 * BH * S * D,
        ),
    )(q, k, v)


# ---------------------------------------------------------------------------
# Model forward (JAX orchestration around the Pallas kernels, NHWC end-to-end)
# ---------------------------------------------------------------------------
def conv_bn_relu_nhwc(x, p, padding, bn_eps=1e-5):
    """Conv2d(stride 1) + eval-mode BatchNorm + ReLU via im2col + Pallas GEMM. x: NHWC."""
    B, H, W, Cin = x.shape
    Cout, _, kh, kw = p['conv_w'].shape
    ph, pw = padding
    Hout = H + 2 * ph - kh + 1
    Wout = W + 2 * pw - kw + 1

    xp = jnp.pad(x, ((0, 0), (ph, ph), (pw, pw), (0, 0)))
    # TODO(synk): im2col patch extraction stays a wrapper-side XLA op (see header note).
    cols = jnp.concatenate(
        [xp[:, dh:dh + Hout, dw:dw + Wout, :] for dh in range(kh) for dw in range(kw)],
        axis=-1)                                             # (B, Hout, Wout, kh*kw*Cin)
    cols = cols.reshape(B * Hout * Wout, kh * kw * Cin)

    # Fold BN(eval) into the conv GEMM: y = relu((x@W + b - m) * g/sqrt(v+eps) + beta)
    scale = p['bn_g'] / jnp.sqrt(p['bn_v'] + bn_eps)                               # (Cout,)
    # K order (kh, kw, cin) to match the im2col column order above.
    w_mat = jnp.transpose(p['conv_w'], (2, 3, 1, 0)).reshape(kh * kw * Cin, Cout)
    w_mat = w_mat * scale[None, :]
    b_eff = (p['conv_b'] - p['bn_m']) * scale + p['bn_b']

    y = pallas_linear(cols, w_mat, b_eff, act="relu")        # (B*Hout*Wout, Cout), no N pad
    return y.reshape(B, Hout, Wout, Cout)                    # stays NHWC


def maxpool_w2_nhwc(x):
    B, H, W, C = x.shape
    return x.reshape(B, H, W // 2, 2, C).max(axis=3)


def embeddings_forward(x, params, cfg):
    """EmbeddingsMineV2: convs (NHWC) -> dense1 + (LN) + pos + LN (single fused GEMM).
    Returns lane-padded activations (B*S, E_pad)."""
    B, S, _, _ = x.shape
    E = cfg['hidden']
    E_pad = _round_up(E, _LANE)

    e = maxpool_w2_nhwc(conv_bn_relu_nhwc(x, params['conv1'], (2, 2)))
    e = maxpool_w2_nhwc(conv_bn_relu_nhwc(e, params['conv2'], (2, 2)))
    e = conv_bn_relu_nhwc(e, params['conv3'], (2, 2))
    e = conv_bn_relu_nhwc(e, params['conv4'], (2, 1))

    Bc, H, W, C = e.shape                                    # (B, S, 5, 128)
    feats = e.reshape(Bc * H, W * C)                         # (w major, c minor) == PyTorch order

    pos = params['pos_embed'][:H]                            # (S, E)
    pos_pad = _pad_last(jnp.broadcast_to(pos[None], (Bc, H, E)).reshape(Bc * H, E), E_pad)

    y_pad = pallas_linear_emb(
        feats, params['dense1']['w'].T, params['dense1']['b'],
        pos_pad, params['norm']['gamma'], params['norm']['beta'],
        n_real=E, eps=1e-12, emb_norm=cfg['emb_norm'])
    return y_pad, Bc, H


def encoder_layer_forward(y_pad, lp, cfg, B, S):
    """nn.TransformerEncoderLayer (post-LN, gelu, dropout=0) on lane-padded activations."""
    E = cfg['hidden']
    nh = cfg['n_heads']
    hd = E // nh
    E_pad = y_pad.shape[1]

    # QKV projection: input is lane-padded -> zero-pad the extra weight rows (K).
    w_qkv = _pad_rows(lp['in_proj_w'].T, E_pad)              # (E_pad, 3E)
    qkv = pallas_linear(y_pad, w_qkv, lp['in_proj_b'], out_pad=True)   # (B*S, pad(3E))
    q, k, v = qkv[:, 0:E], qkv[:, E:2 * E], qkv[:, 2 * E:3 * E]

    # TODO(synk): head split/merge are wrapper-side layout transposes.
    def to_heads(t):
        return t.reshape(B, S, nh, hd).transpose(0, 2, 1, 3).reshape(B * nh, S, hd)

    attn = pallas_attention(to_heads(q), to_heads(k), to_heads(v),
                            n_heads=nh, scale=1.0 / math.sqrt(hd))      # (B*nh, S, hd)
    attn = attn.reshape(B, nh, S, hd).transpose(0, 2, 1, 3).reshape(B * S, E)

    # out_proj + residual + LayerNorm1 fused in the GEMM epilogue.
    y1 = pallas_linear_res_ln(attn, lp['out_proj_w'].T, lp['out_proj_b'],
                              residual=y_pad, gamma=lp['norm1_g'], beta=lp['norm1_b'],
                              n_real=E, eps=1e-5)

    # FFN: gelu GEMM, then second GEMM fused with residual + LayerNorm2.
    w1 = _pad_rows(lp['lin1_w'].T, E_pad)                    # (E_pad, Fff)
    ff = pallas_linear(y1, w1, lp['lin1_b'], act="gelu", out_pad=True)  # (B*S, pad(Fff))
    w2 = _pad_rows(lp['lin2_w'].T, ff.shape[1])              # (Fff_pad, E)
    y2 = pallas_linear_res_ln(ff, w2, lp['lin2_b'],
                              residual=y1, gamma=lp['norm2_g'], beta=lp['norm2_b'],
                              n_real=E, eps=1e-5)
    return y2


def transformer_forward(x, params, cfg):
    y_pad, B, S = embeddings_forward(x, params, cfg)
    for lp in params['layers']:
        y_pad = encoder_layer_forward(y_pad, lp, cfg, B, S)
    E = cfg['hidden']
    return y_pad[:, :E].reshape(B, S, E)


# ---------------------------------------------------------------------------
# Parameters + pure-JAX reference
# ---------------------------------------------------------------------------
def init_params(key, cfg):
    E, Fff = cfg['hidden'], cfg['hidden_ff']
    ki = iter(jax.random.split(key, 64))

    def dense(k, shape, fan_in):
        bound = 1.0 / math.sqrt(fan_in)
        return jax.random.uniform(k, shape, jnp.float32, -bound, bound)

    def conv_block(cin, cout, kh, kw):
        fan_in = cin * kh * kw
        return {
            'conv_w': dense(next(ki), (cout, cin, kh, kw), fan_in),
            'conv_b': dense(next(ki), (cout,), fan_in),
            'bn_g': 1.0 + 0.1 * jax.random.normal(next(ki), (cout,), jnp.float32),
            'bn_b': 0.1 * jax.random.normal(next(ki), (cout,), jnp.float32),
            'bn_m': 0.1 * jax.random.normal(next(ki), (cout,), jnp.float32),
            'bn_v': 1.0 + 0.1 * jax.random.uniform(next(ki), (cout,), jnp.float32),
        }

    params = {
        'conv1': conv_block(cfg['channel'], 16, 5, 5),
        'conv2': conv_block(16, 32, 5, 5),
        'conv3': conv_block(32, 64, 5, 5),
        'conv4': conv_block(64, 128, 5, 3),
        'dense1': {'w': dense(next(ki), (E, 5 * 128), 5 * 128),
                   'b': dense(next(ki), (E,), 5 * 128)},
        'pos_embed': 0.02 * jax.random.normal(next(ki), (cfg['input_shape'][0], E), jnp.float32),
        'norm': {'gamma': 1.0 + 0.1 * jax.random.normal(next(ki), (E,), jnp.float32),
                 'beta': 0.1 * jax.random.normal(next(ki), (E,), jnp.float32)},
        'layers': [],
    }
    for _ in range(cfg['n_layers']):
        params['layers'].append({
            'in_proj_w': dense(next(ki), (3 * E, E), E),
            'in_proj_b': dense(next(ki), (3 * E,), E),
            'out_proj_w': dense(next(ki), (E, E), E),
            'out_proj_b': dense(next(ki), (E,), E),
            'lin1_w': dense(next(ki), (Fff, E), E),
            'lin1_b': dense(next(ki), (Fff,), E),
            'lin2_w': dense(next(ki), (E, Fff), Fff),
            'lin2_b': dense(next(ki), (E,), Fff),
            'norm1_g': 1.0 + 0.1 * jax.random.normal(next(ki), (E,), jnp.float32),
            'norm1_b': 0.1 * jax.random.normal(next(ki), (E,), jnp.float32),
            'norm2_g': 1.0 + 0.1 * jax.random.normal(next(ki), (E,), jnp.float32),
            'norm2_b': 0.1 * jax.random.normal(next(ki), (E,), jnp.float32),
        })
    return params


def reference_forward(x, params, cfg):
    HIGH = jax.lax.Precision.HIGHEST

    def ln(t, g, b, eps):
        mu = t.mean(-1, keepdims=True)
        var = ((t - mu) ** 2).mean(-1, keepdims=True)
        return (t - mu) / jnp.sqrt(var + eps) * g + b

    def conv_bn_relu(t, p, padding):
        out = jax.lax.conv_general_dilated(
            t, p['conv_w'], (1, 1),
            [(padding[0], padding[0]), (padding[1], padding[1])],
            dimension_numbers=('NCHW', 'OIHW', 'NCHW'), precision=HIGH)
        out = out + p['conv_b'][None, :, None, None]
        scale = (p['bn_g'] / jnp.sqrt(p['bn_v'] + 1e-5))[None, :, None, None]
        out = (out - p['bn_m'][None, :, None, None]) * scale + p['bn_b'][None, :, None, None]
        return jnp.maximum(out, 0.0)

    def pool_w2(t):
        n, c, h, w = t.shape
        return t.reshape(n, c, h, w // 2, 2).max(axis=-1)

    B = x.shape[0]
    E, nh = cfg['hidden'], cfg['n_heads']
    hd = E // nh

    e = jnp.transpose(x, (0, 3, 1, 2))
    e = pool_w2(conv_bn_relu(e, params['conv1'], (2, 2)))
    e = pool_w2(conv_bn_relu(e, params['conv2'], (2, 2)))
    e = conv_bn_relu(e, params['conv3'], (2, 2))
    e = conv_bn_relu(e, params['conv4'], (2, 1))
    n, c, s, w = e.shape
    e = jnp.transpose(e, (0, 2, 3, 1)).reshape(n, s, w * c)
    e = jnp.einsum('bsk,hk->bsh', e, params['dense1']['w'], precision=HIGH) + params['dense1']['b']
    if cfg['emb_norm']:
        e = ln(e, params['norm']['gamma'], params['norm']['beta'], 1e-12)
    e = ln(e + params['pos_embed'][:s][None], params['norm']['gamma'], params['norm']['beta'], 1e-12)

    y = e
    for lp in params['layers']:
        qkv = jnp.einsum('bse,fe->bsf', y, lp['in_proj_w'], precision=HIGH) + lp['in_proj_b']
        q, k, v = jnp.split(qkv, 3, axis=-1)
        qh = q.reshape(B, s, nh, hd).transpose(0, 2, 1, 3)
        kh = k.reshape(B, s, nh, hd).transpose(0, 2, 1, 3)
        vh = v.reshape(B, s, nh, hd).transpose(0, 2, 1, 3)
        att = jnp.einsum('bhqd,bhkd->bhqk', qh, kh, precision=HIGH) / math.sqrt(hd)
        att = jax.nn.softmax(att, axis=-1)
        a = jnp.einsum('bhqk,bhkd->bhqd', att, vh, precision=HIGH)
        a = a.transpose(0, 2, 1, 3).reshape(B, s, E)
        sa = jnp.einsum('bse,fe->bsf', a, lp['out_proj_w'], precision=HIGH) + lp['out_proj_b']
        y = ln(y + sa, lp['norm1_g'], lp['norm1_b'], 1e-5)
        ff = jnp.einsum('bse,fe->bsf', y, lp['lin1_w'], precision=HIGH) + lp['lin1_b']
        ff = jax.nn.gelu(ff, approximate=True)
        ff = jnp.einsum('bsf,ef->bse', ff, lp['lin2_w'], precision=HIGH) + lp['lin2_b']
        y = ln(y + ff, lp['norm2_g'], lp['norm2_b'], 1e-5)
    return y


# ---------------------------------------------------------------------------
if __name__ == "__main__":
    cfg = {
        'channel': 4,
        'hidden': 32,
        'hidden_ff': 64,
        'n_heads': 4,
        'n_layers': 2,
        'emb_norm': True,
        # (seq, width, channel); width must be 20 so that after the two (1,2) pools
        # the conv feature-map width is 5, matching dense1's 5*128 input features.
        'input_shape': (8, 20, 4),
    }

    key = jax.random.PRNGKey(0)
    kx, kp = jax.random.split(key)
    B, S, Wd, Cin = 2, cfg['input_shape'][0], cfg['input_shape'][1], cfg['channel']
    x = jax.random.normal(kx, (B, S, Wd, Cin), jnp.float32)
    params = init_params(kp, cfg)

    fwd = jax.jit(lambda xx, pp: transformer_forward(xx, pp, cfg))
    out = jax.block_until_ready(fwd(x, params))
    assert out.shape == (B, S, cfg['hidden'])

    ref_fn = jax.jit(lambda xx, pp: reference_forward(xx, pp, cfg))
    ref = jax.block_until_ready(ref_fn(x, params))
    max_err = float(jnp.max(jnp.abs(out - ref)))
    assert jnp.allclose(out, ref, atol=2e-2, rtol=2e-2), f"max abs err = {max_err}"

    print("KERNEL_OK")
</pallas_src>

<mosaic_0001>
module attributes {stable_mosaic.version = 11 : i64} {
  func.func @_gemm_kernel(%arg0: i32, %arg1: memref<320x100xf32, #tpu.memory_space<vmem>>, %arg2: memref<100x16xf32, #tpu.memory_space<vmem>>, %arg3: memref<1x16xf32, #tpu.memory_space<vmem>>, %arg4: memref<320x16xf32, #tpu.memory_space<vmem>>) attributes {dimension_semantics = [#tpu.dimension_semantics<parallel>], iteration_bounds = array<i64: 1>, scalar_prefetch = 0 : i64, scratch_operands = 0 : i64, tpu.core_type = #tpu.core_type<tc>, window_params = [{transform_indices = @transform_0, window_bounds = array<i64: 320, 100>}, {pipeline_mode = #tpu.pipeline_mode<synchronous>, transform_indices = @transform_1, window_bounds = array<i64: 100, 16>}, {pipeline_mode = #tpu.pipeline_mode<synchronous>, transform_indices = @transform_2, window_bounds = array<i64: 1, 16>}, {transform_indices = @transform_3, window_bounds = array<i64: 320, 16>}]} {
    %c0 = arith.constant 0 : index
    %c0_0 = arith.constant 0 : index
    %0 = vector.load %arg1[%c0, %c0_0] : memref<320x100xf32, #tpu.memory_space<vmem>>, vector<320x100xf32>
    %c0_1 = arith.constant 0 : index
    %c0_2 = arith.constant 0 : index
    %1 = vector.load %arg2[%c0_1, %c0_2] : memref<100x16xf32, #tpu.memory_space<vmem>>, vector<100x16xf32>
    %cst = arith.constant dense<0.000000e+00> : vector<320x16xf32>
    %2 = tpu.matmul %0, %1, %cst {dimension_numbers = #tpu.dot_dimension_numbers<[1], [0], [0], [1], [0, 0, 1, 1], [], []>} : vector<320x100xf32>, vector<100x16xf32>, vector<320x16xf32> -> vector<320x16xf32>
    %c0_3 = arith.constant 0 : index
    %c0_4 = arith.constant 0 : index
    %3 = vector.load %arg3[%c0_3, %c0_4] : memref<1x16xf32, #tpu.memory_space<vmem>>, vector<1x16xf32>
    %4 = vector.broadcast %3 : vector<1x16xf32> to vector<320x16xf32>
    %5 = arith.addf %2, %4 : vector<320x16xf32>
    %cst_5 = arith.constant 0.000000e+00 : f32
    %6 = vector.broadcast %cst_5 : f32 to vector<320x16xf32>
    %7 = arith.maximumf %5, %6 : vector<320x16xf32>
    %c0_6 = arith.constant 0 : index
    %c0_7 = arith.constant 0 : index
    %8 = vector.load %arg4[%c0_6, %c0_7] : memref<320x16xf32, #tpu.memory_space<vmem>>, vector<320x16xf32>
    tpu.vector_store %arg4[%c0_6, %c0_7], %7 {strides = array<i32>} : memref<320x16xf32, #tpu.memory_space<vmem>>, vector<320x16xf32>,
    return
  }
  func.func @transform_0(%arg0: i32) -> (i32, i32) {
    %c0_i32 = arith.constant 0 : i32
    %c0_i32_0 = arith.constant 0 : i32
    return %arg0, %c0_i32 : i32, i32
  }
  func.func @transform_1(%arg0: i32) -> (i32, i32) {
    %c0_i32 = arith.constant 0 : i32
    %c0_i32_0 = arith.constant 0 : i32
    %c0_i32_1 = arith.constant 0 : i32
    return %c0_i32, %c0_i32_0 : i32, i32
  }
  func.func @transform_2(%arg0: i32) -> (i32, i32) {
    %c0_i32 = arith.constant 0 : i32
    %c0_i32_0 = arith.constant 0 : i32
    %c0_i32_1 = arith.constant 0 : i32
    return %c0_i32, %c0_i32_0 : i32, i32
  }
  func.func @transform_3(%arg0: i32) -> (i32, i32) {
    %c0_i32 = arith.constant 0 : i32
    %c0_i32_0 = arith.constant 0 : i32
    return %arg0, %c0_i32 : i32, i32
  }
}

module attributes {stable_mosaic.version = 11 : i64} {
  func.func @_gemm_kernel(%arg0: i32, %arg1: memref<160x400xf32, #tpu.memory_space<vmem>>, %arg2: memref<400x32xf32, #tpu.memory_space<vmem>>, %arg3: memref<1x32xf32, #tpu.memory_space<vmem>>, %arg4: memref<160x32xf32, #tpu.memory_space<vmem>>) attributes {dimension_semantics = [#tpu.dimension_semantics<parallel>], iteration_bounds = array<i64: 1>, scalar_prefetch = 0 : i64, scratch_operands = 0 : i64, tpu.core_type = #tpu.core_type<tc>, window_params = [{transform_indices = @transform_0, window_bounds = array<i64: 160, 400>}, {pipeline_mode = #tpu.pipeline_mode<synchronous>, transform_indices = @transform_1, window_bounds = array<i64: 400, 32>}, {pipeline_mode = #tpu.pipeline_mode<synchronous>, transform_indices = @transform_2, window_bounds = array<i64: 1, 32>}, {transform_indices = @transform_3, window_bounds = array<i64: 160, 32>}]} {
    %c0 = arith.constant 0 : index
    %c0_0 = arith.constant 0 : index
    %0 = vector.load %arg1[%c0, %c0_0] : memref<160x400xf32, #tpu.memory_space<vmem>>, vector<160x400xf32>
    %c0_1 = arith.constant 0 : index
    %c0_2 = arith.constant 0 : index
    %1 = vector.load %arg2[%c0_1, %c0_2] : memref<400x32xf32, #tpu.memory_space<vmem>>, vector<400x32xf32>
    %cst = arith.constant dense<0.000000e+00> : vector<160x32xf32>
    %2 = tpu.matmul %0, %1, %cst {dimension_numbers = #tpu.dot_dimension_numbers<[1], [0], [0], [1], [0, 0, 1, 1], [], []>} : vector<160x400xf32>, vector<400x32xf32>, vector<160x32xf32> -> vector<160x32xf32>
    %c0_3 = arith.constant 0 : index
    %c0_4 = arith.constant 0 : index
    %3 = vector.load %arg3[%c0_3, %c0_4] : memref<1x32xf32, #tpu.memory_space<vmem>>, vector<1x32xf32>
    %4 = vector.broadcast %3 : vector<1x32xf32> to vector<160x32xf32>
    %5 = arith.addf %2, %4 : vector<160x32xf32>
    %cst_5 = arith.constant 0.000000e+00 : f32
    %6 = vector.broadcast %cst_5 : f32 to vector<160x32xf32>
    %7 = arith.maximumf %5, %6 : vector<160x32xf32>
    %c0_6 = arith.constant 0 : index
    %c0_7 = arith.constant 0 : index
    %8 = vector.load %arg4[%c0_6, %c0_7] : memref<160x32xf32, #tpu.memory_space<vmem>>, vector<160x32xf32>
    tpu.vector_store %arg4[%c0_6, %c0_7], %7 {strides = array<i32>} : memref<160x32xf32, #tpu.memory_space<vmem>>, vector<160x32xf32>,
    return
  }
  func.func @transform_0(%arg0: i32) -> (i32, i32) {
    %c0_i32 = arith.constant 0 : i32
    %c0_i32_0 = arith.constant 0 : i32
    return %arg0, %c0_i32 : i32, i32
  }
  func.func @transform_1(%arg0: i32) -> (i32, i32) {
    %c0_i32 = arith.constant 0 : i32
    %c0_i32_0 = arith.constant 0 : i32
    %c0_i32_1 = arith.constant 0 : i32
    return %c0_i32, %c0_i32_0 : i32, i32
  }
  func.func @transform_2(%arg0: i32) -> (i32, i32) {
    %c0_i32 = arith.constant 0 : i32
    %c0_i32_0 = arith.constant 0 : i32
    %c0_i32_1 = arith.constant 0 : i32
    return %c0_i32, %c0_i32_0 : i32, i32
  }
  func.func @transform_3(%arg0: i32) -> (i32, i32) {
    %c0_i32 = arith.constant 0 : i32
    %c0_i32_0 = arith.constant 0 : i32
    return %arg0, %c0_i32 : i32, i32
  }
}

module attributes {stable_mosaic.version = 11 : i64} {
  func.func @_gemm_kernel(%arg0: i32, %arg1: memref<80x800xf32, #tpu.memory_space<vmem>>, %arg2: memref<800x64xf32, #tpu.memory_space<vmem>>, %arg3: memref<1x64xf32, #tpu.memory_space<vmem>>, %arg4: memref<80x64xf32, #tpu.memory_space<vmem>>) attributes {dimension_semantics = [#tpu.dimension_semantics<parallel>], iteration_bounds = array<i64: 1>, scalar_prefetch = 0 : i64, scratch_operands = 0 : i64, tpu.core_type = #tpu.core_type<tc>, window_params = [{transform_indices = @transform_0, window_bounds = array<i64: 80, 800>}, {pipeline_mode = #tpu.pipeline_mode<synchronous>, transform_indices = @transform_1, window_bounds = array<i64: 800, 64>}, {pipeline_mode = #tpu.pipeline_mode<synchronous>, transform_indices = @transform_2, window_bounds = array<i64: 1, 64>}, {transform_indices = @transform_3, window_bounds = array<i64: 80, 64>}]} {
    %c0 = arith.constant 0 : index
    %c0_0 = arith.constant 0 : index
    %0 = vector.load %arg1[%c0, %c0_0] : memref<80x800xf32, #tpu.memory_space<vmem>>, vector<80x800xf32>
    %c0_1 = arith.constant 0 : index
    %c0_2 = arith.constant 0 : index
    %1 = vector.load %arg2[%c0_1, %c0_2] : memref<800x64xf32, #tpu.memory_space<vmem>>, vector<800x64xf32>
    %cst = arith.constant dense<0.000000e+00> : vector<80x64xf32>
    %2 = tpu.matmul %0, %1, %cst {dimension_numbers = #tpu.dot_dimension_numbers<[1], [0], [0], [1], [0, 0, 1, 1], [], []>} : vector<80x800xf32>, vector<800x64xf32>, vector<80x64xf32> -> vector<80x64xf32>
    %c0_3 = arith.constant 0 : index
    %c0_4 = arith.constant 0 : index
    %3 = vector.load %arg3[%c0_3, %c0_4] : memref<1x64xf32, #tpu.memory_space<vmem>>, vector<1x64xf32>
    %4 = vector.broadcast %3 : vector<1x64xf32> to vector<80x64xf32>
    %5 = arith.addf %2, %4 : vector<80x64xf32>
    %cst_5 = arith.constant 0.000000e+00 : f32
    %6 = vector.broadcast %cst_5 : f32 to vector<80x64xf32>
    %7 = arith.maximumf %5, %6 : vector<80x64xf32>
    %c0_6 = arith.constant 0 : index
    %c0_7 = arith.constant 0 : index
    %8 = vector.load %arg4[%c0_6, %c0_7] : memref<80x64xf32, #tpu.memory_space<vmem>>, vector<80x64xf32>
    tpu.vector_store %arg4[%c0_6, %c0_7], %7 {strides = array<i32>} : memref<80x64xf32, #tpu.memory_space<vmem>>, vector<80x64xf32>,
    return
  }
  func.func @transform_0(%arg0: i32) -> (i32, i32) {
    %c0_i32 = arith.constant 0 : i32
    %c0_i32_0 = arith.constant 0 : i32
    return %arg0, %c0_i32 : i32, i32
  }
  func.func @transform_1(%arg0: i32) -> (i32, i32) {
    %c0_i32 = arith.constant 0 : i32
    %c0_i32_0 = arith.constant 0 : i32
    %c0_i32_1 = arith.constant 0 : i32
    return %c0_i32, %c0_i32_0 : i32, i32
  }
  func.func @transform_2(%arg0: i32) -> (i32, i32) {
    %c0_i32 = arith.constant 0 : i32
    %c0_i32_0 = arith.constant 0 : i32
    %c0_i32_1 = arith.constant 0 : i32
    return %c0_i32, %c0_i32_0 : i32, i32
  }
  func.func @transform_3(%arg0: i32) -> (i32, i32) {
    %c0_i32 = arith.constant 0 : i32
    %c0_i32_0 = arith.constant 0 : i32
    return %arg0, %c0_i32 : i32, i32
  }
}

module attributes {stable_mosaic.version = 11 : i64} {
  func.func @_gemm_kernel(%arg0: i32, %arg1: memref<80x960xf32, #tpu.memory_space<vmem>>, %arg2: memref<960x128xf32, #tpu.memory_space<vmem>>, %arg3: memref<1x128xf32, #tpu.memory_space<vmem>>, %arg4: memref<80x128xf32, #tpu.memory_space<vmem>>) attributes {dimension_semantics = [#tpu.dimension_semantics<parallel>], iteration_bounds = array<i64: 1>, scalar_prefetch = 0 : i64, scratch_operands = 0 : i64, tpu.core_type = #tpu.core_type<tc>, window_params = [{transform_indices = @transform_0, window_bounds = array<i64: 80, 960>}, {pipeline_mode = #tpu.pipeline_mode<synchronous>, transform_indices = @transform_1, window_bounds = array<i64: 960, 128>}, {pipeline_mode = #tpu.pipeline_mode<synchronous>, transform_indices = @transform_2, window_bounds = array<i64: 1, 128>}, {transform_indices = @transform_3, window_bounds = array<i64: 80, 128>}]} {
    %c0 = arith.constant 0 : index
    %c0_0 = arith.constant 0 : index
    %0 = vector.load %arg1[%c0, %c0_0] : memref<80x960xf32, #tpu.memory_space<vmem>>, vector<80x960xf32>
    %c0_1 = arith.constant 0 : index
    %c0_2 = arith.constant 0 : index
    %1 = vector.load %arg2[%c0_1, %c0_2] : memref<960x128xf32, #tpu.memory_space<vmem>>, vector<960x128xf32>
    %cst = arith.constant dense<0.000000e+00> : vector<80x128xf32>
    %2 = tpu.matmul %0, %1, %cst {dimension_numbers = #tpu.dot_dimension_numbers<[1], [0], [0], [1], [0, 0, 1, 1], [], []>} : vector<80x960xf32>, vector<960x128xf32>, vector<80x128xf32> -> vector<80x128xf32>
    %c0_3 = arith.constant 0 : index
    %c0_4 = arith.constant 0 : index
    %3 = vector.load %arg3[%c0_3, %c0_4] : memref<1x128xf32, #tpu.memory_space<vmem>>, vector<1x128xf32>
    %4 = vector.broadcast %3 : vector<1x128xf32> to vector<80x128xf32>
    %5 = arith.addf %2, %4 : vector<80x128xf32>
    %cst_5 = arith.constant 0.000000e+00 : f32
    %6 = vector.broadcast %cst_5 : f32 to vector<80x128xf32>
    %7 = arith.maximumf %5, %6 : vector<80x128xf32>
    %c0_6 = arith.constant 0 : index
    %c0_7 = arith.constant 0 : index
    %8 = vector.load %arg4[%c0_6, %c0_7] : memref<80x128xf32, #tpu.memory_space<vmem>>, vector<80x128xf32>
    tpu.vector_store %arg4[%c0_6, %c0_7], %7 {strides = array<i32>} : memref<80x128xf32, #tpu.memory_space<vmem>>, vector<80x128xf32>,
    return
  }
  func.func @transform_0(%arg0: i32) -> (i32, i32) {
    %c0_i32 = arith.constant 0 : i32
    %c0_i32_0 = arith.constant 0 : i32
    return %arg0, %c0_i32 : i32, i32
  }
  func.func @transform_1(%arg0: i32) -> (i32, i32) {
    %c0_i32 = arith.constant 0 : i32
    %c0_i32_0 = arith.constant 0 : i32
    %c0_i32_1 = arith.constant 0 : i32
    return %c0_i32, %c0_i32_0 : i32, i32
  }
  func.func @transform_2(%arg0: i32) -> (i32, i32) {
    %c0_i32 = arith.constant 0 : i32
    %c0_i32_0 = arith.constant 0 : i32
    %c0_i32_1 = arith.constant 0 : i32
    return %c0_i32, %c0_i32_0 : i32, i32
  }
  func.func @transform_3(%arg0: i32) -> (i32, i32) {
    %c0_i32 = arith.constant 0 : i32
    %c0_i32_0 = arith.constant 0 : i32
    return %arg0, %c0_i32 : i32, i32
  }
}

module attributes {stable_mosaic.version = 11 : i64} {
  func.func @_gemm_emb_kernel(%arg0: i32, %arg1: memref<16x640xf32, #tpu.memory_space<vmem>>, %arg2: memref<640x128xf32, #tpu.memory_space<vmem>>, %arg3: memref<1x128xf32, #tpu.memory_space<vmem>>, %arg4: memref<16x128xf32, #tpu.memory_space<vmem>>, %arg5: memref<1x128xf32, #tpu.memory_space<vmem>>, %arg6: memref<1x128xf32, #tpu.memory_space<vmem>>, %arg7: memref<16x128xf32, #tpu.memory_space<vmem>>) attributes {dimension_semantics = [#tpu.dimension_semantics<parallel>], iteration_bounds = array<i64: 1>, scalar_prefetch = 0 : i64, scratch_operands = 0 : i64, tpu.core_type = #tpu.core_type<tc>, window_params = [{transform_indices = @transform_0, window_bounds = array<i64: 16, 640>}, {pipeline_mode = #tpu.pipeline_mode<synchronous>, transform_indices = @transform_1, window_bounds = array<i64: 640, 128>}, {pipeline_mode = #tpu.pipeline_mode<synchronous>, transform_indices = @transform_2, window_bounds = array<i64: 1, 128>}, {transform_indices = @transform_3, window_bounds = array<i64: 16, 128>}, {pipeline_mode = #tpu.pipeline_mode<synchronous>, transform_indices = @transform_4, window_bounds = array<i64: 1, 128>}, {pipeline_mode = #tpu.pipeline_mode<synchronous>, transform_indices = @transform_5, window_bounds = array<i64: 1, 128>}, {transform_indices = @transform_6, window_bounds = array<i64: 16, 128>}]} {
    %c0 = arith.constant 0 : index
    %c0_0 = arith.constant 0 : index
    %0 = vector.load %arg1[%c0, %c0_0] : memref<16x640xf32, #tpu.memory_space<vmem>>, vector<16x640xf32>
    %c0_1 = arith.constant 0 : index
    %c0_2 = arith.constant 0 : index
    %1 = vector.load %arg2[%c0_1, %c0_2] : memref<640x128xf32, #tpu.memory_space<vmem>>, vector<640x128xf32>
    %cst = arith.constant dense<0.000000e+00> : vector<16x128xf32>
    %2 = tpu.matmul %0, %1, %cst {dimension_numbers = #tpu.dot_dimension_numbers<[1], [0], [0], [1], [0, 0, 1, 1], [], []>} : vector<16x640xf32>, vector<640x128xf32>, vector<16x128xf32> -> vector<16x128xf32>
    %c0_3 = arith.constant 0 : index
    %c0_4 = arith.constant 0 : index
    %3 = vector.load %arg3[%c0_3, %c0_4] : memref<1x128xf32, #tpu.memory_space<vmem>>, vector<1x128xf32>
    %4 = vector.broadcast %3 : vector<1x128xf32> to vector<16x128xf32>
    %5 = arith.addf %2, %4 : vector<16x128xf32>
    %c0_5 = arith.constant 0 : index
    %c0_6 = arith.constant 0 : index
    %6 = vector.load %arg5[%c0_5, %c0_6] : memref<1x128xf32, #tpu.memory_space<vmem>>, vector<1x128xf32>
    %c0_7 = arith.constant 0 : index
    %c0_8 = arith.constant 0 : index
    %7 = vector.load %arg6[%c0_7, %c0_8] : memref<1x128xf32, #tpu.memory_space<vmem>>, vector<1x128xf32>
    %cst_9 = arith.constant dense<0.000000e+00> : vector<16xf32>
    %8 = vector.multi_reduction <add>, %5, %cst_9 [1] : vector<16x128xf32> to vector<16xf32>
    %9 = vector.shape_cast %8 : vector<16xf32> to vector<16x1xf32>
    %cst_10 = arith.constant 3.125000e-02 : f32
    %10 = vector.broadcast %cst_10 : f32 to vector<16x1xf32>
    %11 = arith.mulf %9, %10 : vector<16x1xf32>
    %12 = vector.broadcast %11 : vector<16x1xf32> to vector<16x128xf32>
    %13 = arith.subf %5, %12 : vector<16x128xf32>
    %14 = tpu.iota {dimensions = array<i32: 1>} : vector<16x128xi32>
    %c32_i32 = arith.constant 32 : i32
    %15 = vector.broadcast %c32_i32 : i32 to vector<16x128xi32>
    %16 = arith.cmpi slt, %14, %15 : vector<16x128xi32>
    %cst_11 = arith.constant 0.000000e+00 : f32
    %17 = vector.broadcast %cst_11 : f32 to vector<16x128xf32>
    %18 = arith.select %16, %13, %17 : vector<16x128xi1>, vector<16x128xf32>
    %19 = arith.mulf %18, %18 : vector<16x128xf32>
    %cst_12 = arith.constant dense<0.000000e+00> : vector<16xf32>
    %20 = vector.multi_reduction <add>, %19, %cst_12 [1] : vector<16x128xf32> to vector<16xf32>
    %21 = vector.shape_cast %20 : vector<16xf32> to vector<16x1xf32>
    %cst_13 = arith.constant 3.125000e-02 : f32
    %22 = vector.broadcast %cst_13 : f32 to vector<16x1xf32>
    %23 = arith.mulf %21, %22 : vector<16x1xf32>
    %cst_14 = arith.constant 9.99999996E-13 : f32
    %24 = vector.broadcast %cst_14 : f32 to vector<16x1xf32>
    %25 = arith.addf %23, %24 : vector<16x1xf32>
    %26 = math.rsqrt %25 : vector<16x1xf32>
    %27 = vector.broadcast %26 : vector<16x1xf32> to vector<16x128xf32>
    %28 = arith.mulf %18, %27 : vector<16x128xf32>
    %29 = vector.broadcast %6 : vector<1x128xf32> to vector<16x128xf32>
    %30 = arith.mulf %28, %29 : vector<16x128xf32>
    %31 = vector.broadcast %7 : vector<1x128xf32> to vector<16x128xf32>
    %32 = arith.addf %30, %31 : vector<16x128xf32>
    %c0_15 = arith.constant 0 : index
    %c0_16 = arith.constant 0 : index
    %33 = vector.load %arg4[%c0_15, %c0_16] : memref<16x128xf32, #tpu.memory_space<vmem>>, vector<16x128xf32>
    %34 = arith.addf %32, %33 : vector<16x128xf32>
    %c0_17 = arith.constant 0 : index
    %c0_18 = arith.constant 0 : index
    %35 = vector.load %arg5[%c0_17, %c0_18] : memref<1x128xf32, #tpu.memory_space<vmem>>, vector<1x128xf32>
    %c0_19 = arith.constant 0 : index
    %c0_20 = arith.constant 0 : index
    %36 = vector.load %arg6[%c0_19, %c0_20] : memref<1x128xf32, #tpu.memory_space<vmem>>, vector<1x128xf32>
    %cst_21 = arith.constant dense<0.000000e+00> : vector<16xf32>
    %37 = vector.multi_reduction <add>, %34, %cst_21 [1] : vector<16x128xf32> to vector<16xf32>
    %38 = vector.shape_cast %37 : vector<16xf32> to vector<16x1xf32>
    %cst_22 = arith.constant 3.125000e-02 : f32
    %39 = vector.broadcast %cst_22 : f32 to vector<16x1xf32>
    %40 = arith.mulf %38, %39 : vector<16x1xf32>
    %41 = vector.broadcast %40 : vector<16x1xf32> to vector<16x128xf32>
    %42 = arith.subf %34, %41 : vector<16x128xf32>
    %43 = tpu.iota {dimensions = array<i32: 1>} : vector<16x128xi32>
    %c32_i32_23 = arith.constant 32 : i32
    %44 = vector.broadcast %c32_i32_23 : i32 to vector<16x128xi32>
    %45 = arith.cmpi slt, %43, %44 : vector<16x128xi32>
    %cst_24 = arith.constant 0.000000e+00 : f32
    %46 = vector.broadcast %cst_24 : f32 to vector<16x128xf32>
    %47 = arith.select %45, %42, %46 : vector<16x128xi1>, vector<16x128xf32>
    %48 = arith.mulf %47, %47 : vector<16x128xf32>
    %cst_25 = arith.constant dense<0.000000e+00> : vector<16xf32>
    %49 = vector.multi_reduction <add>, %48, %cst_25 [1] : vector<16x128xf32> to vector<16xf32>
    %50 = vector.shape_cast %49 : vector<16xf32> to vector<16x1xf32>
    %cst_26 = arith.constant 3.125000e-02 : f32
    %51 = vector.broadcast %cst_26 : f32 to vector<16x1xf32>
    %52 = arith.mulf %50, %51 : vector<16x1xf32>
    %cst_27 = arith.constant 9.99999996E-13 : f32
    %53 = vector.broadcast %cst_27 : f32 to vector<16x1xf32>
    %54 = arith.addf %52, %53 : vector<16x1xf32>
    %55 = math.rsqrt %54 : vector<16x1xf32>
    %56 = vector.broadcast %55 : vector<16x1xf32> to vector<16x128xf32>
    %57 = arith.mulf %47, %56 : vector<16x128xf32>
    %58 = vector.broadcast %35 : vector<1x128xf32> to vector<16x128xf32>
    %59 = arith.mulf %57, %58 : vector<16x128xf32>
    %60 = vector.broadcast %36 : vector<1x128xf32> to vector<16x128xf32>
    %61 = arith.addf %59, %60 : vector<16x128xf32>
    %c0_28 = arith.constant 0 : index
    %c0_29 = arith.constant 0 : index
    %62 = vector.load %arg7[%c0_28, %c0_29] : memref<16x128xf32, #tpu.memory_space<vmem>>, vector<16x128xf32>
    tpu.vector_store %arg7[%c0_28, %c0_29], %61 {strides = array<i32>} : memref<16x128xf32, #tpu.memory_space<vmem>>, vector<16x128xf32>,
    return
  }
  func.func @transform_0(%arg0: i32) -> (i32, i32) {
    %c0_i32 = arith.constant 0 : i32
    %c0_i32_0 = arith.constant 0 : i32
    return %arg0, %c0_i32 : i32, i32
  }
  func.func @transform_1(%arg0: i32) -> (i32, i32) {
    %c0_i32 = arith.constant 0 : i32
    %c0_i32_0 = arith.constant 0 : i32
    %c0_i32_1 = arith.constant 0 : i32
    return %c0_i32, %c0_i32_0 : i32, i32
  }
  func.func @transform_2(%arg0: i32) -> (i32, i32) {
    %c0_i32 = arith.constant 0 : i32
    %c0_i32_0 = arith.constant 0 : i32
    %c0_i32_1 = arith.constant 0 : i32
    return %c0_i32, %c0_i32_0 : i32, i32
  }
  func.func @transform_3(%arg0: i32) -> (i32, i32) {
    %c0_i32 = arith.constant 0 : i32
    %c0_i32_0 = arith.constant 0 : i32
    return %arg0, %c0_i32 : i32, i32
  }
  func.func @transform_4(%arg0: i32) -> (i32, i32) {
    %c0_i32 = arith.constant 0 : i32
    %c0_i32_0 = arith.constant 0 : i32
    %c0_i32_1 = arith.constant 0 : i32
    return %c0_i32, %c0_i32_0 : i32, i32
  }
  func.func @transform_5(%arg0: i32) -> (i32, i32) {
    %c0_i32 = arith.constant 0 : i32
    %c0_i32_0 = arith.constant 0 : i32
    %c0_i32_1 = arith.constant 0 : i32
    return %c0_i32, %c0_i32_0 : i32, i32
  }
  func.func @transform_6(%arg0: i32) -> (i32, i32) {
    %c0_i32 = arith.constant 0 : i32
    %c0_i32_0 = arith.constant 0 : i32
    return %arg0, %c0_i32 : i32, i32
  }
}

module attributes {stable_mosaic.version = 11 : i64} {
  func.func @_gemm_kernel(%arg0: i32, %arg1: memref<16x128xf32, #tpu.memory_space<vmem>>, %arg2: memref<128x128xf32, #tpu.memory_space<vmem>>, %arg3: memref<1x128xf32, #tpu.memory_space<vmem>>, %arg4: memref<16x128xf32, #tpu.memory_space<vmem>>) attributes {dimension_semantics = [#tpu.dimension_semantics<parallel>], iteration_bounds = array<i64: 1>, scalar_prefetch = 0 : i64, scratch_operands = 0 : i64, tpu.core_type = #tpu.core_type<tc>, window_params = [{transform_indices = @transform_0, window_bounds = array<i64: 16, 128>}, {pipeline_mode = #tpu.pipeline_mode<synchronous>, transform_indices = @transform_1, window_bounds = array<i64: 128, 128>}, {pipeline_mode = #tpu.pipeline_mode<synchronous>, transform_indices = @transform_2, window_bounds = array<i64: 1, 128>}, {transform_indices = @transform_3, window_bounds = array<i64: 16, 128>}]} {
    %c0 = arith.constant 0 : index
    %c0_0 = arith.constant 0 : index
    %0 = vector.load %arg1[%c0, %c0_0] : memref<16x128xf32, #tpu.memory_space<vmem>>, vector<16x128xf32>
    %c0_1 = arith.constant 0 : index
    %c0_2 = arith.constant 0 : index
    %1 = vector.load %arg2[%c0_1, %c0_2] : memref<128x128xf32, #tpu.memory_space<vmem>>, vector<128x128xf32>
    %cst = arith.constant dense<0.000000e+00> : vector<16x128xf32>
    %2 = tpu.matmul %0, %1, %cst {dimension_numbers = #tpu.dot_dimension_numbers<[1], [0], [0], [1], [0, 0, 1, 1], [], []>} : vector<16x128xf32>, vector<128x128xf32>, vector<16x128xf32> -> vector<16x128xf32>
    %c0_3 = arith.constant 0 : index
    %c0_4 = arith.constant 0 : index
    %3 = vector.load %arg3[%c0_3, %c0_4] : memref<1x128xf32, #tpu.memory_space<vmem>>, vector<1x128xf32>
    %4 = vector.broadcast %3 : vector<1x128xf32> to vector<16x128xf32>
    %5 = arith.addf %2, %4 : vector<16x128xf32>
    %c0_5 = arith.constant 0 : index
    %c0_6 = arith.constant 0 : index
    %6 = vector.load %arg4[%c0_5, %c0_6] : memref<16x128xf32, #tpu.memory_space<vmem>>, vector<16x128xf32>
    tpu.vector_store %arg4[%c0_5, %c0_6], %5 {strides = array<i32>} : memref<16x128xf32, #tpu.memory_space<vmem>>, vector<16x128xf32>,
    return
  }
  func.func @transform_0(%arg0: i32) -> (i32, i32) {
    %c0_i32 = arith.constant 0 : i32
    %c0_i32_0 = arith.constant 0 : i32
    return %arg0, %c0_i32 : i32, i32
  }
  func.func @transform_1(%arg0: i32) -> (i32, i32) {
    %c0_i32 = arith.constant 0 : i32
    %c0_i32_0 = arith.constant 0 : i32
    %c0_i32_1 = arith.constant 0 : i32
    return %c0_i32, %c0_i32_0 : i32, i32
  }
  func.func @transform_2(%arg0: i32) -> (i32, i32) {
    %c0_i32 = arith.constant 0 : i32
    %c0_i32_0 = arith.constant 0 : i32
    %c0_i32_1 = arith.constant 0 : i32
    return %c0_i32, %c0_i32_0 : i32, i32
  }
  func.func @transform_3(%arg0: i32) -> (i32, i32) {
    %c0_i32 = arith.constant 0 : i32
    %c0_i32_0 = arith.constant 0 : i32
    return %arg0, %c0_i32 : i32, i32
  }
}

module attributes {stable_mosaic.version = 11 : i64} {
  func.func @_attn_kernel(%arg0: i32, %arg1: memref<4x8x8xf32, #tpu.memory_space<vmem>>, %arg2: memref<4x8x8xf32, #tpu.memory_space<vmem>>, %arg3: memref<4x8x8xf32, #tpu.memory_space<vmem>>, %arg4: memref<4x8x8xf32, #tpu.memory_space<vmem>>) attributes {dimension_semantics = [#tpu.dimension_semantics<parallel>], iteration_bounds = array<i64: 2>, scalar_prefetch = 0 : i64, scratch_operands = 0 : i64, tpu.core_type = #tpu.core_type<tc>, window_params = [{transform_indices = @transform_0, window_bounds = array<i64: 4, 8, 8>}, {transform_indices = @transform_1, window_bounds = array<i64: 4, 8, 8>}, {transform_indices = @transform_2, window_bounds = array<i64: 4, 8, 8>}, {transform_indices = @transform_3, window_bounds = array<i64: 4, 8, 8>}]} {
    %c0 = arith.constant 0 : index
    %c0_0 = arith.constant 0 : index
    %c0_1 = arith.constant 0 : index
    %0 = vector.load %arg1[%c0, %c0_0, %c0_1] : memref<4x8x8xf32, #tpu.memory_space<vmem>>, vector<4x8x8xf32>
    %cst = arith.constant 0.353553385 : f32
    %1 = vector.broadcast %cst : f32 to vector<4x8x8xf32>
    %2 = arith.mulf %0, %1 : vector<4x8x8xf32>
    %c0_2 = arith.constant 0 : index
    %c0_3 = arith.constant 0 : index
    %c0_4 = arith.constant 0 : index
    %3 = vector.load %arg2[%c0_2, %c0_3, %c0_4] : memref<4x8x8xf32, #tpu.memory_space<vmem>>, vector<4x8x8xf32>
    %c0_5 = arith.constant 0 : index
    %c0_6 = arith.constant 0 : index
    %c0_7 = arith.constant 0 : index
    %4 = vector.load %arg3[%c0_5, %c0_6, %c0_7] : memref<4x8x8xf32, #tpu.memory_space<vmem>>, vector<4x8x8xf32>
    %cst_8 = arith.constant dense<0.000000e+00> : vector<4x8x8xf32>
    %5 = tpu.matmul %2, %3, %cst_8 {dimension_numbers = #tpu.dot_dimension_numbers<[2], [2], [1], [1], [0, 0, 0, 1, 1, 1], [0], [0]>} : vector<4x8x8xf32>, vector<4x8x8xf32>, vector<4x8x8xf32> -> vector<4x8x8xf32>
    %cst_9 = arith.constant dense<0xFF800000> : vector<4x8xf32>
    %6 = vector.multi_reduction <maximumf>, %5, %cst_9 [2] : vector<4x8x8xf32> to vector<4x8xf32>
    %7 = vector.shape_cast %6 : vector<4x8xf32> to vector<4x8x1xf32>
    %8 = vector.broadcast %7 : vector<4x8x1xf32> to vector<4x8x8xf32>
    %9 = arith.subf %5, %8 : vector<4x8x8xf32>
    %10 = math.exp %9 : vector<4x8x8xf32>
    %cst_10 = arith.constant dense<0.000000e+00> : vector<4x8xf32>
    %11 = vector.multi_reduction <add>, %10, %cst_10 [2] : vector<4x8x8xf32> to vector<4x8xf32>
    %12 = vector.shape_cast %11 : vector<4x8xf32> to vector<4x8x1xf32>
    %13 = tpu.reciprocal %12 {approx = true} : vector<4x8x1xf32> -> vector<4x8x1xf32>
    %14 = vector.broadcast %13 : vector<4x8x1xf32> to vector<4x8x8xf32>
    %15 = arith.mulf %10, %14 : vector<4x8x8xf32>
    %cst_11 = arith.constant dense<0.000000e+00> : vector<4x8x8xf32>
    %16 = tpu.matmul %15, %4, %cst_11 {dimension_numbers = #tpu.dot_dimension_numbers<[2], [1], [1], [2], [0, 0, 0, 1, 1, 2], [0], [0]>} : vector<4x8x8xf32>, vector<4x8x8xf32>, vector<4x8x8xf32> -> vector<4x8x8xf32>
    %c0_12 = arith.constant 0 : index
    %c0_13 = arith.constant 0 : index
    %c0_14 = arith.constant 0 : index
    %17 = vector.load %arg4[%c0_12, %c0_13, %c0_14] : memref<4x8x8xf32, #tpu.memory_space<vmem>>, vector<4x8x8xf32>
    tpu.vector_store %arg4[%c0_12, %c0_13, %c0_14], %16 {strides = array<i32>} : memref<4x8x8xf32, #tpu.memory_space<vmem>>, vector<4x8x8xf32>,
    return
  }
  func.func @transform_0(%arg0: i32) -> (i32, i32, i32) {
    %c0_i32 = arith.constant 0 : i32
    %c0_i32_0 = arith.constant 0 : i32
    %c0_i32_1 = arith.constant 0 : i32
    return %arg0, %c0_i32, %c0_i32_0 : i32, i32, i32
  }
  func.func @transform_1(%arg0: i32) -> (i32, i32, i32) {
    %c0_i32 = arith.constant 0 : i32
    %c0_i32_0 = arith.constant 0 : i32
    %c0_i32_1 = arith.constant 0 : i32
    return %arg0, %c0_i32, %c0_i32_0 : i32, i32, i32
  }
  func.func @transform_2(%arg0: i32) -> (i32, i32, i32) {
    %c0_i32 = arith.constant 0 : i32
    %c0_i32_0 = arith.constant 0 : i32
    %c0_i32_1 = arith.constant 0 : i32
    return %arg0, %c0_i32, %c0_i32_0 : i32, i32, i32
  }
  func.func @transform_3(%arg0: i32) -> (i32, i32, i32) {
    %c0_i32 = arith.constant 0 : i32
    %c0_i32_0 = arith.constant 0 : i32
    %c0_i32_1 = arith.constant 0 : i32
    return %arg0, %c0_i32, %c0_i32_0 : i32, i32, i32
  }
}

module attributes {stable_mosaic.version = 11 : i64} {
  func.func @_gemm_kernel(%arg0: i32, %arg1: memref<16x128xf32, #tpu.memory_space<vmem>>, %arg2: memref<128x128xf32, #tpu.memory_space<vmem>>, %arg3: memref<1x128xf32, #tpu.memory_space<vmem>>, %arg4: memref<16x128xf32, #tpu.memory_space<vmem>>) attributes {dimension_semantics = [#tpu.dimension_semantics<parallel>], iteration_bounds = array<i64: 1>, scalar_prefetch = 0 : i64, scratch_operands = 0 : i64, tpu.core_type = #tpu.core_type<tc>, window_params = [{transform_indices = @transform_0, window_bounds = array<i64: 16, 128>}, {pipeline_mode = #tpu.pipeline_mode<synchronous>, transform_indices = @transform_1, window_bounds = array<i64: 128, 128>}, {pipeline_mode = #tpu.pipeline_mode<synchronous>, transform_indices = @transform_2, window_bounds = array<i64: 1, 128>}, {transform_indices = @transform_3, window_bounds = array<i64: 16, 128>}]} {
    %c0 = arith.constant 0 : index
    %c0_0 = arith.constant 0 : index
    %0 = vector.load %arg1[%c0, %c0_0] : memref<16x128xf32, #tpu.memory_space<vmem>>, vector<16x128xf32>
    %c0_1 = arith.constant 0 : index
    %c0_2 = arith.constant 0 : index
    %1 = vector.load %arg2[%c0_1, %c0_2] : memref<128x128xf32, #tpu.memory_space<vmem>>, vector<128x128xf32>
    %cst = arith.constant dense<0.000000e+00> : vector<16x128xf32>
    %2 = tpu.matmul %0, %1, %cst {dimension_numbers = #tpu.dot_dimension_numbers<[1], [0], [0], [1], [0, 0, 1, 1], [], []>} : vector<16x128xf32>, vector<128x128xf32>, vector<16x128xf32> -> vector<16x128xf32>
    %c0_3 = arith.constant 0 : index
    %c0_4 = arith.constant 0 : index
    %3 = vector.load %arg3[%c0_3, %c0_4] : memref<1x128xf32, #tpu.memory_space<vmem>>, vector<1x128xf32>
    %4 = vector.broadcast %3 : vector<1x128xf32> to vector<16x128xf32>
    %5 = arith.addf %2, %4 : vector<16x128xf32>
    %6 = arith.mulf %5, %5 : vector<16x128xf32>
    %7 = arith.mulf %5, %6 : vector<16x128xf32>
    %cst_5 = arith.constant 4.471500e-02 : f32
    %8 = vector.broadcast %cst_5 : f32 to vector<16x128xf32>
    %9 = arith.mulf %8, %7 : vector<16x128xf32>
    %10 = arith.addf %5, %9 : vector<16x128xf32>
    %cst_6 = arith.constant 0.797884583 : f32
    %11 = vector.broadcast %cst_6 : f32 to vector<16x128xf32>
    %12 = arith.mulf %11, %10 : vector<16x128xf32>
    %13 = math.tanh %12 : vector<16x128xf32>
    %cst_7 = arith.constant 1.000000e+00 : f32
    %14 = vector.broadcast %cst_7 : f32 to vector<16x128xf32>
    %15 = arith.addf %14, %13 : vector<16x128xf32>
    %cst_8 = arith.constant 5.000000e-01 : f32
    %16 = vector.broadcast %cst_8 : f32 to vector<16x128xf32>
    %17 = arith.mulf %16, %15 : vector<16x128xf32>
    %18 = arith.mulf %5, %17 : vector<16x128xf32>
    %c0_9 = arith.constant 0 : index
    %c0_10 = arith.constant 0 : index
    %19 = vector.load %arg4[%c0_9, %c0_10] : memref<16x128xf32, #tpu.memory_space<vmem>>, vector<16x128xf32>
    tpu.vector_store %arg4[%c0_9, %c0_10], %18 {strides = array<i32>} : memref<16x128xf32, #tpu.memory_space<vmem>>, vector<16x128xf32>,
    return
  }
  func.func @transform_0(%arg0: i32) -> (i32, i32) {
    %c0_i32 = arith.constant 0 : i32
    %c0_i32_0 = arith.constant 0 : i32
    return %arg0, %c0_i32 : i32, i32
  }
  func.func @transform_1(%arg0: i32) -> (i32, i32) {
    %c0_i32 = arith.constant 0 : i32
    %c0_i32_0 = arith.constant 0 : i32
    %c0_i32_1 = arith.constant 0 : i32
    return %c0_i32, %c0_i32_0 : i32, i32
  }
  func.func @transform_2(%arg0: i32) -> (i32, i32) {
    %c0_i32 = arith.constant 0 : i32
    %c0_i32_0 = arith.constant 0 : i32
    %c0_i32_1 = arith.constant 0 : i32
    return %c0_i32, %c0_i32_0 : i32, i32
  }
  func.func @transform_3(%arg0: i32) -> (i32, i32) {
    %c0_i32 = arith.constant 0 : i32
    %c0_i32_0 = arith.constant 0 : i32
    return %arg0, %c0_i32 : i32, i32
  }
}

module attributes {stable_mosaic.version = 11 : i64} {
  func.func @_gemm_res_ln_kernel(%arg0: i32, %arg1: memref<16x32xf32, #tpu.memory_space<vmem>>, %arg2: memref<32x128xf32, #tpu.memory_space<vmem>>, %arg3: memref<1x128xf32, #tpu.memory_space<vmem>>, %arg4: memref<16x128xf32, #tpu.memory_space<vmem>>, %arg5: memref<1x128xf32, #tpu.memory_space<vmem>>, %arg6: memref<1x128xf32, #tpu.memory_space<vmem>>, %arg7: memref<16x128xf32, #tpu.memory_space<vmem>>) attributes {dimension_semantics = [#tpu.dimension_semantics<parallel>], iteration_bounds = array<i64: 1>, scalar_prefetch = 0 : i64, scratch_operands = 0 : i64, tpu.core_type = #tpu.core_type<tc>, window_params = [{transform_indices = @transform_0, window_bounds = array<i64: 16, 32>}, {pipeline_mode = #tpu.pipeline_mode<synchronous>, transform_indices = @transform_1, window_bounds = array<i64: 32, 128>}, {pipeline_mode = #tpu.pipeline_mode<synchronous>, transform_indices = @transform_2, window_bounds = array<i64: 1, 128>}, {transform_indices = @transform_3, window_bounds = array<i64: 16, 128>}, {pipeline_mode = #tpu.pipeline_mode<synchronous>, transform_indices = @transform_4, window_bounds = array<i64: 1, 128>}, {pipeline_mode = #tpu.pipeline_mode<synchronous>, transform_indices = @transform_5, window_bounds = array<i64: 1, 128>}, {transform_indices = @transform_6, window_bounds = array<i64: 16, 128>}]} {
    %c0 = arith.constant 0 : index
    %c0_0 = arith.constant 0 : index
    %0 = vector.load %arg1[%c0, %c0_0] : memref<16x32xf32, #tpu.memory_space<vmem>>, vector<16x32xf32>
    %c0_1 = arith.constant 0 : index
    %c0_2 = arith.constant 0 : index
    %1 = vector.load %arg2[%c0_1, %c0_2] : memref<32x128xf32, #tpu.memory_space<vmem>>, vector<32x128xf32>
    %cst = arith.constant dense<0.000000e+00> : vector<16x128xf32>
    %2 = tpu.matmul %0, %1, %cst {dimension_numbers = #tpu.dot_dimension_numbers<[1], [0], [0], [1], [0, 0, 1, 1], [], []>} : vector<16x32xf32>, vector<32x128xf32>, vector<16x128xf32> -> vector<16x128xf32>
    %c0_3 = arith.constant 0 : index
    %c0_4 = arith.constant 0 : index
    %3 = vector.load %arg3[%c0_3, %c0_4] : memref<1x128xf32, #tpu.memory_space<vmem>>, vector<1x128xf32>
    %4 = vector.broadcast %3 : vector<1x128xf32> to vector<16x128xf32>
    %5 = arith.addf %2, %4 : vector<16x128xf32>
    %c0_5 = arith.constant 0 : index
    %c0_6 = arith.constant 0 : index
    %6 = vector.load %arg4[%c0_5, %c0_6] : memref<16x128xf32, #tpu.memory_space<vmem>>, vector<16x128xf32>
    %7 = arith.addf %5, %6 : vector<16x128xf32>
    %c0_7 = arith.constant 0 : index
    %c0_8 = arith.constant 0 : index
    %8 = vector.load %arg5[%c0_7, %c0_8] : memref<1x128xf32, #tpu.memory_space<vmem>>, vector<1x128xf32>
    %c0_9 = arith.constant 0 : index
    %c0_10 = arith.constant 0 : index
    %9 = vector.load %arg6[%c0_9, %c0_10] : memref<1x128xf32, #tpu.memory_space<vmem>>, vector<1x128xf32>
    %cst_11 = arith.constant dense<0.000000e+00> : vector<16xf32>
    %10 = vector.multi_reduction <add>, %7, %cst_11 [1] : vector<16x128xf32> to vector<16xf32>
    %11 = vector.shape_cast %10 : vector<16xf32> to vector<16x1xf32>
    %cst_12 = arith.constant 3.125000e-02 : f32
    %12 = vector.broadcast %cst_12 : f32 to vector<16x1xf32>
    %13 = arith.mulf %11, %12 : vector<16x1xf32>
    %14 = vector.broadcast %13 : vector<16x1xf32> to vector<16x128xf32>
    %15 = arith.subf %7, %14 : vector<16x128xf32>
    %16 = tpu.iota {dimensions = array<i32: 1>} : vector<16x128xi32>
    %c32_i32 = arith.constant 32 : i32
    %17 = vector.broadcast %c32_i32 : i32 to vector<16x128xi32>
    %18 = arith.cmpi slt, %16, %17 : vector<16x128xi32>
    %cst_13 = arith.constant 0.000000e+00 : f32
    %19 = vector.broadcast %cst_13 : f32 to vector<16x128xf32>
    %20 = arith.select %18, %15, %19 : vector<16x128xi1>, vector<16x128xf32>
    %21 = arith.mulf %20, %20 : vector<16x128xf32>
    %cst_14 = arith.constant dense<0.000000e+00> : vector<16xf32>
    %22 = vector.multi_reduction <add>, %21, %cst_14 [1] : vector<16x128xf32> to vector<16xf32>
    %23 = vector.shape_cast %22 : vector<16xf32> to vector<16x1xf32>
    %cst_15 = arith.constant 3.125000e-02 : f32
    %24 = vector.broadcast %cst_15 : f32 to vector<16x1xf32>
    %25 = arith.mulf %23, %24 : vector<16x1xf32>
    %cst_16 = arith.constant 9.99999974E-6 : f32
    %26 = vector.broadcast %cst_16 : f32 to vector<16x1xf32>
    %27 = arith.addf %25, %26 : vector<16x1xf32>
    %28 = math.rsqrt %27 : vector<16x1xf32>
    %29 = vector.broadcast %28 : vector<16x1xf32> to vector<16x128xf32>
    %30 = arith.mulf %20, %29 : vector<16x128xf32>
    %31 = vector.broadcast %8 : vector<1x128xf32> to vector<16x128xf32>
    %32 = arith.mulf %30, %31 : vector<16x128xf32>
    %33 = vector.broadcast %9 : vector<1x128xf32> to vector<16x128xf32>
    %34 = arith.addf %32, %33 : vector<16x128xf32>
    %c0_17 = arith.constant 0 : index
    %c0_18 = arith.constant 0 : index
    %35 = vector.load %arg7[%c0_17, %c0_18] : memref<16x128xf32, #tpu.memory_space<vmem>>, vector<16x128xf32>
    tpu.vector_store %arg7[%c0_17, %c0_18], %34 {strides = array<i32>} : memref<16x128xf32, #tpu.memory_space<vmem>>, vector<16x128xf32>,
    return
  }
  func.func @transform_0(%arg0: i32) -> (i32, i32) {
    %c0_i32 = arith.constant 0 : i32
    %c0_i32_0 = arith.constant 0 : i32
    return %arg0, %c0_i32 : i32, i32
  }
  func.func @transform_1(%arg0: i32) -> (i32, i32) {
    %c0_i32 = arith.constant 0 : i32
    %c0_i32_0 = arith.constant 0 : i32
    %c0_i32_1 = arith.constant 0 : i32
    return %c0_i32, %c0_i32_0 : i32, i32
  }
  func.func @transform_2(%arg0: i32) -> (i32, i32) {
    %c0_i32 = arith.constant 0 : i32
    %c0_i32_0 = arith.constant 0 : i32
    %c0_i32_1 = arith.constant 0 : i32
    return %c0_i32, %c0_i32_0 : i32, i32
  }
  func.func @transform_3(%arg0: i32) -> (i32, i32) {
    %c0_i32 = arith.constant 0 : i32
    %c0_i32_0 = arith.constant 0 : i32
    return %arg0, %c0_i32 : i32, i32
  }
  func.func @transform_4(%arg0: i32) -> (i32, i32) {
    %c0_i32 = arith.constant 0 : i32
    %c0_i32_0 = arith.constant 0 : i32
    %c0_i32_1 = arith.constant 0 : i32
    return %c0_i32, %c0_i32_0 : i32, i32
  }
  func.func @transform_5(%arg0: i32) -> (i32, i32) {
    %c0_i32 = arith.constant 0 : i32
    %c0_i32_0 = arith.constant 0 : i32
    %c0_i32_1 = arith.constant 0 : i32
    return %c0_i32, %c0_i32_0 : i32, i32
  }
  func.func @transform_6(%arg0: i32) -> (i32, i32) {
    %c0_i32 = arith.constant 0 : i32
    %c0_i32_0 = arith.constant 0 : i32
    return %arg0, %c0_i32 : i32, i32
  }
}

module attributes {stable_mosaic.version = 11 : i64} {
  func.func @_gemm_res_ln_kernel(%arg0: i32, %arg1: memref<16x128xf32, #tpu.memory_space<vmem>>, %arg2: memref<128x128xf32, #tpu.memory_space<vmem>>, %arg3: memref<1x128xf32, #tpu.memory_space<vmem>>, %arg4: memref<16x128xf32, #tpu.memory_space<vmem>>, %arg5: memref<1x128xf32, #tpu.memory_space<vmem>>, %arg6: memref<1x128xf32, #tpu.memory_space<vmem>>, %arg7: memref<16x128xf32, #tpu.memory_space<vmem>>) attributes {dimension_semantics = [#tpu.dimension_semantics<parallel>], iteration_bounds = array<i64: 1>, scalar_prefetch = 0 : i64, scratch_operands = 0 : i64, tpu.core_type = #tpu.core_type<tc>, window_params = [{transform_indices = @transform_0, window_bounds = array<i64: 16, 128>}, {pipeline_mode = #tpu.pipeline_mode<synchronous>, transform_indices = @transform_1, window_bounds = array<i64: 128, 128>}, {pipeline_mode = #tpu.pipeline_mode<synchronous>, transform_indices = @transform_2, window_bounds = array<i64: 1, 128>}, {transform_indices = @transform_3, window_bounds = array<i64: 16, 128>}, {pipeline_mode = #tpu.pipeline_mode<synchronous>, transform_indices = @transform_4, window_bounds = array<i64: 1, 128>}, {pipeline_mode = #tpu.pipeline_mode<synchronous>, transform_indices = @transform_5, window_bounds = array<i64: 1, 128>}, {transform_indices = @transform_6, window_bounds = array<i64: 16, 128>}]} {
    %c0 = arith.constant 0 : index
    %c0_0 = arith.constant 0 : index
    %0 = vector.load %arg1[%c0, %c0_0] : memref<16x128xf32, #tpu.memory_space<vmem>>, vector<16x128xf32>
    %c0_1 = arith.constant 0 : index
    %c0_2 = arith.constant 0 : index
    %1 = vector.load %arg2[%c0_1, %c0_2] : memref<128x128xf32, #tpu.memory_space<vmem>>, vector<128x128xf32>
    %cst = arith.constant dense<0.000000e+00> : vector<16x128xf32>
    %2 = tpu.matmul %0, %1, %cst {dimension_numbers = #tpu.dot_dimension_numbers<[1], [0], [0], [1], [0, 0, 1, 1], [], []>} : vector<16x128xf32>, vector<128x128xf32>, vector<16x128xf32> -> vector<16x128xf32>
    %c0_3 = arith.constant 0 : index
    %c0_4 = arith.constant 0 : index
    %3 = vector.load %arg3[%c0_3, %c0_4] : memref<1x128xf32, #tpu.memory_space<vmem>>, vector<1x128xf32>
    %4 = vector.broadcast %3 : vector<1x128xf32> to vector<16x128xf32>
    %5 = arith.addf %2, %4 : vector<16x128xf32>
    %c0_5 = arith.constant 0 : index
    %c0_6 = arith.constant 0 : index
    %6 = vector.load %arg4[%c0_5, %c0_6] : memref<16x128xf32, #tpu.memory_space<vmem>>, vector<16x128xf32>
    %7 = arith.addf %5, %6 : vector<16x128xf32>
    %c0_7 = arith.constant 0 : index
    %c0_8 = arith.constant 0 : index
    %8 = vector.load %arg5[%c0_7, %c0_8] : memref<1x128xf32, #tpu.memory_space<vmem>>, vector<1x128xf32>
    %c0_9 = arith.constant 0 : index
    %c0_10 = arith.constant 0 : index
    %9 = vector.load %arg6[%c0_9, %c0_10] : memref<1x128xf32, #tpu.memory_space<vmem>>, vector<1x128xf32>
    %cst_11 = arith.constant dense<0.000000e+00> : vector<16xf32>
    %10 = vector.multi_reduction <add>, %7, %cst_11 [1] : vector<16x128xf32> to vector<16xf32>
    %11 = vector.shape_cast %10 : vector<16xf32> to vector<16x1xf32>
    %cst_12 = arith.constant 3.125000e-02 : f32
    %12 = vector.broadcast %cst_12 : f32 to vector<16x1xf32>
    %13 = arith.mulf %11, %12 : vector<16x1xf32>
    %14 = vector.broadcast %13 : vector<16x1xf32> to vector<16x128xf32>
    %15 = arith.subf %7, %14 : vector<16x128xf32>
    %16 = tpu.iota {dimensions = array<i32: 1>} : vector<16x128xi32>
    %c32_i32 = arith.constant 32 : i32
    %17 = vector.broadcast %c32_i32 : i32 to vector<16x128xi32>
    %18 = arith.cmpi slt, %16, %17 : vector<16x128xi32>
    %cst_13 = arith.constant 0.000000e+00 : f32
    %19 = vector.broadcast %cst_13 : f32 to vector<16x128xf32>
    %20 = arith.select %18, %15, %19 : vector<16x128xi1>, vector<16x128xf32>
    %21 = arith.mulf %20, %20 : vector<16x128xf32>
    %cst_14 = arith.constant dense<0.000000e+00> : vector<16xf32>
    %22 = vector.multi_reduction <add>, %21, %cst_14 [1] : vector<16x128xf32> to vector<16xf32>
    %23 = vector.shape_cast %22 : vector<16xf32> to vector<16x1xf32>
    %cst_15 = arith.constant 3.125000e-02 : f32
    %24 = vector.broadcast %cst_15 : f32 to vector<16x1xf32>
    %25 = arith.mulf %23, %24 : vector<16x1xf32>
    %cst_16 = arith.constant 9.99999974E-6 : f32
    %26 = vector.broadcast %cst_16 : f32 to vector<16x1xf32>
    %27 = arith.addf %25, %26 : vector<16x1xf32>
    %28 = math.rsqrt %27 : vector<16x1xf32>
    %29 = vector.broadcast %28 : vector<16x1xf32> to vector<16x128xf32>
    %30 = arith.mulf %20, %29 : vector<16x128xf32>
    %31 = vector.broadcast %8 : vector<1x128xf32> to vector<16x128xf32>
    %32 = arith.mulf %30, %31 : vector<16x128xf32>
    %33 = vector.broadcast %9 : vector<1x128xf32> to vector<16x128xf32>
    %34 = arith.addf %32, %33 : vector<16x128xf32>
    %c0_17 = arith.constant 0 : index
    %c0_18 = arith.constant 0 : index
    %35 = vector.load %arg7[%c0_17, %c0_18] : memref<16x128xf32, #tpu.memory_space<vmem>>, vector<16x128xf32>
    tpu.vector_store %arg7[%c0_17, %c0_18], %34 {strides = array<i32>} : memref<16x128xf32, #tpu.memory_space<vmem>>, vector<16x128xf32>,
    return
  }
  func.func @transform_0(%arg0: i32) -> (i32, i32) {
    %c0_i32 = arith.constant 0 : i32
    %c0_i32_0 = arith.constant 0 : i32
    return %arg0, %c0_i32 : i32, i32
  }
  func.func @transform_1(%arg0: i32) -> (i32, i32) {
    %c0_i32 = arith.constant 0 : i32
    %c0_i32_0 = arith.constant 0 : i32
    %c0_i32_1 = arith.constant 0 : i32
    return %c0_i32, %c0_i32_0 : i32, i32
  }
  func.func @transform_2(%arg0: i32) -> (i32, i32) {
    %c0_i32 = arith.constant 0 : i32
    %c0_i32_0 = arith.constant 0 : i32
    %c0_i32_1 = arith.constant 0 : i32
    return %c0_i32, %c0_i32_0 : i32, i32
  }
  func.func @transform_3(%arg0: i32) -> (i32, i32) {
    %c0_i32 = arith.constant 0 : i32
    %c0_i32_0 = arith.constant 0 : i32
    return %arg0, %c0_i32 : i32, i32
  }
  func.func @transform_4(%arg0: i32) -> (i32, i32) {
    %c0_i32 = arith.constant 0 : i32
    %c0_i32_0 = arith.constant 0 : i32
    %c0_i32_1 = arith.constant 0 : i32
    return %c0_i32, %c0_i32_0 : i32, i32
  }
  func.func @transform_5(%arg0: i32) -> (i32, i32) {
    %c0_i32 = arith.constant 0 : i32
    %c0_i32_0 = arith.constant 0 : i32
    %c0_i32_1 = arith.constant 0 : i32
    return %c0_i32, %c0_i32_0 : i32, i32
  }
  func.func @transform_6(%arg0: i32) -> (i32, i32) {
    %c0_i32 = arith.constant 0 : i32
    %c0_i32_0 = arith.constant 0 : i32
    return %arg0, %c0_i32 : i32, i32
  }
}

</mosaic_0001>

<bundles_post_ra>
// kernel: _lambda_.15
= control target key start
LH: loop header
LB: loop body
LE: loop exit
PB: predicated region body
PF: predicated region fallthrough
CT: control target
= control target key end

     0   :  { %vm195_vm0 = vcmask 1043456   ;;  %vm74_vm1 = vcmask 818176   ;;  %vm504_vm2 = vcmask 130048   ;;  %s1180_s1 = inlined_call_operand.vmem [shape: f32[100,16], index: 1, kind: input, shape index: {}]   ;;  %s1181_s0 = inlined_call_operand.vmem [shape: f32[320,100], index: 0, kind: input, shape index: {}]   ;;  %s1182_s2 = inlined_call_operand.vmem [shape: f32[1,16], index: 2, kind: input, shape index: {}]   ;;  %s1183_s3 = inlined_call_operand.vmem [shape: f32[320,16], index: 3, kind: output, shape index: {}]  }
   0x1   :  { %v66_v0 = vld [vmem:[%s1180_s1 + $0x60] sm:$0xf]  ;;  %v65_v1 = vld [vmem:[%s1180_s1 + $0x58] sm:$0xff]  ;;  %v64_v2 = vld [vmem:[%s1180_s1 + $0x50] sm:$0xff] }
   0x2   :  { %644 = vmatprep.subr.msk.mxu0 %vm195_vm0, %v66_v0  ;;  %730 = vmatprep.subr.msk.mxu1 %vm195_vm0, %v66_v0  ;;  %v63_v3 = vld [vmem:[%s1180_s1 + $0x48] sm:$0xff]  ;;  %v62_v4 = vld [vmem:[%s1180_s1 + $0x40] sm:$0xff]  ;;  %v61_v5 = vld [vmem:[%s1180_s1 + $0x38] sm:$0xff] }
   0x3   :  { %645 = vmatpush3.msk.msra.mxu0 %vm195_vm0, %v66_v0  ;;  %743 = vmatpush3.msk.msra.mxu1 %vm195_vm0, %v66_v0  ;;  %v60_v6 = vld [vmem:[%s1180_s1 + $0x30] sm:$0xff]  ;;  %v59_v7 = vld [vmem:[%s1180_s1 + $0x28] sm:$0xff]  ;;  %v58_v8 = vld [vmem:[%s1180_s1 + $0x20] sm:$0xff] }
   0x4   :  { %646 = vmatprep.subr.mxu0 %v65_v1  ;;  %731 = vmatprep.subr.mxu1 %v65_v1  ;;  %v57_v9 = vld [vmem:[%s1180_s1 + $0x18] sm:$0xff]  ;;  %v56_v10 = vld [vmem:[%s1180_s1 + $0x10] sm:$0xff]  ;;  %v55_v11 = vld [vmem:[%s1180_s1 + $0x8] sm:$0xff] }
   0x5   :  { %647 = vmatpush3.msra.mxu0 %v65_v1  ;;  %744 = vmatpush3.msra.mxu1 %v65_v1  ;;  %v54_v12 = vld [vmem:[%s1180_s1] sm:$0xff]  ;;  %v15_v15 = vld [vmem:[%s1181_s0 + $0x8] sm:$0xff]  ;;  %v16_v17 = vld [vmem:[%s1181_s0 + $0x10] sm:$0xff] }
   0x6   :  { %648 = vmatprep.subr.mxu0 %v64_v2  ;;  %732 = vmatprep.subr.mxu1 %v64_v2  ;;  %v14_v13 = vld [vmem:[%s1181_s0] sm:$0xff]  ;;  %v35_v16 = vld [vmem:[%s1181_s0 + $0xa8] sm:$0xff]  ;;  %v36_v18 = vld [vmem:[%s1181_s0 + $0xb0] sm:$0xff] }
   0x7   :  { %649 = vmatpush3.msra.mxu0 %v64_v2  ;;  %745 = vmatpush3.msra.mxu1 %v64_v2  ;;  %v34_v14 = vld [vmem:[%s1181_s0 + $0xa0] sm:$0xff]  ;;  %v17_v19 = vld [vmem:[%s1181_s0 + $0x18] sm:$0xff]  ;;  %v19_v23 = vld [vmem:[%s1181_s0 + $0x28] sm:$0xff] }
   0x8   :  { %650 = vmatprep.subr.mxu0 %v63_v3  ;;  %733 = vmatprep.subr.mxu1 %v63_v3  ;;  %v37_v20 = vld [vmem:[%s1181_s0 + $0xb8] sm:$0xff]  ;;  %v18_v21 = vld [vmem:[%s1181_s0 + $0x20] sm:$0xff]  ;;  %v39_v24 = vld [vmem:[%s1181_s0 + $0xc8] sm:$0xff] }
   0x9   :  { %651 = vmatpush3.msra.mxu0 %v63_v3  ;;  %746 = vmatpush3.msra.mxu1 %v63_v3  ;;  %v38_v22 = vld [vmem:[%s1181_s0 + $0xc0] sm:$0xff]  ;;  %v20_v25 = vld [vmem:[%s1181_s0 + $0x30] sm:$0xff]  ;;  %v21_v27 = vld [vmem:[%s1181_s0 + $0x38] sm:$0xff] }
   0xa   :  { %652 = vmatprep.subr.mxu0 %v62_v4  ;;  %734 = vmatprep.subr.mxu1 %v62_v4  ;;  %v40_v26 = vld [vmem:[%s1181_s0 + $0xd0] sm:$0xff]  ;;  %v41_v28 = vld [vmem:[%s1181_s0 + $0xd8] sm:$0xff]  ;;  %v22_v29 = vld [vmem:[%s1181_s0 + $0x40] sm:$0xff] }
   0xb   :  { %653 = vmatpush3.msra.mxu0 %v62_v4  ;;  %747 = vmatpush3.msra.mxu1 %v62_v4  ;;  %v42_v30 = vld [vmem:[%s1181_s0 + $0xe0] sm:$0xff]  ;;  %v23_v31 = vld [vmem:[%s1181_s0 + $0x48] sm:$0xff]  ;;  %v24_v33 = vld [vmem:[%s1181_s0 + $0x50] sm:$0xff] }
   0xc   :  { %654 = vmatprep.subr.mxu0 %v61_v5  ;;  %735 = vmatprep.subr.mxu1 %v61_v5  ;;  %v43_v32 = vld [vmem:[%s1181_s0 + $0xe8] sm:$0xff]  ;;  %v44_v34 = vld [vmem:[%s1181_s0 + $0xf0] sm:$0xff]  ;;  %v25_v35 = vld [vmem:[%s1181_s0 + $0x58] sm:$0xff] }
   0xd   :  { %655 = vmatpush3.msra.mxu0 %v61_v5  ;;  %748 = vmatpush3.msra.mxu1 %v61_v5  ;;  %v45_v36 = vld [vmem:[%s1181_s0 + $0xf8] sm:$0xff]  ;;  %v26_v37 = vld [vmem:[%s1181_s0 + $0x60] sm:$0xff]  ;;  %v27_v39 = vld [vmem:[%s1181_s0 + $0x68] sm:$0xff] }
   0xe   :  { %656 = vmatprep.subr.mxu0 %v60_v6  ;;  %736 = vmatprep.subr.mxu1 %v60_v6  ;;  %v46_v38 = vld [vmem:[%s1181_s0 + $0x100] sm:$0xff]  ;;  %v47_v40 = vld [vmem:[%s1181_s0 + $0x108] sm:$0xff]  ;;  %v28_v41 = vld [vmem:[%s1181_s0 + $0x70] sm:$0xff] }
   0xf   :  { %657 = vmatpush3.msra.mxu0 %v60_v6  ;;  %749 = vmatpush3.msra.mxu1 %v60_v6  ;;  %v48_v42 = vld [vmem:[%s1181_s0 + $0x110] sm:$0xff]  ;;  %v29_v43 = vld [vmem:[%s1181_s0 + $0x78] sm:$0xff]  ;;  %v30_v45 = vld [vmem:[%s1181_s0 + $0x80] sm:$0xff] }
  0x10   :  { %658 = vmatprep.subr.mxu0 %v59_v7  ;;  %737 = vmatprep.subr.mxu1 %v59_v7  ;;  %v49_v44 = vld [vmem:[%s1181_s0 + $0x118] sm:$0xff]  ;;  %v50_v46 = vld [vmem:[%s1181_s0 + $0x120] sm:$0xff]  ;;  %v31_v47 = vld [vmem:[%s1181_s0 + $0x88] sm:$0xff] }
  0x11   :  { %659 = vmatpush3.msra.mxu0 %v59_v7  ;;  %750 = vmatpush3.msra.mxu1 %v59_v7  ;;  %v51_v48 = vld [vmem:[%s1181_s0 + $0x128] sm:$0xff]  ;;  %v32_v49 = vld [vmem:[%s1181_s0 + $0x90] sm:$0xff]  ;;  %v33_v51 = vld [vmem:[%s1181_s0 + $0x98] sm:$0xff] }
  0x12   :  { %660 = vmatprep.subr.mxu0 %v58_v8  ;;  %738 = vmatprep.subr.mxu1 %v58_v8  ;;  %v52_v50 = vld [vmem:[%s1181_s0 + $0x130] sm:$0xff]  ;;  %v53_v52 = vld [vmem:[%s1181_s0 + $0x138] sm:$0xff]  ;;  %v978_v53 = vld [vmem:[%s1182_s2] ss:$0 sm:$0xff] }
  0x13   :  { %661 = vmatpush3.msra.mxu0 %v58_v8  ;;  %751 = vmatpush3.msra.mxu1 %v58_v8 }
  0x14   :  { %662 = vmatprep.subr.mxu0 %v57_v9  ;;  %739 = vmatprep.subr.mxu1 %v57_v9 }
  0x15   :  { %663 = vmatpush3.msra.mxu0 %v57_v9  ;;  %752 = vmatpush3.msra.mxu1 %v57_v9 }
  0x16   :  { %664 = vmatprep.subr.mxu0 %v56_v10  ;;  %740 = vmatprep.subr.mxu1 %v56_v10 }
  0x17   :  { %665 = vmatpush3.msra.mxu0 %v56_v10  ;;  %753 = vmatpush3.msra.mxu1 %v56_v10 }
  0x18   :  { %666 = vmatprep.subr.mxu0 %v55_v11  ;;  %741 = vmatprep.subr.mxu1 %v55_v11 }
  0x19   :  { %667 = vmatpush3.msra.mxu0 %v55_v11  ;;  %754 = vmatpush3.msra.mxu1 %v55_v11 }
  0x1a   :  { %668 = vmatprep.subr.mxu0 %v54_v12  ;;  %742 = vmatprep.subr.mxu1 %v54_v12 }
  0x1b   :  { %669 = vmatpush3.msra.mxu0 %v54_v12  ;;  %755 = vmatpush3.msra.mxu1 %v54_v12 }
  0x1c   :  { %670 = vmatprep.mubr.msk.f32.mxu0 %vm74_vm1, %v14_v13  ;;  %700 = vmatprep.mubr.msk.f32.mxu1 %vm74_vm1, %v34_v14 }
  0x1d   :  { %671 = vmatmul.mubr.msk.f32.vlgmr.msra.gmra.mxu0 %vm74_vm1, %v15_v15  ;;  %701 = vmatmul.mubr.msk.f32.vlgmr.msra.gmra.mxu1 %vm74_vm1, %v35_v16 }
  0x1e   :  { %673 = vmatprep.mubr.msk.f32.mxu0 %vm74_vm1, %v16_v17  ;;  %703 = vmatprep.mubr.msk.f32.mxu1 %vm74_vm1, %v36_v18 }
  0x21   :  { %674 = vmatmul.mubr.msk.f32.gmra.mxu0 %vm74_vm1, %v17_v19  ;;  %704 = vmatmul.mubr.msk.f32.gmra.mxu1 %vm74_vm1, %v37_v20 }
  0x22   :  { %676 = vmatprep.mubr.msk.f32.mxu0 %vm74_vm1, %v18_v21  ;;  %706 = vmatprep.mubr.msk.f32.mxu1 %vm74_vm1, %v38_v22 }
  0x25   :  { %677 = vmatmul.mubr.msk.f32.gmra.mxu0 %vm74_vm1, %v19_v23  ;;  %707 = vmatmul.mubr.msk.f32.gmra.mxu1 %vm74_vm1, %v39_v24 }
  0x26   :  { %679 = vmatprep.mubr.msk.f32.mxu0 %vm74_vm1, %v20_v25  ;;  %709 = vmatprep.mubr.msk.f32.mxu1 %vm74_vm1, %v40_v26 }
  0x29   :  { %680 = vmatmul.mubr.msk.f32.gmra.mxu0 %vm74_vm1, %v21_v27  ;;  %710 = vmatmul.mubr.msk.f32.gmra.mxu1 %vm74_vm1, %v41_v28 }
  0x2a   :  { %682 = vmatprep.mubr.msk.f32.mxu0 %vm74_vm1, %v22_v29  ;;  %712 = vmatprep.mubr.msk.f32.mxu1 %vm74_vm1, %v42_v30 }
  0x2d   :  { %683 = vmatmul.mubr.msk.f32.gmra.mxu0 %vm74_vm1, %v23_v31  ;;  %713 = vmatmul.mubr.msk.f32.gmra.mxu1 %vm74_vm1, %v43_v32 }
  0x2e   :  { %685 = vmatprep.mubr.msk.f32.mxu0 %vm74_vm1, %v24_v33  ;;  %715 = vmatprep.mubr.msk.f32.mxu1 %vm74_vm1, %v44_v34 }
  0x31   :  { %686 = vmatmul.mubr.msk.f32.gmra.mxu0 %vm74_vm1, %v25_v35  ;;  %716 = vmatmul.mubr.msk.f32.gmra.mxu1 %vm74_vm1, %v45_v36 }
  0x32   :  { %688 = vmatprep.mubr.msk.f32.mxu0 %vm74_vm1, %v26_v37  ;;  %718 = vmatprep.mubr.msk.f32.mxu1 %vm74_vm1, %v46_v38 }
  0x35   :  { %689 = vmatmul.mubr.msk.f32.gmra.mxu0 %vm74_vm1, %v27_v39  ;;  %719 = vmatmul.mubr.msk.f32.gmra.mxu1 %vm74_vm1, %v47_v40 }
  0x36   :  { %691 = vmatprep.mubr.msk.f32.mxu0 %vm74_vm1, %v28_v41  ;;  %721 = vmatprep.mubr.msk.f32.mxu1 %vm74_vm1, %v48_v42 }
  0x39   :  { %692 = vmatmul.mubr.msk.f32.gmra.mxu0 %vm74_vm1, %v29_v43  ;;  %722 = vmatmul.mubr.msk.f32.gmra.mxu1 %vm74_vm1, %v49_v44 }
  0x3a   :  { %694 = vmatprep.mubr.msk.f32.mxu0 %vm74_vm1, %v30_v45  ;;  %724 = vmatprep.mubr.msk.f32.mxu1 %vm74_vm1, %v50_v46 }
  0x3d   :  { %695 = vmatmul.mubr.msk.f32.gmra.mxu0 %vm74_vm1, %v31_v47  ;;  %725 = vmatmul.mubr.msk.f32.gmra.mxu1 %vm74_vm1, %v51_v48 }
  0x3e   :  { %697 = vmatprep.mubr.msk.f32.mxu0 %vm74_vm1, %v32_v49  ;;  %727 = vmatprep.mubr.msk.f32.mxu1 %vm74_vm1, %v52_v50 }
  0x41   :  { %698 = vmatmul.mubr.msk.f32.gmra.mxu0 %vm74_vm1, %v33_v51  ;;  %728 = vmatmul.mubr.msk.f32.gmra.mxu1 %vm74_vm1, %v53_v52 }
  0xdd   :  { %v672_v54 = vpop.f32.mrf.mxu0  ;;  %v702_v55 = vpop.f32.mrf.mxu1 }
  0xde   :  { %v271_v56 = vadd.f32 %v672_v54, %v978_v53  ;;  %v371_v57 = vadd.f32 %v702_v55, %v978_v53 }
  0xdf   :  { %v265_v58 = vpop.f32.mrf.mxu0  ;;  %v365_v59 = vpop.f32.mrf.mxu1 }
  0xe0   :  { %v465_v60 = vmax.f32 %v271_v56, 0.0  ;;  %v485_v61 = vmax.f32 %v371_v57, 0.0  ;;  %v266_v62 = vadd.f32 %v978_v53, %v265_v58  ;;  %v366_v63 = vadd.f32 %v978_v53, %v365_v59 }
  0xe1   :  { %v675_v0 = vpop.f32.mrf.mxu0  ;;  %v705_v1 = vpop.f32.mrf.mxu1 }
  0xe2   :  { %506 = vst.msk [vmem:[%s1183_s3 + $0x8] sm:$0xff] %vm504_vm2, %v465_v60  ;;  %526 = vst.msk [vmem:[%s1183_s3 + $0xa8] sm:$0xff] %vm504_vm2, %v485_v61  ;;  %v464_v2 = vmax.f32 %v266_v62, 0.0  ;;  %v484_v3 = vmax.f32 %v366_v63, 0.0  ;;  %v281_v4 = vadd.f32 %v675_v0, %v978_v53  ;;  %v381_v5 = vadd.f32 %v705_v1, %v978_v53 }
  0xe3   :  { %v275_v6 = vpop.f32.mrf.mxu0  ;;  %v375_v7 = vpop.f32.mrf.mxu1 }
  0xe4   :  { %505 = vst.msk [vmem:[%s1183_s3] sm:$0xff] %vm504_vm2, %v464_v2  ;;  %525 = vst.msk [vmem:[%s1183_s3 + $0xa0] sm:$0xff] %vm504_vm2, %v484_v3  ;;  %v467_v8 = vmax.f32 %v281_v4, 0.0  ;;  %v487_v9 = vmax.f32 %v381_v5, 0.0  ;;  %v276_v10 = vadd.f32 %v978_v53, %v275_v6  ;;  %v376_v11 = vadd.f32 %v978_v53, %v375_v7 }
  0xe5   :  { %v678_v12 = vpop.f32.mrf.mxu0  ;;  %v708_v13 = vpop.f32.mrf.mxu1 }
  0xe6   :  { %508 = vst.msk [vmem:[%s1183_s3 + $0x18] sm:$0xff] %vm504_vm2, %v467_v8  ;;  %528 = vst.msk [vmem:[%s1183_s3 + $0xb8] sm:$0xff] %vm504_vm2, %v487_v9  ;;  %v466_v14 = vmax.f32 %v276_v10, 0.0  ;;  %v486_v15 = vmax.f32 %v376_v11, 0.0  ;;  %v291_v16 = vadd.f32 %v678_v12, %v978_v53  ;;  %v391_v17 = vadd.f32 %v708_v13, %v978_v53 }
  0xe7   :  { %v285_v18 = vpop.f32.mrf.mxu0  ;;  %v385_v19 = vpop.f32.mrf.mxu1 }
  0xe8   :  { %507 = vst.msk [vmem:[%s1183_s3 + $0x10] sm:$0xff] %vm504_vm2, %v466_v14  ;;  %527 = vst.msk [vmem:[%s1183_s3 + $0xb0] sm:$0xff] %vm504_vm2, %v486_v15  ;;  %v469_v20 = vmax.f32 %v291_v16, 0.0  ;;  %v489_v21 = vmax.f32 %v391_v17, 0.0  ;;  %v286_v22 = vadd.f32 %v978_v53, %v285_v18  ;;  %v386_v23 = vadd.f32 %v978_v53, %v385_v19 }
  0xe9   :  { %v681_v24 = vpop.f32.mrf.mxu0  ;;  %v711_v25 = vpop.f32.mrf.mxu1 }
  0xea   :  { %510 = vst.msk [vmem:[%s1183_s3 + $0x28] sm:$0xff] %vm504_vm2, %v469_v20  ;;  %530 = vst.msk [vmem:[%s1183_s3 + $0xc8] sm:$0xff] %vm504_vm2, %v489_v21  ;;  %v468_v26 = vmax.f32 %v286_v22, 0.0  ;;  %v488_v27 = vmax.f32 %v386_v23, 0.0  ;;  %v301_v28 = vadd.f32 %v681_v24, %v978_v53  ;;  %v401_v29 = vadd.f32 %v711_v25, %v978_v53 }
  0xeb   :  { %v295_v30 = vpop.f32.mrf.mxu0  ;;  %v395_v31 = vpop.f32.mrf.mxu1 }
  0xec   :  { %509 = vst.msk [vmem:[%s1183_s3 + $0x20] sm:$0xff] %vm504_vm2, %v468_v26  ;;  %529 = vst.msk [vmem:[%s1183_s3 + $0xc0] sm:$0xff] %vm504_vm2, %v488_v27  ;;  %v471_v32 = vmax.f32 %v301_v28, 0.0  ;;  %v491_v33 = vmax.f32 %v401_v29, 0.0  ;;  %v296_v34 = vadd.f32 %v978_v53, %v295_v30  ;;  %v396_v35 = vadd.f32 %v978_v53, %v395_v31 }
  0xed   :  { %v684_v36 = vpop.f32.mrf.mxu0  ;;  %v714_v37 = vpop.f32.mrf.mxu1 }
  0xee   :  { %512 = vst.msk [vmem:[%s1183_s3 + $0x38] sm:$0xff] %vm504_vm2, %v471_v32  ;;  %532 = vst.msk [vmem:[%s1183_s3 + $0xd8] sm:$0xff] %vm504_vm2, %v491_v33  ;;  %v470_v38 = vmax.f32 %v296_v34, 0.0  ;;  %v490_v39 = vmax.f32 %v396_v35, 0.0  ;;  %v311_v40 = vadd.f32 %v684_v36, %v978_v53  ;;  %v411_v41 = vadd.f32 %v714_v37, %v978_v53 }
  0xef   :  { %v305_v42 = vpop.f32.mrf.mxu0  ;;  %v405_v43 = vpop.f32.mrf.mxu1 }
  0xf0   :  { %511 = vst.msk [vmem:[%s1183_s3 + $0x30] sm:$0xff] %vm504_vm2, %v470_v38  ;;  %531 = vst.msk [vmem:[%s1183_s3 + $0xd0] sm:$0xff] %vm504_vm2, %v490_v39  ;;  %v473_v44 = vmax.f32 %v311_v40, 0.0  ;;  %v493_v45 = vmax.f32 %v411_v41, 0.0  ;;  %v306_v46 = vadd.f32 %v978_v53, %v305_v42  ;;  %v406_v47 = vadd.f32 %v978_v53, %v405_v43 }
  0xf1   :  { %v687_v48 = vpop.f32.mrf.mxu0  ;;  %v717_v49 = vpop.f32.mrf.mxu1 }
  0xf2   :  { %514 = vst.msk [vmem:[%s1183_s3 + $0x48] sm:$0xff] %vm504_vm2, %v473_v44  ;;  %534 = vst.msk [vmem:[%s1183_s3 + $0xe8] sm:$0xff] %vm504_vm2, %v493_v45  ;;  %v472_v50 = vmax.f32 %v306_v46, 0.0  ;;  %v492_v51 = vmax.f32 %v406_v47, 0.0  ;;  %v321_v52 = vadd.f32 %v687_v48, %v978_v53  ;;  %v421_v54 = vadd.f32 %v717_v49, %v978_v53 }
  0xf3   :  { %v315_v55 = vpop.f32.mrf.mxu0  ;;  %v415_v56 = vpop.f32.mrf.mxu1 }
  0xf4   :  { %513 = vst.msk [vmem:[%s1183_s3 + $0x40] sm:$0xff] %vm504_vm2, %v472_v50  ;;  %533 = vst.msk [vmem:[%s1183_s3 + $0xe0] sm:$0xff] %vm504_vm2, %v492_v51  ;;  %v475_v57 = vmax.f32 %v321_v52, 0.0  ;;  %v495_v58 = vmax.f32 %v421_v54, 0.0  ;;  %v316_v59 = vadd.f32 %v978_v53, %v315_v55  ;;  %v416_v60 = vadd.f32 %v978_v53, %v415_v56 }
  0xf5   :  { %v690_v61 = vpop.f32.mrf.mxu0  ;;  %v720_v62 = vpop.f32.mrf.mxu1 }
  0xf6   :  { %516 = vst.msk [vmem:[%s1183_s3 + $0x58] sm:$0xff] %vm504_vm2, %v475_v57  ;;  %536 = vst.msk [vmem:[%s1183_s3 + $0xf8] sm:$0xff] %vm504_vm2, %v495_v58  ;;  %v474_v63 = vmax.f32 %v316_v59, 0.0  ;;  %v494_v0 = vmax.f32 %v416_v60, 0.0  ;;  %v331_v1 = vadd.f32 %v690_v61, %v978_v53  ;;  %v431_v2 = vadd.f32 %v720_v62, %v978_v53 }
  0xf7   :  { %v325_v3 = vpop.f32.mrf.mxu0  ;;  %v425_v4 = vpop.f32.mrf.mxu1 }
  0xf8   :  { %515 = vst.msk [vmem:[%s1183_s3 + $0x50] sm:$0xff] %vm504_vm2, %v474_v63  ;;  %535 = vst.msk [vmem:[%s1183_s3 + $0xf0] sm:$0xff] %vm504_vm2, %v494_v0  ;;  %v477_v5 = vmax.f32 %v331_v1, 0.0  ;;  %v497_v6 = vmax.f32 %v431_v2, 0.0  ;;  %v326_v7 = vadd.f32 %v978_v53, %v325_v3  ;;  %v426_v8 = vadd.f32 %v978_v53, %v425_v4 }
  0xf9   :  { %v693_v9 = vpop.f32.mrf.mxu0  ;;  %v723_v10 = vpop.f32.mrf.mxu1 }
  0xfa   :  { %518 = vst.msk [vmem:[%s1183_s3 + $0x68] sm:$0xff] %vm504_vm2, %v477_v5  ;;  %538 = vst.msk [vmem:[%s1183_s3 + $0x108] sm:$0xff] %vm504_vm2, %v497_v6  ;;  %v476_v11 = vmax.f32 %v326_v7, 0.0  ;;  %v496_v12 = vmax.f32 %v426_v8, 0.0  ;;  %v341_v13 = vadd.f32 %v693_v9, %v978_v53  ;;  %v441_v14 = vadd.f32 %v723_v10, %v978_v53 }
  0xfb   :  { %v335_v15 = vpop.f32.mrf.mxu0  ;;  %v435_v16 = vpop.f32.mrf.mxu1 }
  0xfc   :  { %517 = vst.msk [vmem:[%s1183_s3 + $0x60] sm:$0xff] %vm504_vm2, %v476_v11  ;;  %537 = vst.msk [vmem:[%s1183_s3 + $0x100] sm:$0xff] %vm504_vm2, %v496_v12  ;;  %v479_v17 = vmax.f32 %v341_v13, 0.0  ;;  %v499_v18 = vmax.f32 %v441_v14, 0.0  ;;  %v336_v19 = vadd.f32 %v978_v53, %v335_v15  ;;  %v436_v20 = vadd.f32 %v978_v53, %v435_v16 }
  0xfd   :  { %v696_v21 = vpop.f32.mrf.mxu0  ;;  %v726_v22 = vpop.f32.mrf.mxu1 }
  0xfe   :  { %520 = vst.msk [vmem:[%s1183_s3 + $0x78] sm:$0xff] %vm504_vm2, %v479_v17  ;;  %540 = vst.msk [vmem:[%s1183_s3 + $0x118] sm:$0xff] %vm504_vm2, %v499_v18  ;;  %v478_v23 = vmax.f32 %v336_v19, 0.0  ;;  %v498_v24 = vmax.f32 %v436_v20, 0.0  ;;  %v351_v25 = vadd.f32 %v696_v21, %v978_v53  ;;  %v451_v26 = vadd.f32 %v726_v22, %v978_v53 }
  0xff   :  { %v345_v27 = vpop.f32.mrf.mxu0  ;;  %v445_v28 = vpop.f32.mrf.mxu1 }
 0x100   :  { %519 = vst.msk [vmem:[%s1183_s3 + $0x70] sm:$0xff] %vm504_vm2, %v478_v23  ;;  %539 = vst.msk [vmem:[%s1183_s3 + $0x110] sm:$0xff] %vm504_vm2, %v498_v24  ;;  %v481_v29 = vmax.f32 %v351_v25, 0.0  ;;  %v501_v30 = vmax.f32 %v451_v26, 0.0  ;;  %v346_v31 = vadd.f32 %v978_v53, %v345_v27  ;;  %v446_v32 = vadd.f32 %v978_v53, %v445_v28 }
 0x101   :  { %v699_v33 = vpop.f32.mrf.mxu0  ;;  %v729_v34 = vpop.f32.mrf.mxu1 }
 0x102   :  { %522 = vst.msk [vmem:[%s1183_s3 + $0x88] sm:$0xff] %vm504_vm2, %v481_v29  ;;  %542 = vst.msk [vmem:[%s1183_s3 + $0x128] sm:$0xff] %vm504_vm2, %v501_v30  ;;  %v480_v35 = vmax.f32 %v346_v31, 0.0  ;;  %v500_v36 = vmax.f32 %v446_v32, 0.0  ;;  %v361_v37 = vadd.f32 %v699_v33, %v978_v53  ;;  %v461_v38 = vadd.f32 %v729_v34, %v978_v53 }
 0x103   :  { %v355_v39 = vpop.f32.mrf.mxu0  ;;  %v455_v40 = vpop.f32.mrf.mxu1 }
 0x104   :  { %521 = vst.msk [vmem:[%s1183_s3 + $0x80] sm:$0xff] %vm504_vm2, %v480_v35  ;;  %541 = vst.msk [vmem:[%s1183_s3 + $0x120] sm:$0xff] %vm504_vm2, %v500_v36  ;;  %v483_v41 = vmax.f32 %v361_v37, 0.0  ;;  %v503_v42 = vmax.f32 %v461_v38, 0.0  ;;  %v356_v43 = vadd.f32 %v978_v53, %v355_v39  ;;  %v456_v44 = vadd.f32 %v978_v53, %v455_v40 }
 0x106   :  { %524 = vst.msk [vmem:[%s1183_s3 + $0x98] sm:$0xff] %vm504_vm2, %v483_v41  ;;  %544 = vst.msk [vmem:[%s1183_s3 + $0x138] sm:$0xff] %vm504_vm2, %v503_v42  ;;  %v482_v45 = vmax.f32 %v356_v43, 0.0  ;;  %v502_v46 = vmax.f32 %v456_v44, 0.0 }
 0x108   :  { %523 = vst.msk [vmem:[%s1183_s3 + $0x90] sm:$0xff] %vm504_vm2, %v482_v45  ;;  %543 = vst.msk [vmem:[%s1183_s3 + $0x130] sm:$0xff] %vm504_vm2, %v502_v46 }

// kernel: _lambda_.16
= control target key start
LH: loop header
LB: loop body
LE: loop exit
PB: predicated region body
PF: predicated region fallthrough
CT: control target
= control target key end

     0   :  { %v609_v0 = vmov 0.0   ;;  %vm151_vm0 = vcmask 130048   ;;  %vm562_vm1 = vcmask 261120   ;;  %s1195_s1 = inlined_call_operand.vmem [shape: f32[400,32], index: 1, kind: input, shape index: {}]   ;;  %s1196_s0 = inlined_call_operand.vmem [shape: f32[160,400], index: 0, kind: input, shape index: {}]   ;;  %s1197_s2 = inlined_call_operand.vmem [shape: f32[1,32], index: 2, kind: input, shape index: {}]   ;;  %s1198_s3 = inlined_call_operand.vmem [shape: f32[160,32], index: 3, kind: output, shape index: {}]  }
   0x1   :  { %212 = vmatprep.subr.mxu0 %v609_v0  ;;  %v109_v1 = vld [vmem:[%s1195_s1 + $0x78] sm:$0xff]  ;;  %v108_v2 = vld [vmem:[%s1195_s1 + $0x70] sm:$0xff]  ;;  %377 = vmatprep.subr.mxu1 %v609_v0  ;;  %v107_v3 = vld [vmem:[%s1195_s1 + $0x68] sm:$0xff] }
   0x2   :  { %213 = vmatpush1.msra.mxu0 %v109_v1  ;;  %v106_v4 = vld [vmem:[%s1195_s1 + $0x60] sm:$0xff]  ;;  %v141_v5 = vld [vmem:[%s1195_s1 + $0x178] sm:$0xff]  ;;  %v140_v6 = vld [vmem:[%s1195_s1 + $0x170] sm:$0xff] }
   0x3   :  { %214 = vmatprep.subr.mxu0 %v609_v0  ;;  %v105_v7 = vld [vmem:[%s1195_s1 + $0x58] sm:$0xff]  ;;  %378 = vmatpush1.msra.mxu1 %v141_v5  ;;  %v139_v8 = vld [vmem:[%s1195_s1 + $0x168] sm:$0xff]  ;;  %v104_v9 = vld [vmem:[%s1195_s1 + $0x50] sm:$0xff] }
   0x4   :  { %215 = vmatpush1.msra.mxu0 %v108_v2  ;;  %379 = vmatprep.subr.mxu1 %v609_v0  ;;  %v138_v10 = vld [vmem:[%s1195_s1 + $0x160] sm:$0xff]  ;;  %v103_v11 = vld [vmem:[%s1195_s1 + $0x48] sm:$0xff]  ;;  %v137_v12 = vld [vmem:[%s1195_s1 + $0x158] sm:$0xff] }
   0x5   :  { %216 = vmatprep.subr.mxu0 %v609_v0  ;;  %380 = vmatpush1.msra.mxu1 %v140_v6  ;;  %v102_v13 = vld [vmem:[%s1195_s1 + $0x40] sm:$0xff]  ;;  %v136_v14 = vld [vmem:[%s1195_s1 + $0x150] sm:$0xff]  ;;  %v101_v15 = vld [vmem:[%s1195_s1 + $0x38] sm:$0xff] }
   0x6   :  { %217 = vmatpush1.msra.mxu0 %v107_v3  ;;  %381 = vmatprep.subr.mxu1 %v609_v0  ;;  %v135_v16 = vld [vmem:[%s1195_s1 + $0x148] sm:$0xff]  ;;  %v100_v17 = vld [vmem:[%s1195_s1 + $0x30] sm:$0xff]  ;;  %v134_v18 = vld [vmem:[%s1195_s1 + $0x140] sm:$0xff] }
   0x7   :  { %218 = vmatprep.subr.mxu0 %v609_v0  ;;  %382 = vmatpush1.msra.mxu1 %v139_v8  ;;  %v99_v19 = vld [vmem:[%s1195_s1 + $0x28] sm:$0xff]  ;;  %v133_v20 = vld [vmem:[%s1195_s1 + $0x138] sm:$0xff]  ;;  %v98_v21 = vld [vmem:[%s1195_s1 + $0x20] sm:$0xff] }
   0x8   :  { %219 = vmatpush1.msra.mxu0 %v106_v4  ;;  %383 = vmatprep.subr.mxu1 %v609_v0  ;;  %v132_v22 = vld [vmem:[%s1195_s1 + $0x130] sm:$0xff]  ;;  %v97_v23 = vld [vmem:[%s1195_s1 + $0x18] sm:$0xff]  ;;  %v131_v24 = vld [vmem:[%s1195_s1 + $0x128] sm:$0xff] }
   0x9   :  { %220 = vmatprep.subr.mxu0 %v609_v0  ;;  %384 = vmatpush1.msra.mxu1 %v138_v10  ;;  %v96_v25 = vld [vmem:[%s1195_s1 + $0x10] sm:$0xff]  ;;  %v130_v26 = vld [vmem:[%s1195_s1 + $0x120] sm:$0xff]  ;;  %v95_v27 = vld [vmem:[%s1195_s1 + $0x8] sm:$0xff] }
   0xa   :  { %221 = vmatpush1.msra.mxu0 %v105_v7  ;;  %385 = vmatprep.subr.mxu1 %v609_v0  ;;  %v129_v28 = vld [vmem:[%s1195_s1 + $0x118] sm:$0xff]  ;;  %v94_v29 = vld [vmem:[%s1195_s1] sm:$0xff]  ;;  %v128_v30 = vld [vmem:[%s1195_s1 + $0x110] sm:$0xff] }
   0xb   :  { %222 = vmatprep.subr.mxu0 %v609_v0  ;;  %386 = vmatpush1.msra.mxu1 %v137_v12  ;;  %v125_v31 = vld [vmem:[%s1195_s1 + $0xf8] sm:$0xff]  ;;  %v127_v32 = vld [vmem:[%s1195_s1 + $0x108] sm:$0xff]  ;;  %v124_v33 = vld [vmem:[%s1195_s1 + $0xf0] sm:$0xff] }
   0xc   :  { %223 = vmatpush1.msra.mxu0 %v104_v9  ;;  %387 = vmatprep.subr.mxu1 %v609_v0  ;;  %v126_v34 = vld [vmem:[%s1195_s1 + $0x100] sm:$0xff]  ;;  %v123_v35 = vld [vmem:[%s1195_s1 + $0xe8] sm:$0xff]  ;;  %v121_v39 = vld [vmem:[%s1195_s1 + $0xd8] sm:$0xff] }
   0xd   :  { %224 = vmatprep.subr.mxu0 %v609_v0  ;;  %388 = vmatpush1.msra.mxu1 %v136_v14  ;;  %v143_v36 = vld [vmem:[%s1195_s1 + $0x188] sm:$0xff]  ;;  %v122_v37 = vld [vmem:[%s1195_s1 + $0xe0] sm:$0xff]  ;;  %v17_v41 = vld [vmem:[%s1196_s0 + $0x18] sm:$0xff] }
   0xe   :  { %225 = vmatpush1.msra.mxu0 %v103_v11  ;;  %389 = vmatprep.subr.mxu1 %v609_v0  ;;  %v15_v38 = vld [vmem:[%s1196_s0 + $0x8] sm:$0xff]  ;;  %v142_v40 = vld [vmem:[%s1195_s1 + $0x180] sm:$0xff]  ;;  %v120_v42 = vld [vmem:[%s1195_s1 + $0xd0] sm:$0xff] }
   0xf   :  { %226 = vmatprep.subr.mxu0 %v609_v0  ;;  %390 = vmatpush1.msra.mxu1 %v135_v16  ;;  %v16_v43 = vld [vmem:[%s1196_s0 + $0x10] sm:$0xff]  ;;  %v21_v44 = vld [vmem:[%s1196_s0 + $0x38] sm:$0xff]  ;;  %v119_v45 = vld [vmem:[%s1195_s1 + $0xc8] sm:$0xff] }
  0x10   :  { %227 = vmatpush1.msra.mxu0 %v102_v13  ;;  %391 = vmatprep.subr.mxu1 %v609_v0  ;;  %v118_v46 = vld [vmem:[%s1195_s1 + $0xc0] sm:$0xff]  ;;  %v20_v47 = vld [vmem:[%s1196_s0 + $0x30] sm:$0xff]  ;;  %v25_v48 = vld [vmem:[%s1196_s0 + $0x58] sm:$0xff] }
  0x11   :  { %228 = vmatprep.subr.mxu0 %v609_v0  ;;  %392 = vmatpush1.msra.mxu1 %v134_v18  ;;  %v117_v49 = vld [vmem:[%s1195_s1 + $0xb8] sm:$0xff]  ;;  %v116_v50 = vld [vmem:[%s1195_s1 + $0xb0] sm:$0xff]  ;;  %v115_v53 = vld [vmem:[%s1195_s1 + $0xa8] sm:$0xff] }
  0x12   :  { %229 = vmatpush1.msra.mxu0 %v101_v15  ;;  %393 = vmatprep.subr.mxu1 %v609_v0  ;;  %v24_v51 = vld [vmem:[%s1196_s0 + $0x50] sm:$0xff]  ;;  %v29_v52 = vld [vmem:[%s1196_s0 + $0x78] sm:$0xff]  ;;  %v114_v54 = vld [vmem:[%s1195_s1 + $0xa0] sm:$0xff] }
  0x13   :  { %230 = vmatprep.subr.mxu0 %v609_v0  ;;  %394 = vmatpush1.msra.mxu1 %v133_v20  ;;  %v28_v55 = vld [vmem:[%s1196_s0 + $0x70] sm:$0xff]  ;;  %v33_v56 = vld [vmem:[%s1196_s0 + $0x98] sm:$0xff]  ;;  %v111_v61 = vld [vmem:[%s1195_s1 + $0x88] sm:$0xff] }
  0x14   :  { %231 = vmatpush1.msra.mxu0 %v100_v17  ;;  %395 = vmatprep.subr.mxu1 %v609_v0  ;;  %v113_v57 = vld [vmem:[%s1195_s1 + $0x98] sm:$0xff]  ;;  %v112_v58 = vld [vmem:[%s1195_s1 + $0x90] sm:$0xff]  ;;  %v110_v62 = vld [vmem:[%s1195_s1 + $0x80] sm:$0xff] }
  0x15   :  { %232 = vmatprep.subr.mxu0 %v609_v0  ;;  %396 = vmatpush1.msra.mxu1 %v132_v22  ;;  %v32_v59 = vld [vmem:[%s1196_s0 + $0x90] sm:$0xff]  ;;  %v37_v60 = vld [vmem:[%s1196_s0 + $0xb8] sm:$0xff]  ;;  %v14_v1 = vld [vmem:[%s1196_s0] sm:$0xff] }
  0x16   :  { %233 = vmatpush1.msra.mxu0 %v99_v19  ;;  %397 = vmatprep.subr.mxu1 %v609_v0  ;;  %v36_v63 = vld [vmem:[%s1196_s0 + $0xb0] sm:$0xff]  ;;  %v41_v2 = vld [vmem:[%s1196_s0 + $0xd8] sm:$0xff]  ;;  %v19_v3 = vld [vmem:[%s1196_s0 + $0x28] sm:$0xff] }
  0x17   :  { %234 = vmatprep.subr.mxu0 %v609_v0  ;;  %398 = vmatpush1.msra.mxu1 %v131_v24  ;;  %v40_v4 = vld [vmem:[%s1196_s0 + $0xd0] sm:$0xff]  ;;  %v18_v5 = vld [vmem:[%s1196_s0 + $0x20] sm:$0xff]  ;;  %v23_v6 = vld [vmem:[%s1196_s0 + $0x48] sm:$0xff] }
  0x18   :  { %235 = vmatpush1.msra.mxu0 %v98_v21  ;;  %399 = vmatprep.subr.mxu1 %v609_v0  ;;  %v44_v7 = vld [vmem:[%s1196_s0 + $0xf0] sm:$0xff]  ;;  %v22_v8 = vld [vmem:[%s1196_s0 + $0x40] sm:$0xff]  ;;  %v49_v9 = vld [vmem:[%s1196_s0 + $0x118] sm:$0xff] }
  0x19   :  { %236 = vmatprep.subr.mxu0 %v609_v0  ;;  %400 = vmatpush1.msra.mxu1 %v130_v26  ;;  %v27_v10 = vld [vmem:[%s1196_s0 + $0x68] sm:$0xff]  ;;  %v48_v11 = vld [vmem:[%s1196_s0 + $0x110] sm:$0xff]  ;;  %v26_v12 = vld [vmem:[%s1196_s0 + $0x60] sm:$0xff] }
  0x1a   :  { %237 = vmatpush1.msra.mxu0 %v97_v23  ;;  %401 = vmatprep.subr.mxu1 %v609_v0  ;;  %v53_v13 = vld [vmem:[%s1196_s0 + $0x138] sm:$0xff]  ;;  %v31_v14 = vld [vmem:[%s1196_s0 + $0x88] sm:$0xff]  ;;  %v52_v15 = vld [vmem:[%s1196_s0 + $0x130] sm:$0xff] }
  0x1b   :  { %238 = vmatprep.subr.mxu0 %v609_v0  ;;  %402 = vmatpush1.msra.mxu1 %v129_v28  ;;  %v30_v16 = vld [vmem:[%s1196_s0 + $0x80] sm:$0xff]  ;;  %v57_v17 = vld [vmem:[%s1196_s0 + $0x158] sm:$0xff]  ;;  %v35_v18 = vld [vmem:[%s1196_s0 + $0xa8] sm:$0xff] }
  0x1c   :  { %239 = vmatpush1.msra.mxu0 %v96_v25  ;;  %403 = vmatprep.subr.mxu1 %v609_v0  ;;  %v56_v19 = vld [vmem:[%s1196_s0 + $0x150] sm:$0xff]  ;;  %v34_v20 = vld [vmem:[%s1196_s0 + $0xa0] sm:$0xff]  ;;  %v61_v21 = vld [vmem:[%s1196_s0 + $0x178] sm:$0xff] }
  0x1d   :  { %240 = vmatprep.subr.mxu0 %v609_v0  ;;  %404 = vmatpush1.msra.mxu1 %v128_v30  ;;  %v39_v22 = vld [vmem:[%s1196_s0 + $0xc8] sm:$0xff]  ;;  %v60_v23 = vld [vmem:[%s1196_s0 + $0x170] sm:$0xff]  ;;  %v38_v24 = vld [vmem:[%s1196_s0 + $0xc0] sm:$0xff] }
  0x1e   :  { %241 = vmatpush1.msra.mxu0 %v95_v27  ;;  %405 = vmatprep.subr.mxu1 %v609_v0  ;;  %v65_v25 = vld [vmem:[%s1196_s0 + $0x198] sm:$0xff]  ;;  %v43_v26 = vld [vmem:[%s1196_s0 + $0xe8] sm:$0xff]  ;;  %v64_v27 = vld [vmem:[%s1196_s0 + $0x190] sm:$0xff] }
  0x1f   :  { %242 = vmatprep.subr.mxu0 %v609_v0  ;;  %406 = vmatpush1.msra.mxu1 %v127_v32  ;;  %v42_v28 = vld [vmem:[%s1196_s0 + $0xe0] sm:$0xff]  ;;  %v47_v30 = vld [vmem:[%s1196_s0 + $0x108] sm:$0xff] }
  0x20   :  { %243 = vmatpush1.msra.mxu0 %v94_v29  ;;  %407 = vmatprep.subr.mxu1 %v609_v0  ;;  %v69_v29 = vld [vmem:[%s1196_s0 + $0x1b8] sm:$0xff]  ;;  %v46_v32 = vld [vmem:[%s1196_s0 + $0x100] sm:$0xff] }
  0x21   :  { %244 = vmatprep.subr.mxu0 %v609_v0  ;;  %408 = vmatpush1.msra.mxu1 %v126_v34  ;;  %v51_v34 = vld [vmem:[%s1196_s0 + $0x128] sm:$0xff] }
  0x22   :  { %245 = vmatpush2.msra.mxu0 %v125_v31  ;;  %437 = vmatprep.subr.mxu1 %v609_v0  ;;  %v68_v31 = vld [vmem:[%s1196_s0 + $0x1b0] sm:$0xff] }
  0x23   :  { %246 = vmatprep.subr.mxu0 %v609_v0  ;;  %438 = vmatpush2.msra.mxu1 %v143_v36  ;;  %v50_v36 = vld [vmem:[%s1196_s0 + $0x120] sm:$0xff] }
  0x24   :  { %247 = vmatpush2.msra.mxu0 %v124_v33  ;;  %439 = vmatprep.subr.mxu1 %v609_v0  ;;  %v73_v33 = vld [vmem:[%s1196_s0 + $0x1d8] sm:$0xff] }
  0x25   :  { %248 = vmatprep.subr.mxu0 %v609_v0  ;;  %276 = vmatprep.mubr.f32.mxu0 %v15_v38  ;;  %v55_v38 = vld [vmem:[%s1196_s0 + $0x148] sm:$0xff] }
  0x26   :  { %249 = vmatpush2.msra.mxu0 %v123_v35  ;;  %440 = vmatpush2.msra.mxu1 %v142_v40  ;;  %v72_v35 = vld [vmem:[%s1196_s0 + $0x1d0] sm:$0xff]  ;;  %v54_v40 = vld [vmem:[%s1196_s0 + $0x140] sm:$0xff] }
  0x27   :  { %250 = vmatprep.subr.mxu0 %v609_v0  ;;  %588 = vmatprep.mubr.msk.f32.mxu1 %vm151_vm0, %v17_v41  ;;  %v81_v41 = vld [vmem:[%s1196_s0 + $0x218] sm:$0xff] }
  0x28   :  { %251 = vmatpush2.msra.mxu0 %v122_v37  ;;  %442 = vmatmul.mubr.f32.vlgmr.msra.gmra.mxu1 %v16_v43  ;;  %v77_v37 = vld [vmem:[%s1196_s0 + $0x1f8] sm:$0xff]  ;;  %v80_v43 = vld [vmem:[%s1196_s0 + $0x210] sm:$0xff] }
  0x29   :  { %252 = vmatprep.subr.mxu0 %v609_v0  ;;  %589 = vmatprep.mubr.msk.f32.mxu1 %vm151_vm0, %v21_v44  ;;  %v58_v44 = vld [vmem:[%s1196_s0 + $0x160] sm:$0xff] }
  0x2a   :  { %253 = vmatpush2.msra.mxu0 %v121_v39  ;;  %v76_v39 = vld [vmem:[%s1196_s0 + $0x1f0] sm:$0xff] }
  0x2b   :  { %254 = vmatprep.subr.mxu0 %v609_v0 }
  0x2c   :  { %255 = vmatpush2.msra.mxu0 %v120_v42  ;;  %447 = vmatmul.mubr.f32.gmra.mxu1 %v20_v47  ;;  %v59_v42 = vld [vmem:[%s1196_s0 + $0x168] sm:$0xff]  ;;  %v84_v47 = vld [vmem:[%s1196_s0 + $0x230] sm:$0xff] }
  0x2d   :  { %256 = vmatprep.subr.mxu0 %v609_v0  ;;  %590 = vmatprep.mubr.msk.f32.mxu1 %vm151_vm0, %v25_v48  ;;  %v62_v48 = vld [vmem:[%s1196_s0 + $0x180] sm:$0xff] }
  0x2e   :  { %257 = vmatpush2.msra.mxu0 %v119_v45  ;;  %v85_v45 = vld [vmem:[%s1196_s0 + $0x238] sm:$0xff] }
  0x2f   :  { %258 = vmatprep.subr.mxu0 %v609_v0 }
  0x30   :  { %259 = vmatpush2.msra.mxu0 %v118_v46  ;;  %452 = vmatmul.mubr.f32.gmra.mxu1 %v24_v51  ;;  %v63_v46 = vld [vmem:[%s1196_s0 + $0x188] sm:$0xff]  ;;  %v88_v51 = vld [vmem:[%s1196_s0 + $0x250] sm:$0xff] }
  0x31   :  { %260 = vmatprep.subr.mxu0 %v609_v0  ;;  %591 = vmatprep.mubr.msk.f32.mxu1 %vm151_vm0, %v29_v52  ;;  %v66_v52 = vld [vmem:[%s1196_s0 + $0x1a0] sm:$0xff] }
  0x32   :  { %261 = vmatpush2.msra.mxu0 %v117_v49  ;;  %v89_v49 = vld [vmem:[%s1196_s0 + $0x258] sm:$0xff] }
  0x33   :  { %262 = vmatprep.subr.mxu0 %v609_v0 }
  0x34   :  { %263 = vmatpush2.msra.mxu0 %v116_v50  ;;  %457 = vmatmul.mubr.f32.gmra.mxu1 %v28_v55  ;;  %v67_v50 = vld [vmem:[%s1196_s0 + $0x1a8] sm:$0xff]  ;;  %v92_v55 = vld [vmem:[%s1196_s0 + $0x270] sm:$0xff] }
  0x35   :  { %264 = vmatprep.subr.mxu0 %v609_v0  ;;  %592 = vmatprep.mubr.msk.f32.mxu1 %vm151_vm0, %v33_v56  ;;  %v70_v56 = vld [vmem:[%s1196_s0 + $0x1c0] sm:$0xff] }
  0x36   :  { %265 = vmatpush2.msra.mxu0 %v115_v53  ;;  %v93_v53 = vld [vmem:[%s1196_s0 + $0x278] sm:$0xff] }
  0x37   :  { %266 = vmatprep.subr.mxu0 %v609_v0 }
  0x38   :  { %267 = vmatpush2.msra.mxu0 %v114_v54  ;;  %462 = vmatmul.mubr.f32.gmra.mxu1 %v32_v59  ;;  %v71_v54 = vld [vmem:[%s1196_s0 + $0x1c8] sm:$0xff] }
  0x39   :  { %268 = vmatprep.subr.mxu0 %v609_v0  ;;  %593 = vmatprep.mubr.msk.f32.mxu1 %vm151_vm0, %v37_v60  ;;  %v79_v59 = vld [vmem:[%s1196_s0 + $0x208] sm:$0xff]  ;;  %v78_v60 = vld [vmem:[%s1196_s0 + $0x200] sm:$0xff] }
  0x3a   :  { %269 = vmatpush2.msra.mxu0 %v113_v57  ;;  %v75_v57 = vld [vmem:[%s1196_s0 + $0x1e8] sm:$0xff] }
  0x3b   :  { %270 = vmatprep.subr.mxu0 %v609_v0 }
  0x3c   :  { %271 = vmatpush2.msra.mxu0 %v112_v58  ;;  %467 = vmatmul.mubr.f32.gmra.mxu1 %v36_v63  ;;  %v74_v58 = vld [vmem:[%s1196_s0 + $0x1e0] sm:$0xff]  ;;  %v87_v63 = vld [vmem:[%s1196_s0 + $0x248] sm:$0xff] }
  0x3d   :  { %272 = vmatprep.subr.mxu0 %v609_v0  ;;  %594 = vmatprep.mubr.msk.f32.mxu1 %vm151_vm0, %v41_v2  ;;  %v91_v2 = vld [vmem:[%s1196_s0 + $0x268] sm:$0xff] }
  0x3e   :  { %273 = vmatpush2.msra.mxu0 %v111_v61  ;;  %v83_v61 = vld [vmem:[%s1196_s0 + $0x228] sm:$0xff] }
  0x3f   :  { %274 = vmatprep.subr.mxu0 %v609_v0  ;;  %v45_v0 = vld [vmem:[%s1196_s0 + $0xf8] sm:$0xff] }
  0x40   :  { %275 = vmatpush2.msra.mxu0 %v110_v62  ;;  %472 = vmatmul.mubr.f32.gmra.mxu1 %v40_v4  ;;  %v82_v62 = vld [vmem:[%s1196_s0 + $0x220] sm:$0xff] }
  0x41   :  { %277 = vmatmul.mubr.f32.vlgmr.msra.gmra.mxu0 %v14_v1  ;;  %595 = vmatprep.mubr.msk.f32.mxu1 %vm151_vm0, %v45_v0  ;;  %v86_v1 = vld [vmem:[%s1196_s0 + $0x240] sm:$0xff] }
  0x42   :  { %281 = vmatprep.mubr.f32.mxu0 %v19_v3  ;;  %v90_v3 = vld [vmem:[%s1196_s0 + $0x260] sm:$0xff] }
  0x44   :  { %477 = vmatmul.mubr.f32.gmra.mxu1 %v44_v7 }
  0x45   :  { %282 = vmatmul.mubr.f32.gmra.mxu0 %v18_v5  ;;  %596 = vmatprep.mubr.msk.f32.mxu1 %vm151_vm0, %v49_v9 }
  0x46   :  { %286 = vmatprep.mubr.f32.mxu0 %v23_v6 }
  0x48   :  { %482 = vmatmul.mubr.f32.gmra.mxu1 %v48_v11 }
  0x49   :  { %287 = vmatmul.mubr.f32.gmra.mxu0 %v22_v8  ;;  %597 = vmatprep.mubr.msk.f32.mxu1 %vm151_vm0, %v53_v13  ;;  %v1093_v13 = vld [vmem:[%s1197_s2] ss:$0 sm:$0xff] }
  0x4a   :  { %291 = vmatprep.mubr.f32.mxu0 %v27_v10 }
  0x4c   :  { %487 = vmatmul.mubr.f32.gmra.mxu1 %v52_v15 }
  0x4d   :  { %292 = vmatmul.mubr.f32.gmra.mxu0 %v26_v12  ;;  %598 = vmatprep.mubr.msk.f32.mxu1 %vm151_vm0, %v57_v17 }
  0x4e   :  { %296 = vmatprep.mubr.f32.mxu0 %v31_v14 }
  0x50   :  { %492 = vmatmul.mubr.f32.gmra.mxu1 %v56_v19 }
  0x51   :  { %297 = vmatmul.mubr.f32.gmra.mxu0 %v30_v16  ;;  %599 = vmatprep.mubr.msk.f32.mxu1 %vm151_vm0, %v61_v21 }
  0x52   :  { %301 = vmatprep.mubr.f32.mxu0 %v35_v18 }
  0x54   :  { %497 = vmatmul.mubr.f32.gmra.mxu1 %v60_v23 }
  0x55   :  { %302 = vmatmul.mubr.f32.gmra.mxu0 %v34_v20  ;;  %600 = vmatprep.mubr.msk.f32.mxu1 %vm151_vm0, %v65_v25 }
  0x56   :  { %306 = vmatprep.mubr.f32.mxu0 %v39_v22 }
  0x58   :  { %502 = vmatmul.mubr.f32.gmra.mxu1 %v64_v27 }
  0x59   :  { %307 = vmatmul.mubr.f32.gmra.mxu0 %v38_v24  ;;  %601 = vmatprep.mubr.msk.f32.mxu1 %vm151_vm0, %v69_v29 }
  0x5a   :  { %311 = vmatprep.mubr.f32.mxu0 %v43_v26 }
  0x5c   :  { %507 = vmatmul.mubr.f32.gmra.mxu1 %v68_v31 }
  0x5d   :  { %312 = vmatmul.mubr.f32.gmra.mxu0 %v42_v28  ;;  %602 = vmatprep.mubr.msk.f32.mxu1 %vm151_vm0, %v73_v33 }
  0x5e   :  { %316 = vmatprep.mubr.f32.mxu0 %v47_v30 }
  0x60   :  { %512 = vmatmul.mubr.f32.gmra.mxu1 %v72_v35 }
  0x61   :  { %317 = vmatmul.mubr.f32.gmra.mxu0 %v46_v32  ;;  %603 = vmatprep.mubr.msk.f32.mxu1 %vm151_vm0, %v77_v37 }
  0x62   :  { %321 = vmatprep.mubr.f32.mxu0 %v51_v34 }
  0x64   :  { %517 = vmatmul.mubr.f32.gmra.mxu1 %v76_v39 }
  0x65   :  { %322 = vmatmul.mubr.f32.gmra.mxu0 %v50_v36  ;;  %604 = vmatprep.mubr.msk.f32.mxu1 %vm151_vm0, %v81_v41 }
  0x66   :  { %326 = vmatprep.mubr.f32.mxu0 %v55_v38 }
  0x68   :  { %522 = vmatmul.mubr.f32.gmra.mxu1 %v80_v43 }
  0x69   :  { %327 = vmatmul.mubr.f32.gmra.mxu0 %v54_v40  ;;  %605 = vmatprep.mubr.msk.f32.mxu1 %vm151_vm0, %v85_v45 }
  0x6a   :  { %331 = vmatprep.mubr.f32.mxu0 %v59_v42 }
  0x6c   :  { %527 = vmatmul.mubr.f32.gmra.mxu1 %v84_v47 }
  0x6d   :  { %332 = vmatmul.mubr.f32.gmra.mxu0 %v58_v44  ;;  %606 = vmatprep.mubr.msk.f32.mxu1 %vm151_vm0, %v89_v49 }
  0x6e   :  { %336 = vmatprep.mubr.f32.mxu0 %v63_v46 }
  0x70   :  { %532 = vmatmul.mubr.f32.gmra.mxu1 %v88_v51 }
  0x71   :  { %337 = vmatmul.mubr.f32.gmra.mxu0 %v62_v48  ;;  %607 = vmatprep.mubr.msk.f32.mxu1 %vm151_vm0, %v93_v53 }
  0x72   :  { %341 = vmatprep.mubr.f32.mxu0 %v67_v50 }
  0x74   :  { %537 = vmatmul.mubr.f32.gmra.mxu1 %v92_v55 }
  0x75   :  { %342 = vmatmul.mubr.f32.gmra.mxu0 %v66_v52 }
  0x76   :  { %346 = vmatprep.mubr.f32.mxu0 %v71_v54 }
  0x79   :  { %347 = vmatmul.mubr.f32.gmra.mxu0 %v70_v56 }
  0x7a   :  { %351 = vmatprep.mubr.f32.mxu0 %v75_v57 }
  0x7d   :  { %352 = vmatmul.mubr.f32.gmra.mxu0 %v74_v58 }
  0x7e   :  { %356 = vmatprep.mubr.f32.mxu0 %v79_v59 }
  0x81   :  { %357 = vmatmul.mubr.f32.gmra.mxu0 %v78_v60 }
  0x82   :  { %361 = vmatprep.mubr.f32.mxu0 %v83_v61 }
  0x85   :  { %362 = vmatmul.mubr.f32.gmra.mxu0 %v82_v62 }
  0x86   :  { %366 = vmatprep.mubr.f32.mxu0 %v87_v63 }
  0x89   :  { %367 = vmatmul.mubr.f32.gmra.mxu0 %v86_v1 }
  0x8a   :  { %371 = vmatprep.mubr.f32.mxu0 %v91_v2 }
  0x8d   :  { %372 = vmatmul.mubr.f32.gmra.mxu0 %v90_v3 }
  0xe8   :  { %v443_v4 = vpop.f32.mrf.mxu1 }
  0xea   :  { %v445_v5 = vpop.f32.mrf.mxu1 }
  0xec   :  { %v448_v0 = vpop.f32.mrf.mxu1 }
  0xee   :  { %v450_v6 = vpop.f32.mrf.mxu1 }
  0xf0   :  { %v453_v7 = vpop.f32.mrf.mxu1 }
  0xf2   :  { %v455_v8 = vpop.f32.mrf.mxu1 }
  0xf4   :  { %v458_v9 = vpop.f32.mrf.mxu1 }
  0xf6   :  { %v460_v10 = vpop.f32.mrf.mxu1 }
  0xf8   :  { %v463_v11 = vpop.f32.mrf.mxu1 }
  0xfa   :  { %v465_v12 = vpop.f32.mrf.mxu1 }
  0xfc   :  { %v468_v14 = vpop.f32.mrf.mxu1 }
  0xfe   :  { %v470_v17 = vpop.f32.mrf.mxu1 }
 0x100   :  { %v473_v20 = vpop.f32.mrf.mxu1 }
 0x101   :  { %v278_v15 = vpop.f32.mrf.mxu0 }
 0x102   :  { %v279_v16 = vadd.f32 %v1093_v13, %v278_v15  ;;  %v475_v24 = vpop.f32.mrf.mxu1 }
 0x103   :  { %v280_v18 = vpop.f32.mrf.mxu0 }
 0x104   :  { %v444_v19 = vadd.f32 %v443_v4, %v279_v16  ;;  %v478_v27 = vpop.f32.mrf.mxu1 }
 0x105   :  { %v283_v21 = vpop.f32.mrf.mxu0 }
 0x106   :  { %v542_v22 = vmax.f32 %v444_v19, 0.0  ;;  %v284_v23 = vadd.f32 %v1093_v13, %v283_v21  ;;  %v480_v31 = vpop.f32.mrf.mxu1 }
 0x107   :  { %v285_v25 = vpop.f32.mrf.mxu0 }
 0x108   :  { %563 = vst.msk [vmem:[%s1198_s3] sm:$0xff] %vm562_vm1, %v542_v22  ;;  %v449_v26 = vadd.f32 %v448_v0, %v284_v23  ;;  %v483_v34 = vpop.f32.mrf.mxu1 }
 0x109   :  { %v288_v28 = vpop.f32.mrf.mxu0 }
 0x10a   :  { %v543_v29 = vmax.f32 %v449_v26, 0.0  ;;  %v289_v30 = vadd.f32 %v1093_v13, %v288_v28  ;;  %v485_v38 = vpop.f32.mrf.mxu1 }
 0x10b   :  { %v290_v32 = vpop.f32.mrf.mxu0 }
 0x10c   :  { %564 = vst.msk [vmem:[%s1198_s3 + $0x8] sm:$0xff] %vm562_vm1, %v543_v29  ;;  %v454_v33 = vadd.f32 %v453_v7, %v289_v30  ;;  %v488_v41 = vpop.f32.mrf.mxu1 }
 0x10d   :  { %v293_v35 = vpop.f32.mrf.mxu0 }
 0x10e   :  { %v544_v36 = vmax.f32 %v454_v33, 0.0  ;;  %v294_v37 = vadd.f32 %v1093_v13, %v293_v35  ;;  %v490_v45 = vpop.f32.mrf.mxu1 }
 0x10f   :  { %v295_v39 = vpop.f32.mrf.mxu0 }
 0x110   :  { %565 = vst.msk [vmem:[%s1198_s3 + $0x10] sm:$0xff] %vm562_vm1, %v544_v36  ;;  %v459_v40 = vadd.f32 %v458_v9, %v294_v37  ;;  %v493_v48 = vpop.f32.mrf.mxu1 }
 0x111   :  { %v298_v42 = vpop.f32.mrf.mxu0 }
 0x112   :  { %v545_v43 = vmax.f32 %v459_v40, 0.0  ;;  %v299_v44 = vadd.f32 %v1093_v13, %v298_v42  ;;  %v495_v52 = vpop.f32.mrf.mxu1 }
 0x113   :  { %v300_v46 = vpop.f32.mrf.mxu0 }
 0x114   :  { %566 = vst.msk [vmem:[%s1198_s3 + $0x18] sm:$0xff] %vm562_vm1, %v545_v43  ;;  %v464_v47 = vadd.f32 %v463_v11, %v299_v44  ;;  %v498_v55 = vpop.f32.mrf.mxu1 }
 0x115   :  { %v303_v49 = vpop.f32.mrf.mxu0 }
 0x116   :  { %v546_v50 = vmax.f32 %v464_v47, 0.0  ;;  %v304_v51 = vadd.f32 %v1093_v13, %v303_v49  ;;  %v500_v59 = vpop.f32.mrf.mxu1 }
 0x117   :  { %v305_v53 = vpop.f32.mrf.mxu0 }
 0x118   :  { %567 = vst.msk [vmem:[%s1198_s3 + $0x20] sm:$0xff] %vm562_vm1, %v546_v50  ;;  %v469_v54 = vadd.f32 %v468_v14, %v304_v51  ;;  %v503_v62 = vpop.f32.mrf.mxu1 }
 0x119   :  { %v308_v56 = vpop.f32.mrf.mxu0 }
 0x11a   :  { %v547_v57 = vmax.f32 %v469_v54, 0.0  ;;  %v309_v58 = vadd.f32 %v1093_v13, %v308_v56  ;;  %v505_v3 = vpop.f32.mrf.mxu1 }
 0x11b   :  { %v310_v60 = vpop.f32.mrf.mxu0 }
 0x11c   :  { %568 = vst.msk [vmem:[%s1198_s3 + $0x28] sm:$0xff] %vm562_vm1, %v547_v57  ;;  %v474_v61 = vadd.f32 %v473_v20, %v309_v58  ;;  %v508_v0 = vpop.f32.mrf.mxu1 }
 0x11d   :  { %v313_v63 = vpop.f32.mrf.mxu0 }
 0x11e   :  { %v548_v1 = vmax.f32 %v474_v61, 0.0  ;;  %v314_v2 = vadd.f32 %v1093_v13, %v313_v63  ;;  %v510_v9 = vpop.f32.mrf.mxu1 }
 0x11f   :  { %v315_v4 = vpop.f32.mrf.mxu0 }
 0x120   :  { %569 = vst.msk [vmem:[%s1198_s3 + $0x30] sm:$0xff] %vm562_vm1, %v548_v1  ;;  %v479_v5 = vadd.f32 %v478_v27, %v314_v2  ;;  %v513_v12 = vpop.f32.mrf.mxu1 }
 0x121   :  { %v318_v6 = vpop.f32.mrf.mxu0 }
 0x122   :  { %v549_v7 = vmax.f32 %v479_v5, 0.0  ;;  %v319_v8 = vadd.f32 %v1093_v13, %v318_v6  ;;  %v515_v17 = vpop.f32.mrf.mxu1 }
 0x123   :  { %v320_v10 = vpop.f32.mrf.mxu0 }
 0x124   :  { %570 = vst.msk [vmem:[%s1198_s3 + $0x38] sm:$0xff] %vm562_vm1, %v549_v7  ;;  %v484_v11 = vadd.f32 %v483_v34, %v319_v8  ;;  %v518_v20 = vpop.f32.mrf.mxu1 }
 0x125   :  { %v323_v14 = vpop.f32.mrf.mxu0 }
 0x126   :  { %v550_v15 = vmax.f32 %v484_v11, 0.0  ;;  %v324_v16 = vadd.f32 %v1093_v13, %v323_v14  ;;  %v520_v24 = vpop.f32.mrf.mxu1 }
 0x127   :  { %v325_v18 = vpop.f32.mrf.mxu0 }
 0x128   :  { %571 = vst.msk [vmem:[%s1198_s3 + $0x40] sm:$0xff] %vm562_vm1, %v550_v15  ;;  %v489_v19 = vadd.f32 %v488_v41, %v324_v16  ;;  %v523_v27 = vpop.f32.mrf.mxu1 }
 0x129   :  { %v328_v21 = vpop.f32.mrf.mxu0 }
 0x12a   :  { %v551_v22 = vmax.f32 %v489_v19, 0.0  ;;  %v329_v23 = vadd.f32 %v1093_v13, %v328_v21  ;;  %v525_v31 = vpop.f32.mrf.mxu1 }
 0x12b   :  { %v330_v25 = vpop.f32.mrf.mxu0 }
 0x12c   :  { %572 = vst.msk [vmem:[%s1198_s3 + $0x48] sm:$0xff] %vm562_vm1, %v551_v22  ;;  %v494_v26 = vadd.f32 %v493_v48, %v329_v23  ;;  %v528_v34 = vpop.f32.mrf.mxu1 }
 0x12d   :  { %v333_v28 = vpop.f32.mrf.mxu0 }
 0x12e   :  { %v552_v29 = vmax.f32 %v494_v26, 0.0  ;;  %v334_v30 = vadd.f32 %v1093_v13, %v333_v28  ;;  %v530_v38 = vpop.f32.mrf.mxu1 }
 0x12f   :  { %v335_v32 = vpop.f32.mrf.mxu0 }
 0x130   :  { %573 = vst.msk [vmem:[%s1198_s3 + $0x50] sm:$0xff] %vm562_vm1, %v552_v29  ;;  %v499_v33 = vadd.f32 %v498_v55, %v334_v30  ;;  %v533_v41 = vpop.f32.mrf.mxu1 }
 0x131   :  { %v338_v35 = vpop.f32.mrf.mxu0 }
 0x132   :  { %v553_v36 = vmax.f32 %v499_v33, 0.0  ;;  %v339_v37 = vadd.f32 %v1093_v13, %v338_v35  ;;  %v535_v45 = vpop.f32.mrf.mxu1 }
 0x133   :  { %v340_v39 = vpop.f32.mrf.mxu0 }
 0x134   :  { %574 = vst.msk [vmem:[%s1198_s3 + $0x58] sm:$0xff] %vm562_vm1, %v553_v36  ;;  %v504_v40 = vadd.f32 %v503_v62, %v339_v37  ;;  %v538_v48 = vpop.f32.mrf.mxu1 }
 0x135   :  { %v343_v42 = vpop.f32.mrf.mxu0 }
 0x136   :  { %v554_v43 = vmax.f32 %v504_v40, 0.0  ;;  %v344_v44 = vadd.f32 %v1093_v13, %v343_v42  ;;  %v540_v52 = vpop.f32.mrf.mxu1 }
 0x137   :  { %v345_v46 = vpop.f32.mrf.mxu0 }
 0x138   :  { %575 = vst.msk [vmem:[%s1198_s3 + $0x60] sm:$0xff] %vm562_vm1, %v554_v43  ;;  %v509_v47 = vadd.f32 %v508_v0, %v344_v44 }
 0x139   :  { %v348_v49 = vpop.f32.mrf.mxu0 }
 0x13a   :  { %v555_v50 = vmax.f32 %v509_v47, 0.0  ;;  %v349_v51 = vadd.f32 %v1093_v13, %v348_v49 }
 0x13b   :  { %v350_v53 = vpop.f32.mrf.mxu0 }
 0x13c   :  { %576 = vst.msk [vmem:[%s1198_s3 + $0x68] sm:$0xff] %vm562_vm1, %v555_v50  ;;  %v514_v54 = vadd.f32 %v513_v12, %v349_v51 }
 0x13d   :  { %v353_v55 = vpop.f32.mrf.mxu0 }
 0x13e   :  { %v556_v56 = vmax.f32 %v514_v54, 0.0  ;;  %v354_v57 = vadd.f32 %v1093_v13, %v353_v55 }
 0x13f   :  { %v355_v58 = vpop.f32.mrf.mxu0 }
 0x140   :  { %577 = vst.msk [vmem:[%s1198_s3 + $0x70] sm:$0xff] %vm562_vm1, %v556_v56  ;;  %v519_v59 = vadd.f32 %v518_v20, %v354_v57 }
 0x141   :  { %v358_v60 = vpop.f32.mrf.mxu0 }
 0x142   :  { %v557_v61 = vmax.f32 %v519_v59, 0.0  ;;  %v359_v62 = vadd.f32 %v1093_v13, %v358_v60 }
 0x143   :  { %v360_v63 = vpop.f32.mrf.mxu0 }
 0x144   :  { %578 = vst.msk [vmem:[%s1198_s3 + $0x78] sm:$0xff] %vm562_vm1, %v557_v61  ;;  %v524_v1 = vadd.f32 %v523_v27, %v359_v62 }
 0x145   :  { %v363_v2 = vpop.f32.mrf.mxu0 }
 0x146   :  { %v558_v3 = vmax.f32 %v524_v1, 0.0  ;;  %v364_v4 = vadd.f32 %v1093_v13, %v363_v2 }
 0x147   :  { %v365_v5 = vpop.f32.mrf.mxu0 }
 0x148   :  { %579 = vst.msk [vmem:[%s1198_s3 + $0x80] sm:$0xff] %vm562_vm1, %v558_v3  ;;  %v529_v0 = vadd.f32 %v528_v34, %v364_v4 }
 0x149   :  { %v368_v6 = vpop.f32.mrf.mxu0 }
 0x14a   :  { %v559_v7 = vmax.f32 %v529_v0, 0.0  ;;  %v369_v8 = vadd.f32 %v1093_v13, %v368_v6 }
 0x14b   :  { %v370_v9 = vpop.f32.mrf.mxu0 }
 0x14c   :  { %580 = vst.msk [vmem:[%s1198_s3 + $0x88] sm:$0xff] %vm562_vm1, %v559_v7  ;;  %v534_v10 = vadd.f32 %v533_v41, %v369_v8 }
 0x14d   :  { %v373_v11 = vpop.f32.mrf.mxu0 }
 0x14e   :  { %v560_v12 = vmax.f32 %v534_v10, 0.0  ;;  %v374_v14 = vadd.f32 %v1093_v13, %v373_v11 }
 0x14f   :  { %v375_v15 = vpop.f32.mrf.mxu0 }
 0x150   :  { %581 = vst.msk [vmem:[%s1198_s3 + $0x90] sm:$0xff] %vm562_vm1, %v560_v12  ;;  %v539_v16 = vadd.f32 %v538_v48, %v374_v14 }
 0x152   :  { %v561_v17 = vmax.f32 %v539_v16, 0.0 }
 0x154   :  { %582 = vst.msk [vmem:[%s1198_s3 + $0x98] sm:$0xff] %vm562_vm1, %v561_v17 }

// kernel: _lambda_.17
= control target key start
LH: loop header
LB: loop body
LE: loop exit
PB: predicated region body
PF: predicated region fallthrough
CT: control target
= control target key end

     0   :  { %vm191_vm0 = vcmask 261120   ;;  %vm692_vm1 = vcmask 523264   ;;  %s1625_s1 = inlined_call_operand.vmem [shape: f32[800,64], index: 1, kind: input, shape index: {}]   ;;  %s1626_s0 = inlined_call_operand.vmem [shape: f32[80,800], index: 0, kind: input, shape index: {}]   ;;  %s1627_s2 = inlined_call_operand.vmem [shape: f32[1,64], index: 2, kind: input, shape index: {}]   ;;  %s1628_s3 = inlined_call_operand.vmem [shape: f32[80,64], index: 3, kind: output, shape index: {}]  }
   0x1   :  { %v115_v0 = vld [vmem:[%s1625_s1 + $0xf8] sm:$0xff]  ;;  %v114_v4 = vld [vmem:[%s1625_s1 + $0xf0] sm:$0xff]  ;;  %v113_v8 = vld [vmem:[%s1625_s1 + $0xe8] sm:$0xff] }
   0x2   :  { %v147_v1 = vld [vmem:[%s1625_s1 + $0x1f8] sm:$0xff]  ;;  %718 = vmatprep.subr.mxu0 %v115_v0  ;;  %v146_v5 = vld [vmem:[%s1625_s1 + $0x1f0] sm:$0xff]  ;;  %v145_v9 = vld [vmem:[%s1625_s1 + $0x1e8] sm:$0xff] }
   0x3   :  { %v99_v2 = vld [vmem:[%s1625_s1 + $0x78] sm:$0xff]  ;;  %780 = vmatprep.subr.mxu1 %v147_v1  ;;  %v98_v6 = vld [vmem:[%s1625_s1 + $0x70] sm:$0xff]  ;;  %v97_v10 = vld [vmem:[%s1625_s1 + $0x68] sm:$0xff] }
   0x4   :  { %v131_v3 = vld [vmem:[%s1625_s1 + $0x178] sm:$0xff]  ;;  %719 = vmatpush3.msra.mxu0 %v99_v2  ;;  %v130_v7 = vld [vmem:[%s1625_s1 + $0x170] sm:$0xff]  ;;  %v129_v11 = vld [vmem:[%s1625_s1 + $0x168] sm:$0xff] }
   0x5   :  { %781 = vmatpush3.msra.mxu1 %v131_v3  ;;  %720 = vmatprep.subr.mxu0 %v114_v4  ;;  %v112_v12 = vld [vmem:[%s1625_s1 + $0xe0] sm:$0xff]  ;;  %v111_v16 = vld [vmem:[%s1625_s1 + $0xd8] sm:$0xff]  ;;  %v110_v20 = vld [vmem:[%s1625_s1 + $0xd0] sm:$0xff] }
   0x6   :  { %782 = vmatprep.subr.mxu1 %v146_v5  ;;  %721 = vmatpush3.msra.mxu0 %v98_v6  ;;  %v144_v13 = vld [vmem:[%s1625_s1 + $0x1e0] sm:$0xff]  ;;  %v143_v17 = vld [vmem:[%s1625_s1 + $0x1d8] sm:$0xff]  ;;  %v142_v21 = vld [vmem:[%s1625_s1 + $0x1d0] sm:$0xff] }
   0x7   :  { %783 = vmatpush3.msra.mxu1 %v130_v7  ;;  %722 = vmatprep.subr.mxu0 %v113_v8  ;;  %v96_v14 = vld [vmem:[%s1625_s1 + $0x60] sm:$0xff]  ;;  %v95_v18 = vld [vmem:[%s1625_s1 + $0x58] sm:$0xff]  ;;  %v94_v22 = vld [vmem:[%s1625_s1 + $0x50] sm:$0xff] }
   0x8   :  { %784 = vmatprep.subr.mxu1 %v145_v9  ;;  %v128_v15 = vld [vmem:[%s1625_s1 + $0x160] sm:$0xff]  ;;  %723 = vmatpush3.msra.mxu0 %v97_v10  ;;  %v127_v19 = vld [vmem:[%s1625_s1 + $0x158] sm:$0xff]  ;;  %v126_v23 = vld [vmem:[%s1625_s1 + $0x150] sm:$0xff] }
   0x9   :  { %785 = vmatpush3.msra.mxu1 %v129_v11  ;;  %724 = vmatprep.subr.mxu0 %v112_v12  ;;  %v109_v24 = vld [vmem:[%s1625_s1 + $0xc8] sm:$0xff]  ;;  %v108_v28 = vld [vmem:[%s1625_s1 + $0xc0] sm:$0xff]  ;;  %v107_v32 = vld [vmem:[%s1625_s1 + $0xb8] sm:$0xff] }
   0xa   :  { %786 = vmatprep.subr.mxu1 %v144_v13  ;;  %725 = vmatpush3.msra.mxu0 %v96_v14  ;;  %v141_v25 = vld [vmem:[%s1625_s1 + $0x1c8] sm:$0xff]  ;;  %v140_v29 = vld [vmem:[%s1625_s1 + $0x1c0] sm:$0xff]  ;;  %v139_v33 = vld [vmem:[%s1625_s1 + $0x1b8] sm:$0xff] }
   0xb   :  { %787 = vmatpush3.msra.mxu1 %v128_v15  ;;  %726 = vmatprep.subr.mxu0 %v111_v16  ;;  %v93_v26 = vld [vmem:[%s1625_s1 + $0x48] sm:$0xff]  ;;  %v92_v30 = vld [vmem:[%s1625_s1 + $0x40] sm:$0xff]  ;;  %v91_v34 = vld [vmem:[%s1625_s1 + $0x38] sm:$0xff] }
   0xc   :  { %788 = vmatprep.subr.mxu1 %v143_v17  ;;  %727 = vmatpush3.msra.mxu0 %v95_v18  ;;  %v125_v27 = vld [vmem:[%s1625_s1 + $0x148] sm:$0xff]  ;;  %v124_v31 = vld [vmem:[%s1625_s1 + $0x140] sm:$0xff]  ;;  %v123_v35 = vld [vmem:[%s1625_s1 + $0x138] sm:$0xff] }
   0xd   :  { %789 = vmatpush3.msra.mxu1 %v127_v19  ;;  %728 = vmatprep.subr.mxu0 %v110_v20  ;;  %v106_v36 = vld [vmem:[%s1625_s1 + $0xb0] sm:$0xff]  ;;  %v105_v40 = vld [vmem:[%s1625_s1 + $0xa8] sm:$0xff]  ;;  %v104_v44 = vld [vmem:[%s1625_s1 + $0xa0] sm:$0xff] }
   0xe   :  { %790 = vmatprep.subr.mxu1 %v142_v21  ;;  %729 = vmatpush3.msra.mxu0 %v94_v22  ;;  %v138_v37 = vld [vmem:[%s1625_s1 + $0x1b0] sm:$0xff]  ;;  %v137_v41 = vld [vmem:[%s1625_s1 + $0x1a8] sm:$0xff]  ;;  %v136_v45 = vld [vmem:[%s1625_s1 + $0x1a0] sm:$0xff] }
   0xf   :  { %791 = vmatpush3.msra.mxu1 %v126_v23  ;;  %730 = vmatprep.subr.mxu0 %v109_v24  ;;  %v90_v38 = vld [vmem:[%s1625_s1 + $0x30] sm:$0xff]  ;;  %v89_v42 = vld [vmem:[%s1625_s1 + $0x28] sm:$0xff]  ;;  %v88_v46 = vld [vmem:[%s1625_s1 + $0x20] sm:$0xff] }
  0x10   :  { %792 = vmatprep.subr.mxu1 %v141_v25  ;;  %731 = vmatpush3.msra.mxu0 %v93_v26  ;;  %v122_v39 = vld [vmem:[%s1625_s1 + $0x130] sm:$0xff]  ;;  %v121_v43 = vld [vmem:[%s1625_s1 + $0x128] sm:$0xff]  ;;  %v120_v47 = vld [vmem:[%s1625_s1 + $0x120] sm:$0xff] }
  0x11   :  { %793 = vmatpush3.msra.mxu1 %v125_v27  ;;  %732 = vmatprep.subr.mxu0 %v108_v28  ;;  %v103_v48 = vld [vmem:[%s1625_s1 + $0x98] sm:$0xff]  ;;  %v102_v52 = vld [vmem:[%s1625_s1 + $0x90] sm:$0xff]  ;;  %v101_v56 = vld [vmem:[%s1625_s1 + $0x88] sm:$0xff] }
  0x12   :  { %794 = vmatprep.subr.mxu1 %v140_v29  ;;  %733 = vmatpush3.msra.mxu0 %v92_v30  ;;  %v135_v49 = vld [vmem:[%s1625_s1 + $0x198] sm:$0xff]  ;;  %v134_v53 = vld [vmem:[%s1625_s1 + $0x190] sm:$0xff]  ;;  %v133_v57 = vld [vmem:[%s1625_s1 + $0x188] sm:$0xff] }
  0x13   :  { %795 = vmatpush3.msra.mxu1 %v124_v31  ;;  %734 = vmatprep.subr.mxu0 %v107_v32  ;;  %v87_v50 = vld [vmem:[%s1625_s1 + $0x18] sm:$0xff]  ;;  %v86_v54 = vld [vmem:[%s1625_s1 + $0x10] sm:$0xff]  ;;  %v85_v58 = vld [vmem:[%s1625_s1 + $0x8] sm:$0xff] }
  0x14   :  { %796 = vmatprep.subr.mxu1 %v139_v33  ;;  %735 = vmatpush3.msra.mxu0 %v91_v34  ;;  %v119_v51 = vld [vmem:[%s1625_s1 + $0x118] sm:$0xff]  ;;  %v118_v55 = vld [vmem:[%s1625_s1 + $0x110] sm:$0xff]  ;;  %v117_v59 = vld [vmem:[%s1625_s1 + $0x108] sm:$0xff] }
  0x15   :  { %797 = vmatpush3.msra.mxu1 %v123_v35  ;;  %736 = vmatprep.subr.mxu0 %v106_v36  ;;  %v100_v60 = vld [vmem:[%s1625_s1 + $0x80] sm:$0xff]  ;;  %v15_v63 = vld [vmem:[%s1626_s0 + $0x8] sm:$0xff]  ;;  %v17_v1 = vld [vmem:[%s1626_s0 + $0x18] sm:$0xff] }
  0x16   :  { %798 = vmatprep.subr.mxu1 %v138_v37  ;;  %737 = vmatpush3.msra.mxu0 %v90_v38  ;;  %v132_v61 = vld [vmem:[%s1625_s1 + $0x180] sm:$0xff]  ;;  %v16_v3 = vld [vmem:[%s1626_s0 + $0x10] sm:$0xff]  ;;  %v179_v4 = vld [vmem:[%s1625_s1 + $0x2f8] sm:$0xff] }
  0x17   :  { %799 = vmatpush3.msra.mxu1 %v122_v39  ;;  %738 = vmatprep.subr.mxu0 %v105_v40  ;;  %v84_v62 = vld [vmem:[%s1625_s1] sm:$0xff]  ;;  %v163_v6 = vld [vmem:[%s1625_s1 + $0x278] sm:$0xff]  ;;  %v24_v7 = vld [vmem:[%s1626_s0 + $0x50] sm:$0xff] }
  0x18   :  { %800 = vmatprep.subr.mxu1 %v137_v41  ;;  %739 = vmatpush3.msra.mxu0 %v89_v42  ;;  %v116_v0 = vld [vmem:[%s1625_s1 + $0x100] sm:$0xff]  ;;  %v178_v8 = vld [vmem:[%s1625_s1 + $0x2f0] sm:$0xff]  ;;  %v21_v9 = vld [vmem:[%s1626_s0 + $0x38] sm:$0xff] }
  0x19   :  { %801 = vmatpush3.msra.mxu1 %v121_v43  ;;  %740 = vmatprep.subr.mxu0 %v104_v44  ;;  %v14_v2 = vld [vmem:[%s1626_s0] sm:$0xff]  ;;  %v23_v10 = vld [vmem:[%s1626_s0 + $0x48] sm:$0xff]  ;;  %v162_v11 = vld [vmem:[%s1625_s1 + $0x270] sm:$0xff] }
  0x1a   :  { %802 = vmatprep.subr.mxu1 %v136_v45  ;;  %741 = vmatpush3.msra.mxu0 %v88_v46  ;;  %v22_v5 = vld [vmem:[%s1626_s0 + $0x40] sm:$0xff]  ;;  %v29_v12 = vld [vmem:[%s1626_s0 + $0x78] sm:$0xff]  ;;  %v177_v13 = vld [vmem:[%s1625_s1 + $0x2e8] sm:$0xff] }
  0x1b   :  { %803 = vmatpush3.msra.mxu1 %v120_v47  ;;  %742 = vmatprep.subr.mxu0 %v103_v48  ;;  %v31_v14 = vld [vmem:[%s1626_s0 + $0x88] sm:$0xff]  ;;  %v28_v16 = vld [vmem:[%s1626_s0 + $0x70] sm:$0xff]  ;;  %v30_v17 = vld [vmem:[%s1626_s0 + $0x80] sm:$0xff] }
  0x1c   :  { %804 = vmatprep.subr.mxu1 %v135_v49  ;;  %743 = vmatpush3.msra.mxu0 %v87_v50  ;;  %v161_v15 = vld [vmem:[%s1625_s1 + $0x268] sm:$0xff]  ;;  %v176_v18 = vld [vmem:[%s1625_s1 + $0x2e0] sm:$0xff]  ;;  %v36_v20 = vld [vmem:[%s1626_s0 + $0xb0] sm:$0xff] }
  0x1d   :  { %805 = vmatpush3.msra.mxu1 %v119_v51  ;;  %744 = vmatprep.subr.mxu0 %v102_v52  ;;  %v160_v19 = vld [vmem:[%s1625_s1 + $0x260] sm:$0xff]  ;;  %v175_v21 = vld [vmem:[%s1625_s1 + $0x2d8] sm:$0xff]  ;;  %v35_v24 = vld [vmem:[%s1626_s0 + $0xa8] sm:$0xff] }
  0x1e   :  { %806 = vmatprep.subr.mxu1 %v134_v53  ;;  %745 = vmatpush3.msra.mxu0 %v86_v54  ;;  %v38_v22 = vld [vmem:[%s1626_s0 + $0xc0] sm:$0xff]  ;;  %v159_v23 = vld [vmem:[%s1625_s1 + $0x258] sm:$0xff]  ;;  %v174_v26 = vld [vmem:[%s1625_s1 + $0x2d0] sm:$0xff] }
  0x1f   :  { %807 = vmatpush3.msra.mxu1 %v118_v55  ;;  %746 = vmatprep.subr.mxu0 %v101_v56  ;;  %v37_v25 = vld [vmem:[%s1626_s0 + $0xb8] sm:$0xff]  ;;  %v158_v27 = vld [vmem:[%s1625_s1 + $0x250] sm:$0xff]  ;;  %v43_v28 = vld [vmem:[%s1626_s0 + $0xe8] sm:$0xff] }
  0x20   :  { %808 = vmatprep.subr.mxu1 %v133_v57  ;;  %747 = vmatpush3.msra.mxu0 %v85_v58  ;;  %v45_v29 = vld [vmem:[%s1626_s0 + $0xf8] sm:$0xff]  ;;  %v173_v30 = vld [vmem:[%s1625_s1 + $0x2c8] sm:$0xff]  ;;  %v42_v31 = vld [vmem:[%s1626_s0 + $0xe0] sm:$0xff] }
  0x21   :  { %809 = vmatpush3.msra.mxu1 %v117_v59  ;;  %748 = vmatprep.subr.mxu0 %v100_v60  ;;  %v44_v32 = vld [vmem:[%s1626_s0 + $0xf0] sm:$0xff]  ;;  %v157_v33 = vld [vmem:[%s1625_s1 + $0x248] sm:$0xff]  ;;  %v172_v34 = vld [vmem:[%s1625_s1 + $0x2c0] sm:$0xff] }
  0x22   :  { %810 = vmatprep.subr.mxu1 %v132_v61  ;;  %749 = vmatpush3.msra.mxu0 %v84_v62  ;;  %v50_v35 = vld [vmem:[%s1626_s0 + $0x120] sm:$0xff]  ;;  %v52_v36 = vld [vmem:[%s1626_s0 + $0x130] sm:$0xff]  ;;  %v49_v38 = vld [vmem:[%s1626_s0 + $0x118] sm:$0xff] }
  0x23   :  { %286 = vmatprep.mubr.f32.mxu0 %v15_v63  ;;  %811 = vmatpush3.msra.mxu1 %v116_v0  ;;  %v156_v37 = vld [vmem:[%s1625_s1 + $0x240] sm:$0xff]  ;;  %v51_v39 = vld [vmem:[%s1626_s0 + $0x128] sm:$0xff]  ;;  %v171_v40 = vld [vmem:[%s1625_s1 + $0x2b8] sm:$0xff] }
  0x24   :  { %401 = vmatprep.mubr.f32.mxu1 %v17_v1  ;;  %287 = vmatmul.mubr.f32.vlgmr.msra.gmra.mxu0 %v14_v2  ;;  %v155_v41 = vld [vmem:[%s1625_s1 + $0x238] sm:$0xff]  ;;  %v59_v43 = vld [vmem:[%s1626_s0 + $0x168] sm:$0xff]  ;;  %v170_v44 = vld [vmem:[%s1625_s1 + $0x2b0] sm:$0xff] }
  0x25   :  { %402 = vmatmul.mubr.f32.vlgmr.msra.gmra.mxu1 %v16_v3  ;;  %842 = vmatprep.subr.mxu0 %v179_v4  ;;  %v57_v42 = vld [vmem:[%s1626_s0 + $0x158] sm:$0xff]  ;;  %v56_v45 = vld [vmem:[%s1626_s0 + $0x150] sm:$0xff]  ;;  %v58_v46 = vld [vmem:[%s1626_s0 + $0x160] sm:$0xff] }
  0x26   :  { %291 = vmatprep.mubr.f32.mxu0 %v22_v5  ;;  %843 = vmatpush3.msra.mxu0 %v163_v6  ;;  %v154_v47 = vld [vmem:[%s1625_s1 + $0x230] sm:$0xff]  ;;  %v169_v48 = vld [vmem:[%s1625_s1 + $0x2a8] sm:$0xff]  ;;  %v66_v51 = vld [vmem:[%s1626_s0 + $0x1a0] sm:$0xff] }
  0x27   :  { %406 = vmatprep.mubr.f32.mxu1 %v24_v7  ;;  %844 = vmatprep.subr.mxu0 %v178_v8  ;;  %v153_v49 = vld [vmem:[%s1625_s1 + $0x228] sm:$0xff]  ;;  %v64_v50 = vld [vmem:[%s1626_s0 + $0x190] sm:$0xff]  ;;  %v65_v53 = vld [vmem:[%s1626_s0 + $0x198] sm:$0xff] }
  0x28   :  { %941 = vmatprep.subr.mxu1 %v179_v4  ;;  %292 = vmatmul.mubr.f32.gmra.mxu0 %v21_v9  ;;  %v63_v52 = vld [vmem:[%s1626_s0 + $0x188] sm:$0xff]  ;;  %v168_v54 = vld [vmem:[%s1625_s1 + $0x2a0] sm:$0xff]  ;;  %v167_v56 = vld [vmem:[%s1625_s1 + $0x298] sm:$0xff] }
  0x29   :  { %407 = vmatmul.mubr.f32.gmra.mxu1 %v23_v10  ;;  %845 = vmatpush3.msra.mxu0 %v162_v11  ;;  %v152_v55 = vld [vmem:[%s1625_s1 + $0x220] sm:$0xff]  ;;  %v71_v57 = vld [vmem:[%s1626_s0 + $0x1c8] sm:$0xff]  ;;  %v73_v58 = vld [vmem:[%s1626_s0 + $0x1d8] sm:$0xff] }
  0x2a   :  { %296 = vmatprep.mubr.f32.mxu0 %v29_v12  ;;  %846 = vmatprep.subr.mxu0 %v177_v13  ;;  %v151_v59 = vld [vmem:[%s1625_s1 + $0x218] sm:$0xff]  ;;  %v70_v60 = vld [vmem:[%s1626_s0 + $0x1c0] sm:$0xff]  ;;  %v72_v61 = vld [vmem:[%s1626_s0 + $0x1d0] sm:$0xff] }
  0x2b   :  { %411 = vmatprep.mubr.f32.mxu1 %v31_v14  ;;  %847 = vmatpush3.msra.mxu0 %v161_v15  ;;  %v166_v62 = vld [vmem:[%s1625_s1 + $0x290] sm:$0xff]  ;;  %v78_v0 = vld [vmem:[%s1626_s0 + $0x200] sm:$0xff]  ;;  %v165_v2 = vld [vmem:[%s1625_s1 + $0x288] sm:$0xff] }
  0x2c   :  { %957 = vmatpush3.msra.mxu1 %v163_v6  ;;  %297 = vmatmul.mubr.f32.gmra.mxu0 %v28_v16  ;;  %v150_v63 = vld [vmem:[%s1625_s1 + $0x210] sm:$0xff]  ;;  %v77_v3 = vld [vmem:[%s1626_s0 + $0x1f8] sm:$0xff]  ;;  %v79_v4 = vld [vmem:[%s1626_s0 + $0x208] sm:$0xff] }
  0x2d   :  { %412 = vmatmul.mubr.f32.gmra.mxu1 %v30_v17  ;;  %848 = vmatprep.subr.mxu0 %v176_v18  ;;  %v80_v1 = vld [vmem:[%s1626_s0 + $0x210] sm:$0xff]  ;;  %v149_v5 = vld [vmem:[%s1625_s1 + $0x208] sm:$0xff]  ;;  %v164_v6 = vld [vmem:[%s1625_s1 + $0x280] sm:$0xff] }
  0x2e   :  { %942 = vmatprep.subr.mxu1 %v178_v8  ;;  %849 = vmatpush3.msra.mxu0 %v160_v19  ;;  %v148_v7 = vld [vmem:[%s1625_s1 + $0x200] sm:$0xff]  ;;  %v19_v8 = vld [vmem:[%s1626_s0 + $0x28] sm:$0xff]  ;;  %v183_v12 = vld [vmem:[%s1625_s1 + $0x318] sm:$0xff] }
  0x2f   :  { %301 = vmatprep.mubr.f32.mxu0 %v36_v20  ;;  %850 = vmatprep.subr.mxu0 %v175_v21  ;;  %v75_v9 = vld [vmem:[%s1626_s0 + $0x1e8] sm:$0xff]  ;;  %v18_v10 = vld [vmem:[%s1626_s0 + $0x20] sm:$0xff]  ;;  %v25_v16 = vld [vmem:[%s1626_s0 + $0x58] sm:$0xff] }
  0x30   :  { %416 = vmatprep.mubr.f32.mxu1 %v38_v22  ;;  %958 = vmatpush3.msra.mxu1 %v162_v11  ;;  %v74_v11 = vld [vmem:[%s1626_s0 + $0x1e0] sm:$0xff]  ;;  %v81_v17 = vld [vmem:[%s1626_s0 + $0x218] sm:$0xff]  ;;  %v32_v22 = vld [vmem:[%s1626_s0 + $0x90] sm:$0xff] }
  0x31   :  { %851 = vmatpush3.msra.mxu0 %v159_v23  ;;  %417 = vmatmul.mubr.f32.gmra.mxu1 %v37_v25  ;;  %v82_v14 = vld [vmem:[%s1626_s0 + $0x220] sm:$0xff] }
  0x32   :  { %302 = vmatmul.mubr.f32.gmra.mxu0 %v35_v24  ;;  %943 = vmatprep.subr.mxu1 %v177_v13  ;;  %v26_v13 = vld [vmem:[%s1626_s0 + $0x60] sm:$0xff]  ;;  %v40_v24 = vld [vmem:[%s1626_s0 + $0xd0] sm:$0xff] }
  0x33   :  { %852 = vmatprep.subr.mxu0 %v174_v26  ;;  %959 = vmatpush3.msra.mxu1 %v161_v15  ;;  %v182_v15 = vld [vmem:[%s1625_s1 + $0x310] sm:$0xff]  ;;  %v180_v20 = vld [vmem:[%s1625_s1 + $0x300] sm:$0xff] }
  0x34   :  { %853 = vmatpush3.msra.mxu0 %v158_v27  ;;  %944 = vmatprep.subr.mxu1 %v176_v18  ;;  %v181_v18 = vld [vmem:[%s1625_s1 + $0x308] sm:$0xff]  ;;  %v34_v25 = vld [vmem:[%s1626_s0 + $0xa0] sm:$0xff] }
  0x35   :  { %306 = vmatprep.mubr.f32.mxu0 %v43_v28  ;;  %421 = vmatprep.mubr.f32.mxu1 %v45_v29  ;;  %v47_v28 = vld [vmem:[%s1626_s0 + $0x108] sm:$0xff]  ;;  %v48_v29 = vld [vmem:[%s1626_s0 + $0x110] sm:$0xff] }
  0x36   :  { %960 = vmatpush3.msra.mxu1 %v160_v19  ;;  %854 = vmatprep.subr.mxu0 %v173_v30  ;;  %v33_v19 = vld [vmem:[%s1626_s0 + $0x98] sm:$0xff] }
  0x37   :  { %307 = vmatmul.mubr.f32.gmra.mxu0 %v42_v31  ;;  %422 = vmatmul.mubr.f32.gmra.mxu1 %v44_v32  ;;  %v55_v31 = vld [vmem:[%s1626_s0 + $0x148] sm:$0xff]  ;;  %v54_v32 = vld [vmem:[%s1626_s0 + $0x140] sm:$0xff] }
  0x38   :  { %945 = vmatprep.subr.mxu1 %v175_v21  ;;  %855 = vmatpush3.msra.mxu0 %v157_v33  ;;  %v20_v21 = vld [vmem:[%s1626_s0 + $0x30] sm:$0xff] }
  0x39   :  { %961 = vmatpush3.msra.mxu1 %v159_v23  ;;  %856 = vmatprep.subr.mxu0 %v172_v34  ;;  %v27_v23 = vld [vmem:[%s1626_s0 + $0x68] sm:$0xff] }
  0x3a   :  { %946 = vmatprep.subr.mxu1 %v174_v26  ;;  %311 = vmatprep.mubr.f32.mxu0 %v50_v35  ;;  %v39_v26 = vld [vmem:[%s1626_s0 + $0xc8] sm:$0xff]  ;;  %v69_v35 = vld [vmem:[%s1626_s0 + $0x1b8] sm:$0xff] }
  0x3b   :  { %426 = vmatprep.mubr.f32.mxu1 %v52_v36  ;;  %962 = vmatpush3.msra.mxu1 %v158_v27  ;;  %v41_v27 = vld [vmem:[%s1626_s0 + $0xd8] sm:$0xff] }
  0x3c   :  { %857 = vmatpush3.msra.mxu0 %v156_v37  ;;  %427 = vmatmul.mubr.f32.gmra.mxu1 %v51_v39  ;;  %v61_v36 = vld [vmem:[%s1626_s0 + $0x178] sm:$0xff]  ;;  %v83_v39 = vld [vmem:[%s1626_s0 + $0x228] sm:$0xff] }
  0x3d   :  { %312 = vmatmul.mubr.f32.gmra.mxu0 %v49_v38  ;;  %947 = vmatprep.subr.mxu1 %v173_v30  ;;  %v46_v30 = vld [vmem:[%s1626_s0 + $0x100] sm:$0xff]  ;;  %v60_v38 = vld [vmem:[%s1626_s0 + $0x170] sm:$0xff] }
  0x3e   :  { %858 = vmatprep.subr.mxu0 %v171_v40  ;;  %963 = vmatpush3.msra.mxu1 %v157_v33  ;;  %v62_v33 = vld [vmem:[%s1626_s0 + $0x180] sm:$0xff] }
  0x3f   :  { %859 = vmatpush3.msra.mxu0 %v155_v41  ;;  %948 = vmatprep.subr.mxu1 %v172_v34  ;;  %v53_v34 = vld [vmem:[%s1626_s0 + $0x138] sm:$0xff] }
  0x40   :  { %316 = vmatprep.mubr.f32.mxu0 %v57_v42  ;;  %431 = vmatprep.mubr.f32.mxu1 %v59_v43 }
  0x41   :  { %964 = vmatpush3.msra.mxu1 %v156_v37  ;;  %860 = vmatprep.subr.mxu0 %v170_v44  ;;  %v76_v37 = vld [vmem:[%s1626_s0 + $0x1f0] sm:$0xff] }
  0x42   :  { %317 = vmatmul.mubr.f32.gmra.mxu0 %v56_v45  ;;  %432 = vmatmul.mubr.f32.gmra.mxu1 %v58_v46 }
  0x43   :  { %949 = vmatprep.subr.mxu1 %v171_v40  ;;  %861 = vmatpush3.msra.mxu0 %v154_v47  ;;  %v68_v40 = vld [vmem:[%s1626_s0 + $0x1b0] sm:$0xff] }
  0x44   :  { %965 = vmatpush3.msra.mxu1 %v155_v41  ;;  %862 = vmatprep.subr.mxu0 %v169_v48  ;;  %v67_v41 = vld [vmem:[%s1626_s0 + $0x1a8] sm:$0xff] }
  0x45   :  { %950 = vmatprep.subr.mxu1 %v170_v44  ;;  %863 = vmatpush3.msra.mxu0 %v153_v49 }
  0x46   :  { %321 = vmatprep.mubr.f32.mxu0 %v64_v50  ;;  %436 = vmatprep.mubr.f32.mxu1 %v66_v51 }
  0x47   :  { %966 = vmatpush3.msra.mxu1 %v154_v47  ;;  %322 = vmatmul.mubr.f32.gmra.mxu0 %v63_v52 }
  0x48   :  { %437 = vmatmul.mubr.f32.gmra.mxu1 %v65_v53  ;;  %951 = vmatprep.subr.mxu1 %v169_v48 }
  0x49   :  { %864 = vmatprep.subr.mxu0 %v168_v54  ;;  %967 = vmatpush3.msra.mxu1 %v153_v49 }
  0x4a   :  { %865 = vmatpush3.msra.mxu0 %v152_v55  ;;  %952 = vmatprep.subr.mxu1 %v168_v54 }
  0x4b   :  { %866 = vmatprep.subr.mxu0 %v167_v56  ;;  %326 = vmatprep.mubr.f32.mxu0 %v71_v57 }
  0x4c   :  { %441 = vmatprep.mubr.f32.mxu1 %v73_v58  ;;  %968 = vmatpush3.msra.mxu1 %v152_v55 }
  0x4d   :  { %867 = vmatpush3.msra.mxu0 %v151_v59  ;;  %442 = vmatmul.mubr.f32.gmra.mxu1 %v72_v61 }
  0x4e   :  { %327 = vmatmul.mubr.f32.gmra.mxu0 %v70_v60  ;;  %953 = vmatprep.subr.mxu1 %v167_v56 }
  0x4f   :  { %868 = vmatprep.subr.mxu0 %v166_v62  ;;  %969 = vmatpush3.msra.mxu1 %v151_v59 }
  0x50   :  { %869 = vmatpush3.msra.mxu0 %v150_v63  ;;  %954 = vmatprep.subr.mxu1 %v166_v62 }
  0x51   :  { %331 = vmatprep.mubr.f32.mxu0 %v78_v0  ;;  %446 = vmatprep.mubr.f32.mxu1 %v80_v1 }
  0x52   :  { %970 = vmatpush3.msra.mxu1 %v150_v63  ;;  %870 = vmatprep.subr.mxu0 %v165_v2 }
  0x53   :  { %332 = vmatmul.mubr.f32.gmra.mxu0 %v77_v3  ;;  %447 = vmatmul.mubr.f32.gmra.mxu1 %v79_v4 }
  0x54   :  { %955 = vmatprep.subr.mxu1 %v165_v2  ;;  %871 = vmatpush3.msra.mxu0 %v149_v5 }
  0x55   :  { %971 = vmatpush3.msra.mxu1 %v149_v5  ;;  %872 = vmatprep.subr.mxu0 %v164_v6 }
  0x56   :  { %956 = vmatprep.subr.mxu1 %v164_v6  ;;  %873 = vmatpush3.msra.mxu0 %v148_v7 }
  0x57   :  { %972 = vmatpush3.msra.mxu1 %v148_v7  ;;  %516 = vmatprep.mubr.f32.mxu0 %v19_v8 }
  0x58   :  { %556 = vmatprep.mubr.f32.mxu1 %v75_v9  ;;  %517 = vmatmul.mubr.f32.vlgmr.msra.gmra.mxu0 %v18_v10 }
  0x59   :  { %557 = vmatmul.mubr.f32.vlgmr.msra.gmra.mxu1 %v74_v11  ;;  %918 = vmatprep.subr.mxu1 %v183_v12 }
  0x5a   :  { %521 = vmatprep.mubr.f32.mxu0 %v26_v13  ;;  %919 = vmatpush3.msra.mxu1 %v183_v12 }
  0x5b   :  { %561 = vmatprep.mubr.f32.mxu1 %v82_v14  ;;  %920 = vmatprep.subr.mxu1 %v182_v15 }
  0x5c   :  { %921 = vmatpush3.msra.mxu1 %v182_v15  ;;  %522 = vmatmul.mubr.f32.gmra.mxu0 %v25_v16 }
  0x5d   :  { %562 = vmatmul.mubr.f32.gmra.mxu1 %v81_v17  ;;  %922 = vmatprep.subr.mxu1 %v181_v18 }
  0x5e   :  { %923 = vmatpush3.msra.mxu1 %v181_v18  ;;  %526 = vmatprep.mubr.f32.mxu0 %v33_v19 }
  0x5f   :  { %924 = vmatprep.subr.mxu1 %v180_v20  ;;  %926 = vmatprep.mubr.msk.f32.mxu1 %vm191_vm0, %v20_v21 }
  0x60   :  { %925 = vmatpush3.msra.mxu1 %v180_v20  ;;  %527 = vmatmul.mubr.f32.gmra.mxu0 %v32_v22  ;;  %v1552_v22 = vld [vmem:[%s1627_s2] ss:$0 sm:$0xff] }
  0x61   :  { %927 = vmatmul.mubr.msk.f32.vlgmr.msra.gmra.mxu1 %vm191_vm0, %v27_v23  ;;  %531 = vmatprep.mubr.f32.mxu0 %v40_v24 }
  0x62   :  { %929 = vmatprep.mubr.msk.f32.mxu1 %vm191_vm0, %v34_v25 }
  0x64   :  { %532 = vmatmul.mubr.f32.gmra.mxu0 %v39_v26 }
  0x65   :  { %930 = vmatmul.mubr.msk.f32.gmra.mxu1 %vm191_vm0, %v41_v27  ;;  %536 = vmatprep.mubr.f32.mxu0 %v47_v28 }
  0x66   :  { %932 = vmatprep.mubr.msk.f32.mxu1 %vm191_vm0, %v48_v29 }
  0x68   :  { %537 = vmatmul.mubr.f32.gmra.mxu0 %v46_v30 }
  0x69   :  { %933 = vmatmul.mubr.msk.f32.gmra.mxu1 %vm191_vm0, %v55_v31  ;;  %541 = vmatprep.mubr.f32.mxu0 %v54_v32 }
  0x6a   :  { %935 = vmatprep.mubr.msk.f32.mxu1 %vm191_vm0, %v62_v33 }
  0x6c   :  { %542 = vmatmul.mubr.f32.gmra.mxu0 %v53_v34 }
  0x6d   :  { %936 = vmatmul.mubr.msk.f32.gmra.mxu1 %vm191_vm0, %v69_v35  ;;  %546 = vmatprep.mubr.f32.mxu0 %v61_v36 }
  0x6e   :  { %938 = vmatprep.mubr.msk.f32.mxu1 %vm191_vm0, %v76_v37 }
  0x70   :  { %547 = vmatmul.mubr.f32.gmra.mxu0 %v60_v38 }
  0x71   :  { %939 = vmatmul.mubr.msk.f32.gmra.mxu1 %vm191_vm0, %v83_v39  ;;  %551 = vmatprep.mubr.f32.mxu0 %v68_v40 }
  0x74   :  { %552 = vmatmul.mubr.f32.gmra.mxu0 %v67_v41 }
  0xe4   :  { %v750_v42 = vpop.f32.mrf.mxu0 }
  0xe5   :  { %v812_v43 = vpop.f32.mrf.mxu1 }
  0xe6   :  { %v751_v44 = vpop.f32.mrf.mxu0 }
  0xe7   :  { %v813_v45 = vpop.f32.mrf.mxu1  ;;  %v752_v19 = vadd.f32 %v751_v44, %v750_v42 }
  0xe8   :  { %v753_v46 = vpop.f32.mrf.mxu0  ;;  %v814_v29 = vadd.f32 %v813_v45, %v812_v43 }
  0xe9   :  { %v815_v47 = vpop.f32.mrf.mxu1  ;;  %v289_v28 = vadd.f32 %v752_v19, %v1552_v22 }
  0xea   :  { %v754_v48 = vpop.f32.mrf.mxu0 }
  0xeb   :  { %v816_v49 = vpop.f32.mrf.mxu1  ;;  %v755_v18 = vadd.f32 %v754_v48, %v753_v46  ;;  %v404_v40 = vadd.f32 %v814_v29, %v289_v28 }
  0xec   :  { %v756_v50 = vpop.f32.mrf.mxu0  ;;  %v817_v27 = vadd.f32 %v816_v49, %v815_v47 }
  0xed   :  { %v818_v51 = vpop.f32.mrf.mxu1  ;;  %v294_v26 = vadd.f32 %v755_v18, %v1552_v22 }
  0xee   :  { %v757_v52 = vpop.f32.mrf.mxu0 }
  0xef   :  { %v819_v53 = vpop.f32.mrf.mxu1  ;;  %v758_v23 = vadd.f32 %v757_v52, %v756_v50  ;;  %v409_v36 = vadd.f32 %v817_v27, %v294_v26 }
  0xf0   :  { %v820_v33 = vadd.f32 %v819_v53, %v818_v51 }
  0xf1   :  { %v821_v55 = vpop.f32.mrf.mxu1  ;;  %v299_v32 = vadd.f32 %v758_v23, %v1552_v22 }
  0xf2   :  { %v759_v54 = vpop.f32.mrf.mxu0 }
  0xf3   :  { %v822_v57 = vpop.f32.mrf.mxu1  ;;  %v414_v47 = vadd.f32 %v820_v33, %v299_v32 }
  0xf4   :  { %v760_v56 = vpop.f32.mrf.mxu0  ;;  %v823_v45 = vadd.f32 %v822_v57, %v821_v55 }
  0xf5   :  { %v761_v37 = vadd.f32 %v760_v56, %v759_v54 }
  0xf7   :  { %v762_v58 = vpop.f32.mrf.mxu0  ;;  %v1513_v59 = vpop.f32.mrf.mxu1  ;;  %v304_v43 = vadd.f32 %v761_v37, %v1552_v22 }
  0xf9   :  { %v763_v60 = vpop.f32.mrf.mxu0  ;;  %v825_v61 = vpop.f32.mrf.mxu1  ;;  %v419_v26 = vadd.f32 %v823_v45, %v304_v43 }
  0xfa   :  { %v764_v42 = vadd.f32 %v763_v60, %v762_v58  ;;  %v826_v56 = vadd.f32 %v825_v61, %v1513_v59 }
  0xfc   :  { %v1517_v63 = vpop.f32.mrf.mxu1  ;;  %v309_v54 = vadd.f32 %v764_v42, %v1552_v22 }
  0xfd   :  { %v1515_v62 = vpop.f32.mrf.mxu0 }
  0xfe   :  { %v1521_v1 = vpop.f32.mrf.mxu1 }
  0xff   :  { %v1519_v0 = vpop.f32.mrf.mxu0  ;;  %v829_v33 = vadd.f32 %v1521_v1, %v1517_v63 }
 0x100   :  { %v767_v55 = vadd.f32 %v1519_v0, %v1515_v62 }
 0x102   :  { %v1523_v2 = vpop.f32.mrf.mxu0  ;;  %v1525_v3 = vpop.f32.mrf.mxu1 }
 0x104   :  { %v1527_v4 = vpop.f32.mrf.mxu0  ;;  %v1529_v5 = vpop.f32.mrf.mxu1 }
 0x105   :  { %v770_v62 = vadd.f32 %v1527_v4, %v1523_v2  ;;  %v832_v1 = vadd.f32 %v1529_v5, %v1525_v3 }
 0x107   :  { %v1531_v6 = vpop.f32.mrf.mxu0  ;;  %v319_v63 = vadd.f32 %v770_v62, %v1552_v22 }
 0x108   :  { %v1533_v7 = vpop.f32.mrf.mxu1 }
 0x109   :  { %v1535_v8 = vpop.f32.mrf.mxu0 }
 0x10a   :  { %v1537_v9 = vpop.f32.mrf.mxu1 }
 0x10d   :  { %v1539_v11 = vpop.f32.mrf.mxu1 }
 0x10e   :  { %v774_v10 = vpop.f32.mrf.mxu0 }
 0x10f   :  { %v1541_v13 = vpop.f32.mrf.mxu1 }
 0x110   :  { %v775_v12 = vpop.f32.mrf.mxu0  ;;  %v838_v2 = vadd.f32 %v1541_v13, %v1539_v11 }
 0x111   :  { %v776_v28 = vadd.f32 %v775_v12, %v774_v10  ;;  %v314_v12 = vadd.f32 %v767_v55, %v1552_v22 }
 0x113   :  { %v777_v14 = vpop.f32.mrf.mxu0  ;;  %v1543_v15 = vpop.f32.mrf.mxu1  ;;  %v329_v37 = vadd.f32 %v776_v28, %v1552_v22  ;;  %v429_v13 = vadd.f32 %v829_v33, %v314_v12 }
 0x115   :  { %v778_v16 = vpop.f32.mrf.mxu0  ;;  %v1545_v17 = vpop.f32.mrf.mxu1 }
 0x118   :  { %v874_v20 = vpop.f32.mrf.mxu0 }
 0x119   :  { %v1547_v21 = vpop.f32.mrf.mxu1 }
 0x11a   :  { %v875_v24 = vpop.f32.mrf.mxu0 }
 0x11b   :  { %v1554_v25 = vpop.f32.mrf.mxu1  ;;  %v876_v34 = vadd.f32 %v875_v24, %v874_v20  ;;  %v779_v20 = vadd.f32 %v778_v16, %v777_v14  ;;  %v424_v14 = vadd.f32 %v826_v56, %v309_v54 }
 0x11c   :  { %v877_v30 = vpop.f32.mrf.mxu0  ;;  %v900_v42 = vadd.f32 %v1554_v25, %v1547_v21  ;;  %v434_v21 = vadd.f32 %v832_v1, %v319_v63 }
 0x11d   :  { %v901_v31 = vpop.f32.mrf.mxu1  ;;  %v519_v49 = vadd.f32 %v876_v34, %v404_v40  ;;  %v334_v0 = vadd.f32 %v779_v20, %v1552_v22 }
 0x11e   :  { %v878_v35 = vpop.f32.mrf.mxu0 }
 0x11f   :  { %v879_v38 = vadd.f32 %v878_v35, %v877_v30  ;;  %v902_v39 = vpop.f32.mrf.mxu1  ;;  %v841_v30 = vadd.f32 %v1545_v17, %v1543_v15 }
 0x120   :  { %v880_v41 = vpop.f32.mrf.mxu0  ;;  %v903_v4 = vadd.f32 %v902_v39, %v901_v31  ;;  %v773_v31 = vadd.f32 %v1535_v8, %v1531_v6  ;;  %v835_v8 = vadd.f32 %v1537_v9, %v1533_v7 }
 0x121   :  { %v524_v44 = vadd.f32 %v879_v38, %v409_v36  ;;  %v928_v46 = vpop.f32.mrf.mxu1 }
 0x122   :  { %v881_v48 = vpop.f32.mrf.mxu0  ;;  %v324_v6 = vadd.f32 %v773_v31, %v1552_v22 }
 0x123   :  { %v639_v50 = vadd.f32 %v928_v46, %v524_v44  ;;  %v882_v52 = vadd.f32 %v881_v48, %v880_v41  ;;  %v633_v51 = vpop.f32.mrf.mxu1  ;;  %v449_v41 = vadd.f32 %v841_v30, %v334_v0 }
 0x124   :  { %v634_v53 = vadd.f32 %v633_v51, %v519_v49  ;;  %v883_v18 = vpop.f32.mrf.mxu0  ;;  %v439_v9 = vadd.f32 %v835_v8, %v324_v6 }
 0x125   :  { %v683_v19 = vmax.f32 %v639_v50, 0.0  ;;  %v931_v58 = vpop.f32.mrf.mxu1  ;;  %v529_v60 = vadd.f32 %v882_v52, %v414_v47  ;;  %v444_v47 = vadd.f32 %v838_v2, %v329_v37  ;;  %v564_v3 = vadd.f32 %v903_v4, %v449_v41 }
 0x126   :  { %v682_v23 = vmax.f32 %v634_v53, 0.0  ;;  %v884_v24 = vpop.f32.mrf.mxu0 }
 0x127   :  { %694 = vst.msk [vmem:[%s1628_s3 + $0x8] sm:$0xff] %vm692_vm1, %v683_v19  ;;  %v885_v57 = vadd.f32 %v884_v24, %v883_v18  ;;  %v643_v27 = vpop.f32.mrf.mxu1  ;;  %v559_v50 = vadd.f32 %v900_v42, %v444_v47 }
 0x128   :  { %693 = vst.msk [vmem:[%s1628_s3] sm:$0xff] %vm692_vm1, %v682_v23  ;;  %v644_v59 = vadd.f32 %v643_v27, %v529_v60  ;;  %v886_v61 = vpop.f32.mrf.mxu0 }
 0x129   :  { %v534_v16 = vadd.f32 %v885_v57, %v419_v26  ;;  %v934_v29 = vpop.f32.mrf.mxu1 }
 0x12a   :  { %v684_v32 = vmax.f32 %v644_v59, 0.0  ;;  %v887_v10 = vpop.f32.mrf.mxu0 }
 0x12b   :  { %v649_v34 = vadd.f32 %v931_v58, %v534_v16  ;;  %v888_v35 = vadd.f32 %v887_v10, %v886_v61  ;;  %v653_v36 = vpop.f32.mrf.mxu1 }
 0x12c   :  { %695 = vst.msk [vmem:[%s1628_s3 + $0x10] sm:$0xff] %vm692_vm1, %v684_v32  ;;  %v889_v15 = vpop.f32.mrf.mxu0 }
 0x12d   :  { %v685_v17 = vmax.f32 %v649_v34, 0.0  ;;  %v539_v38 = vadd.f32 %v888_v35, %v424_v14  ;;  %v937_v40 = vpop.f32.mrf.mxu1 }
 0x12e   :  { %v890_v11 = vpop.f32.mrf.mxu0 }
 0x12f   :  { %696 = vst.msk [vmem:[%s1628_s3 + $0x18] sm:$0xff] %vm692_vm1, %v685_v17  ;;  %v654_v39 = vadd.f32 %v653_v36, %v539_v38  ;;  %v891_v44 = vadd.f32 %v890_v11, %v889_v15  ;;  %v663_v46 = vpop.f32.mrf.mxu1 }
 0x130   :  { %v892_v48 = vpop.f32.mrf.mxu0 }
 0x131   :  { %v686_v5 = vmax.f32 %v654_v39, 0.0  ;;  %v544_v49 = vadd.f32 %v891_v44, %v429_v13  ;;  %v940_v43 = vpop.f32.mrf.mxu1 }
 0x132   :  { %v679_v25 = vadd.f32 %v940_v43, %v564_v3  ;;  %v893_v45 = vpop.f32.mrf.mxu0 }
 0x133   :  { %697 = vst.msk [vmem:[%s1628_s3 + $0x20] sm:$0xff] %vm692_vm1, %v686_v5  ;;  %v659_v52 = vadd.f32 %v934_v29, %v544_v49  ;;  %v894_v51 = vadd.f32 %v893_v45, %v892_v48  ;;  %v673_v53 = vpop.f32.mrf.mxu1 }
 0x134   :  { %v691_v18 = vmax.f32 %v679_v25, 0.0  ;;  %v674_v54 = vadd.f32 %v673_v53, %v559_v50  ;;  %v895_v56 = vpop.f32.mrf.mxu0 }
 0x135   :  { %v687_v19 = vmax.f32 %v659_v52, 0.0  ;;  %v549_v58 = vadd.f32 %v894_v51, %v434_v21 }
 0x136   :  { %702 = vst.msk [vmem:[%s1628_s3 + $0x48] sm:$0xff] %vm692_vm1, %v691_v18  ;;  %v690_v22 = vmax.f32 %v674_v54, 0.0  ;;  %v896_v7 = vpop.f32.mrf.mxu0 }
 0x137   :  { %698 = vst.msk [vmem:[%s1628_s3 + $0x28] sm:$0xff] %vm692_vm1, %v687_v19  ;;  %v664_v60 = vadd.f32 %v663_v46, %v549_v58  ;;  %v897_v20 = vadd.f32 %v896_v7, %v895_v56 }
 0x138   :  { %701 = vst.msk [vmem:[%s1628_s3 + $0x40] sm:$0xff] %vm692_vm1, %v690_v22 }
 0x139   :  { %v688_v23 = vmax.f32 %v664_v60, 0.0  ;;  %v554_v24 = vadd.f32 %v897_v20, %v439_v9 }
 0x13b   :  { %699 = vst.msk [vmem:[%s1628_s3 + $0x30] sm:$0xff] %vm692_vm1, %v688_v23  ;;  %v669_v26 = vadd.f32 %v937_v40, %v554_v24 }
 0x13d   :  { %v689_v55 = vmax.f32 %v669_v26, 0.0 }
 0x13f   :  { %700 = vst.msk [vmem:[%s1628_s3 + $0x38] sm:$0xff] %vm692_vm1, %v689_v55 }

// kernel: _lambda_.18
= control target key start
LH: loop header
LB: loop body
LE: loop exit
PB: predicated region body
PF: predicated region fallthrough
CT: control target
= control target key end

     0   :  { %vm221_vm0 = vcmask 523264   ;;  %s1700_s1 = inlined_call_operand.vmem [shape: f32[960,128], index: 1, kind: input, shape index: {}]   ;;  %s1701_s0 = inlined_call_operand.vmem [shape: f32[80,960], index: 0, kind: input, shape index: {}]   ;;  %s1702_s2 = inlined_call_operand.vmem [shape: f32[1,128], index: 2, kind: input, shape index: {}]   ;;  %s1703_s3 = inlined_call_operand.vmem [shape: f32[80,128], index: 3, kind: output, shape index: {}]  }
   0x1   :  { %v125_v0 = vld [vmem:[%s1700_s1 + $0xf8] sm:$0xff]  ;;  %v124_v4 = vld [vmem:[%s1700_s1 + $0xf0] sm:$0xff]  ;;  %v123_v8 = vld [vmem:[%s1700_s1 + $0xe8] sm:$0xff] }
   0x2   :  { %v157_v1 = vld [vmem:[%s1700_s1 + $0x1f8] sm:$0xff]  ;;  %747 = vmatprep.subr.mxu0 %v125_v0  ;;  %v156_v5 = vld [vmem:[%s1700_s1 + $0x1f0] sm:$0xff]  ;;  %v155_v9 = vld [vmem:[%s1700_s1 + $0x1e8] sm:$0xff] }
   0x3   :  { %v109_v2 = vld [vmem:[%s1700_s1 + $0x78] sm:$0xff]  ;;  %809 = vmatprep.subr.mxu1 %v157_v1  ;;  %v108_v6 = vld [vmem:[%s1700_s1 + $0x70] sm:$0xff]  ;;  %v107_v10 = vld [vmem:[%s1700_s1 + $0x68] sm:$0xff] }
   0x4   :  { %v141_v3 = vld [vmem:[%s1700_s1 + $0x178] sm:$0xff]  ;;  %748 = vmatpush3.msra.mxu0 %v109_v2  ;;  %v140_v7 = vld [vmem:[%s1700_s1 + $0x170] sm:$0xff]  ;;  %v139_v11 = vld [vmem:[%s1700_s1 + $0x168] sm:$0xff] }
   0x5   :  { %810 = vmatpush3.msra.mxu1 %v141_v3  ;;  %749 = vmatprep.subr.mxu0 %v124_v4  ;;  %v122_v12 = vld [vmem:[%s1700_s1 + $0xe0] sm:$0xff]  ;;  %v121_v16 = vld [vmem:[%s1700_s1 + $0xd8] sm:$0xff]  ;;  %v120_v20 = vld [vmem:[%s1700_s1 + $0xd0] sm:$0xff] }
   0x6   :  { %811 = vmatprep.subr.mxu1 %v156_v5  ;;  %750 = vmatpush3.msra.mxu0 %v108_v6  ;;  %v154_v13 = vld [vmem:[%s1700_s1 + $0x1e0] sm:$0xff]  ;;  %v153_v17 = vld [vmem:[%s1700_s1 + $0x1d8] sm:$0xff]  ;;  %v152_v21 = vld [vmem:[%s1700_s1 + $0x1d0] sm:$0xff] }
   0x7   :  { %812 = vmatpush3.msra.mxu1 %v140_v7  ;;  %751 = vmatprep.subr.mxu0 %v123_v8  ;;  %v106_v14 = vld [vmem:[%s1700_s1 + $0x60] sm:$0xff]  ;;  %v105_v18 = vld [vmem:[%s1700_s1 + $0x58] sm:$0xff]  ;;  %v104_v22 = vld [vmem:[%s1700_s1 + $0x50] sm:$0xff]  ;;  %v934_v8 = vmov 0.0  }
   0x8   :  { %813 = vmatprep.subr.mxu1 %v155_v9  ;;  %v138_v15 = vld [vmem:[%s1700_s1 + $0x160] sm:$0xff]  ;;  %752 = vmatpush3.msra.mxu0 %v107_v10  ;;  %v137_v19 = vld [vmem:[%s1700_s1 + $0x158] sm:$0xff]  ;;  %v136_v23 = vld [vmem:[%s1700_s1 + $0x150] sm:$0xff] }
   0x9   :  { %814 = vmatpush3.msra.mxu1 %v139_v11  ;;  %753 = vmatprep.subr.mxu0 %v122_v12  ;;  %v119_v24 = vld [vmem:[%s1700_s1 + $0xc8] sm:$0xff]  ;;  %v118_v28 = vld [vmem:[%s1700_s1 + $0xc0] sm:$0xff]  ;;  %v117_v32 = vld [vmem:[%s1700_s1 + $0xb8] sm:$0xff] }
   0xa   :  { %815 = vmatprep.subr.mxu1 %v154_v13  ;;  %754 = vmatpush3.msra.mxu0 %v106_v14  ;;  %v151_v25 = vld [vmem:[%s1700_s1 + $0x1c8] sm:$0xff]  ;;  %v150_v29 = vld [vmem:[%s1700_s1 + $0x1c0] sm:$0xff]  ;;  %v149_v33 = vld [vmem:[%s1700_s1 + $0x1b8] sm:$0xff] }
   0xb   :  { %816 = vmatpush3.msra.mxu1 %v138_v15  ;;  %755 = vmatprep.subr.mxu0 %v121_v16  ;;  %v103_v26 = vld [vmem:[%s1700_s1 + $0x48] sm:$0xff]  ;;  %v102_v30 = vld [vmem:[%s1700_s1 + $0x40] sm:$0xff]  ;;  %v101_v34 = vld [vmem:[%s1700_s1 + $0x38] sm:$0xff] }
   0xc   :  { %817 = vmatprep.subr.mxu1 %v153_v17  ;;  %756 = vmatpush3.msra.mxu0 %v105_v18  ;;  %v135_v27 = vld [vmem:[%s1700_s1 + $0x148] sm:$0xff]  ;;  %v134_v31 = vld [vmem:[%s1700_s1 + $0x140] sm:$0xff]  ;;  %v133_v35 = vld [vmem:[%s1700_s1 + $0x138] sm:$0xff] }
   0xd   :  { %818 = vmatpush3.msra.mxu1 %v137_v19  ;;  %757 = vmatprep.subr.mxu0 %v120_v20  ;;  %v116_v36 = vld [vmem:[%s1700_s1 + $0xb0] sm:$0xff]  ;;  %v115_v40 = vld [vmem:[%s1700_s1 + $0xa8] sm:$0xff]  ;;  %v114_v44 = vld [vmem:[%s1700_s1 + $0xa0] sm:$0xff] }
   0xe   :  { %819 = vmatprep.subr.mxu1 %v152_v21  ;;  %758 = vmatpush3.msra.mxu0 %v104_v22  ;;  %v148_v37 = vld [vmem:[%s1700_s1 + $0x1b0] sm:$0xff]  ;;  %v147_v41 = vld [vmem:[%s1700_s1 + $0x1a8] sm:$0xff]  ;;  %v146_v45 = vld [vmem:[%s1700_s1 + $0x1a0] sm:$0xff] }
   0xf   :  { %820 = vmatpush3.msra.mxu1 %v136_v23  ;;  %759 = vmatprep.subr.mxu0 %v119_v24  ;;  %v100_v38 = vld [vmem:[%s1700_s1 + $0x30] sm:$0xff]  ;;  %v99_v42 = vld [vmem:[%s1700_s1 + $0x28] sm:$0xff]  ;;  %v98_v46 = vld [vmem:[%s1700_s1 + $0x20] sm:$0xff] }
  0x10   :  { %821 = vmatprep.subr.mxu1 %v151_v25  ;;  %760 = vmatpush3.msra.mxu0 %v103_v26  ;;  %v132_v39 = vld [vmem:[%s1700_s1 + $0x130] sm:$0xff]  ;;  %v131_v43 = vld [vmem:[%s1700_s1 + $0x128] sm:$0xff]  ;;  %v130_v47 = vld [vmem:[%s1700_s1 + $0x120] sm:$0xff] }
  0x11   :  { %822 = vmatpush3.msra.mxu1 %v135_v27  ;;  %761 = vmatprep.subr.mxu0 %v118_v28  ;;  %v113_v48 = vld [vmem:[%s1700_s1 + $0x98] sm:$0xff]  ;;  %v112_v52 = vld [vmem:[%s1700_s1 + $0x90] sm:$0xff]  ;;  %v111_v56 = vld [vmem:[%s1700_s1 + $0x88] sm:$0xff] }
  0x12   :  { %823 = vmatprep.subr.mxu1 %v150_v29  ;;  %762 = vmatpush3.msra.mxu0 %v102_v30  ;;  %v145_v49 = vld [vmem:[%s1700_s1 + $0x198] sm:$0xff]  ;;  %v144_v53 = vld [vmem:[%s1700_s1 + $0x190] sm:$0xff]  ;;  %v143_v57 = vld [vmem:[%s1700_s1 + $0x188] sm:$0xff] }
  0x13   :  { %824 = vmatpush3.msra.mxu1 %v134_v31  ;;  %763 = vmatprep.subr.mxu0 %v117_v32  ;;  %v97_v50 = vld [vmem:[%s1700_s1 + $0x18] sm:$0xff]  ;;  %v96_v54 = vld [vmem:[%s1700_s1 + $0x10] sm:$0xff]  ;;  %v95_v58 = vld [vmem:[%s1700_s1 + $0x8] sm:$0xff] }
  0x14   :  { %825 = vmatprep.subr.mxu1 %v149_v33  ;;  %764 = vmatpush3.msra.mxu0 %v101_v34  ;;  %v129_v51 = vld [vmem:[%s1700_s1 + $0x118] sm:$0xff]  ;;  %v128_v55 = vld [vmem:[%s1700_s1 + $0x110] sm:$0xff]  ;;  %v127_v59 = vld [vmem:[%s1700_s1 + $0x108] sm:$0xff] }
  0x15   :  { %826 = vmatpush3.msra.mxu1 %v133_v35  ;;  %765 = vmatprep.subr.mxu0 %v116_v36  ;;  %v110_v60 = vld [vmem:[%s1700_s1 + $0x80] sm:$0xff]  ;;  %v15_v63 = vld [vmem:[%s1701_s0 + $0x8] sm:$0xff]  ;;  %v17_v1 = vld [vmem:[%s1701_s0 + $0x18] sm:$0xff] }
  0x16   :  { %827 = vmatprep.subr.mxu1 %v148_v37  ;;  %766 = vmatpush3.msra.mxu0 %v100_v38  ;;  %v142_v61 = vld [vmem:[%s1700_s1 + $0x180] sm:$0xff]  ;;  %v16_v3 = vld [vmem:[%s1701_s0 + $0x10] sm:$0xff]  ;;  %v189_v4 = vld [vmem:[%s1700_s1 + $0x2f8] sm:$0xff] }
  0x17   :  { %828 = vmatpush3.msra.mxu1 %v132_v39  ;;  %767 = vmatprep.subr.mxu0 %v115_v40  ;;  %v94_v62 = vld [vmem:[%s1700_s1] sm:$0xff]  ;;  %v205_v5 = vld [vmem:[%s1700_s1 + $0x378] sm:$0xff]  ;;  %v23_v7 = vld [vmem:[%s1701_s0 + $0x48] sm:$0xff] }
  0x18   :  { %829 = vmatprep.subr.mxu1 %v147_v41  ;;  %768 = vmatpush3.msra.mxu0 %v99_v42  ;;  %v126_v0 = vld [vmem:[%s1700_s1 + $0x100] sm:$0xff]  ;;  %v173_v6 = vld [vmem:[%s1700_s1 + $0x278] sm:$0xff]  ;;  %v204_v9 = vld [vmem:[%s1700_s1 + $0x370] sm:$0xff] }
  0x19   :  { %830 = vmatpush3.msra.mxu1 %v131_v43  ;;  %769 = vmatprep.subr.mxu0 %v114_v44  ;;  %v14_v2 = vld [vmem:[%s1701_s0] sm:$0xff]  ;;  %v188_v11 = vld [vmem:[%s1700_s1 + $0x2f0] sm:$0xff]  ;;  %v25_v12 = vld [vmem:[%s1701_s0 + $0x58] sm:$0xff] }
  0x1a   :  { %831 = vmatprep.subr.mxu1 %v146_v45  ;;  %770 = vmatpush3.msra.mxu0 %v98_v46  ;;  %v22_v10 = vld [vmem:[%s1701_s0 + $0x40] sm:$0xff]  ;;  %v172_v13 = vld [vmem:[%s1700_s1 + $0x270] sm:$0xff]  ;;  %v203_v14 = vld [vmem:[%s1700_s1 + $0x368] sm:$0xff] }
  0x1b   :  { %832 = vmatpush3.msra.mxu1 %v130_v47  ;;  %771 = vmatprep.subr.mxu0 %v113_v48  ;;  %v187_v15 = vld [vmem:[%s1700_s1 + $0x2e8] sm:$0xff]  ;;  %v24_v16 = vld [vmem:[%s1701_s0 + $0x50] sm:$0xff]  ;;  %v202_v19 = vld [vmem:[%s1700_s1 + $0x360] sm:$0xff] }
  0x1c   :  { %833 = vmatprep.subr.mxu1 %v145_v49  ;;  %772 = vmatpush3.msra.mxu0 %v97_v50  ;;  %v31_v17 = vld [vmem:[%s1701_s0 + $0x88] sm:$0xff]  ;;  %v30_v20 = vld [vmem:[%s1701_s0 + $0x80] sm:$0xff]  ;;  %v33_v21 = vld [vmem:[%s1701_s0 + $0x98] sm:$0xff] }
  0x1d   :  { %834 = vmatpush3.msra.mxu1 %v129_v51  ;;  %773 = vmatprep.subr.mxu0 %v112_v52  ;;  %v171_v18 = vld [vmem:[%s1700_s1 + $0x268] sm:$0xff]  ;;  %v186_v22 = vld [vmem:[%s1700_s1 + $0x2e0] sm:$0xff]  ;;  %v201_v23 = vld [vmem:[%s1700_s1 + $0x358] sm:$0xff] }
  0x1e   :  { %835 = vmatprep.subr.mxu1 %v144_v53  ;;  %774 = vmatpush3.msra.mxu0 %v96_v54  ;;  %v32_v24 = vld [vmem:[%s1701_s0 + $0x90] sm:$0xff]  ;;  %v170_v25 = vld [vmem:[%s1700_s1 + $0x260] sm:$0xff]  ;;  %v39_v26 = vld [vmem:[%s1701_s0 + $0xc8] sm:$0xff] }
  0x1f   :  { %836 = vmatpush3.msra.mxu1 %v128_v55  ;;  %775 = vmatprep.subr.mxu0 %v111_v56  ;;  %v185_v27 = vld [vmem:[%s1700_s1 + $0x2d8] sm:$0xff]  ;;  %v200_v28 = vld [vmem:[%s1700_s1 + $0x350] sm:$0xff]  ;;  %v38_v29 = vld [vmem:[%s1701_s0 + $0xc0] sm:$0xff] }
  0x20   :  { %837 = vmatprep.subr.mxu1 %v143_v57  ;;  %776 = vmatpush3.msra.mxu0 %v95_v58  ;;  %v169_v30 = vld [vmem:[%s1700_s1 + $0x258] sm:$0xff]  ;;  %v199_v32 = vld [vmem:[%s1700_s1 + $0x348] sm:$0xff]  ;;  %v184_v33 = vld [vmem:[%s1700_s1 + $0x2d0] sm:$0xff] }
  0x21   :  { %838 = vmatpush3.msra.mxu1 %v127_v59  ;;  %777 = vmatprep.subr.mxu0 %v110_v60  ;;  %v41_v31 = vld [vmem:[%s1701_s0 + $0xd8] sm:$0xff]  ;;  %v40_v34 = vld [vmem:[%s1701_s0 + $0xd0] sm:$0xff]  ;;  %v47_v35 = vld [vmem:[%s1701_s0 + $0x108] sm:$0xff] }
  0x22   :  { %839 = vmatprep.subr.mxu1 %v142_v61  ;;  %778 = vmatpush3.msra.mxu0 %v94_v62  ;;  %v168_v36 = vld [vmem:[%s1700_s1 + $0x250] sm:$0xff]  ;;  %v198_v37 = vld [vmem:[%s1700_s1 + $0x340] sm:$0xff]  ;;  %v183_v39 = vld [vmem:[%s1700_s1 + $0x2c8] sm:$0xff] }
  0x23   :  { %316 = vmatprep.mubr.f32.mxu0 %v15_v63  ;;  %840 = vmatpush3.msra.mxu1 %v126_v0  ;;  %v46_v38 = vld [vmem:[%s1701_s0 + $0x100] sm:$0xff]  ;;  %v49_v40 = vld [vmem:[%s1701_s0 + $0x118] sm:$0xff]  ;;  %v167_v41 = vld [vmem:[%s1700_s1 + $0x248] sm:$0xff] }
  0x24   :  { %431 = vmatprep.mubr.f32.mxu1 %v17_v1  ;;  %317 = vmatmul.mubr.f32.vlgmr.msra.gmra.mxu0 %v14_v2  ;;  %v197_v42 = vld [vmem:[%s1700_s1 + $0x338] sm:$0xff]  ;;  %v55_v43 = vld [vmem:[%s1701_s0 + $0x148] sm:$0xff]  ;;  %v48_v44 = vld [vmem:[%s1701_s0 + $0x110] sm:$0xff] }
  0x25   :  { %432 = vmatmul.mubr.f32.vlgmr.msra.gmra.mxu1 %v16_v3  ;;  %597 = vmatprep.subr.mxu1 %v934_v8  ;;  %v182_v45 = vld [vmem:[%s1700_s1 + $0x2c0] sm:$0xff]  ;;  %v196_v46 = vld [vmem:[%s1700_s1 + $0x330] sm:$0xff]  ;;  %v57_v49 = vld [vmem:[%s1701_s0 + $0x158] sm:$0xff] }
  0x26   :  { %871 = vmatprep.subr.mxu0 %v189_v4  ;;  %598 = vmatpush1.msra.mxu1 %v205_v5  ;;  %v54_v47 = vld [vmem:[%s1701_s0 + $0x140] sm:$0xff]  ;;  %v181_v50 = vld [vmem:[%s1700_s1 + $0x2b8] sm:$0xff]  ;;  %v195_v51 = vld [vmem:[%s1700_s1 + $0x328] sm:$0xff] }
  0x27   :  { %872 = vmatpush3.msra.mxu0 %v173_v6  ;;  %599 = vmatprep.subr.mxu1 %v934_v8  ;;  %v166_v48 = vld [vmem:[%s1700_s1 + $0x240] sm:$0xff]  ;;  %v56_v52 = vld [vmem:[%s1701_s0 + $0x150] sm:$0xff]  ;;  %v165_v53 = vld [vmem:[%s1700_s1 + $0x238] sm:$0xff] }
  0x28   :  { %321 = vmatprep.mubr.f32.mxu0 %v23_v7  ;;  %600 = vmatpush1.msra.mxu1 %v204_v9  ;;  %v63_v54 = vld [vmem:[%s1701_s0 + $0x188] sm:$0xff]  ;;  %v194_v55 = vld [vmem:[%s1700_s1 + $0x320] sm:$0xff]  ;;  %v180_v57 = vld [vmem:[%s1700_s1 + $0x2b0] sm:$0xff] }
  0x29   :  { %322 = vmatmul.mubr.f32.gmra.mxu0 %v22_v10  ;;  %873 = vmatprep.subr.mxu0 %v188_v11  ;;  %v62_v56 = vld [vmem:[%s1701_s0 + $0x180] sm:$0xff]  ;;  %v65_v58 = vld [vmem:[%s1701_s0 + $0x198] sm:$0xff]  ;;  %v164_v59 = vld [vmem:[%s1700_s1 + $0x230] sm:$0xff] }
  0x2a   :  { %601 = vmatprep.subr.mxu1 %v934_v8  ;;  %436 = vmatprep.mubr.f32.mxu1 %v25_v12  ;;  %v193_v60 = vld [vmem:[%s1700_s1 + $0x318] sm:$0xff]  ;;  %v179_v61 = vld [vmem:[%s1700_s1 + $0x2a8] sm:$0xff]  ;;  %v64_v62 = vld [vmem:[%s1701_s0 + $0x190] sm:$0xff] }
  0x2b   :  { %874 = vmatpush3.msra.mxu0 %v172_v13  ;;  %602 = vmatpush1.msra.mxu1 %v203_v14  ;;  %v71_v63 = vld [vmem:[%s1701_s0 + $0x1c8] sm:$0xff]  ;;  %v192_v1 = vld [vmem:[%s1700_s1 + $0x310] sm:$0xff]  ;;  %v70_v2 = vld [vmem:[%s1701_s0 + $0x1c0] sm:$0xff] }
  0x2c   :  { %875 = vmatprep.subr.mxu0 %v187_v15  ;;  %437 = vmatmul.mubr.f32.gmra.mxu1 %v24_v16  ;;  %v163_v0 = vld [vmem:[%s1700_s1 + $0x228] sm:$0xff]  ;;  %v73_v3 = vld [vmem:[%s1701_s0 + $0x1d8] sm:$0xff]  ;;  %v178_v4 = vld [vmem:[%s1700_s1 + $0x2a0] sm:$0xff] }
  0x2d   :  { %603 = vmatprep.subr.mxu1 %v934_v8  ;;  %326 = vmatprep.mubr.f32.mxu0 %v31_v17  ;;  %v191_v5 = vld [vmem:[%s1700_s1 + $0x308] sm:$0xff]  ;;  %v72_v6 = vld [vmem:[%s1701_s0 + $0x1d0] sm:$0xff]  ;;  %v162_v7 = vld [vmem:[%s1700_s1 + $0x220] sm:$0xff] }
  0x2e   :  { %876 = vmatpush3.msra.mxu0 %v171_v18  ;;  %604 = vmatpush1.msra.mxu1 %v202_v19  ;;  %v79_v9 = vld [vmem:[%s1701_s0 + $0x208] sm:$0xff]  ;;  %v177_v10 = vld [vmem:[%s1700_s1 + $0x298] sm:$0xff]  ;;  %v190_v11 = vld [vmem:[%s1700_s1 + $0x300] sm:$0xff] }
  0x2f   :  { %327 = vmatmul.mubr.f32.gmra.mxu0 %v30_v20  ;;  %605 = vmatprep.subr.mxu1 %v934_v8  ;;  %v78_v12 = vld [vmem:[%s1701_s0 + $0x200] sm:$0xff]  ;;  %v161_v13 = vld [vmem:[%s1700_s1 + $0x218] sm:$0xff]  ;;  %v176_v16 = vld [vmem:[%s1700_s1 + $0x290] sm:$0xff] }
  0x30   :  { %441 = vmatprep.mubr.f32.mxu1 %v33_v21  ;;  %877 = vmatprep.subr.mxu0 %v186_v22  ;;  %v81_v14 = vld [vmem:[%s1701_s0 + $0x218] sm:$0xff]  ;;  %v80_v17 = vld [vmem:[%s1701_s0 + $0x210] sm:$0xff]  ;;  %v87_v18 = vld [vmem:[%s1701_s0 + $0x248] sm:$0xff] }
  0x31   :  { %606 = vmatpush1.msra.mxu1 %v201_v23  ;;  %878 = vmatpush3.msra.mxu0 %v170_v25  ;;  %v213_v15 = vld [vmem:[%s1700_s1 + $0x3b8] sm:$0xff]  ;;  %v160_v19 = vld [vmem:[%s1700_s1 + $0x210] sm:$0xff]  ;;  %v86_v21 = vld [vmem:[%s1701_s0 + $0x240] sm:$0xff] }
  0x32   :  { %442 = vmatmul.mubr.f32.gmra.mxu1 %v32_v24  ;;  %607 = vmatprep.subr.mxu1 %v934_v8  ;;  %v212_v20 = vld [vmem:[%s1700_s1 + $0x3b0] sm:$0xff]  ;;  %v175_v22 = vld [vmem:[%s1700_s1 + $0x288] sm:$0xff]  ;;  %v89_v23 = vld [vmem:[%s1701_s0 + $0x258] sm:$0xff] }
  0x33   :  { %331 = vmatprep.mubr.f32.mxu0 %v39_v26  ;;  %879 = vmatprep.subr.mxu0 %v185_v27  ;;  %v159_v24 = vld [vmem:[%s1700_s1 + $0x208] sm:$0xff]  ;;  %v174_v26 = vld [vmem:[%s1700_s1 + $0x280] sm:$0xff]  ;;  %v88_v27 = vld [vmem:[%s1701_s0 + $0x250] sm:$0xff] }
  0x34   :  { %608 = vmatpush1.msra.mxu1 %v200_v28  ;;  %332 = vmatmul.mubr.f32.gmra.mxu0 %v38_v29  ;;  %v211_v25 = vld [vmem:[%s1700_s1 + $0x3a8] sm:$0xff]  ;;  %v158_v28 = vld [vmem:[%s1700_s1 + $0x200] sm:$0xff] }
  0x35   :  { %609 = vmatprep.subr.mxu1 %v934_v8  ;;  %880 = vmatpush3.msra.mxu0 %v169_v30  ;;  %v19_v29 = vld [vmem:[%s1701_s0 + $0x28] sm:$0xff]  ;;  %v210_v30 = vld [vmem:[%s1700_s1 + $0x3a0] sm:$0xff] }
  0x36   :  { %446 = vmatprep.mubr.f32.mxu1 %v41_v31  ;;  %610 = vmatpush1.msra.mxu1 %v199_v32  ;;  %v18_v31 = vld [vmem:[%s1701_s0 + $0x20] sm:$0xff]  ;;  %v27_v32 = vld [vmem:[%s1701_s0 + $0x68] sm:$0xff] }
  0x37   :  { %881 = vmatprep.subr.mxu0 %v184_v33  ;;  %447 = vmatmul.mubr.f32.gmra.mxu1 %v40_v34  ;;  %v209_v33 = vld [vmem:[%s1700_s1 + $0x398] sm:$0xff] }
  0x38   :  { %611 = vmatprep.subr.mxu1 %v934_v8  ;;  %336 = vmatprep.mubr.f32.mxu0 %v47_v35  ;;  %v21_v34 = vld [vmem:[%s1701_s0 + $0x38] sm:$0xff]  ;;  %v208_v35 = vld [vmem:[%s1700_s1 + $0x390] sm:$0xff] }
  0x39   :  { %882 = vmatpush3.msra.mxu0 %v168_v36  ;;  %612 = vmatpush1.msra.mxu1 %v198_v37  ;;  %v26_v36 = vld [vmem:[%s1701_s0 + $0x60] sm:$0xff]  ;;  %v35_v37 = vld [vmem:[%s1701_s0 + $0xa8] sm:$0xff] }
  0x3a   :  { %337 = vmatmul.mubr.f32.gmra.mxu0 %v46_v38  ;;  %883 = vmatprep.subr.mxu0 %v183_v39  ;;  %v207_v38 = vld [vmem:[%s1700_s1 + $0x388] sm:$0xff]  ;;  %v206_v39 = vld [vmem:[%s1700_s1 + $0x380] sm:$0xff] }
  0x3b   :  { %613 = vmatprep.subr.mxu1 %v934_v8  ;;  %451 = vmatprep.mubr.f32.mxu1 %v49_v40  ;;  %v34_v40 = vld [vmem:[%s1701_s0 + $0xa0] sm:$0xff] }
  0x3c   :  { %884 = vmatpush3.msra.mxu0 %v167_v41  ;;  %614 = vmatpush1.msra.mxu1 %v197_v42  ;;  %v20_v41 = vld [vmem:[%s1701_s0 + $0x30] sm:$0xff]  ;;  %v43_v42 = vld [vmem:[%s1701_s0 + $0xe8] sm:$0xff] }
  0x3d   :  { %341 = vmatprep.mubr.f32.mxu0 %v55_v43  ;;  %452 = vmatmul.mubr.f32.gmra.mxu1 %v48_v44  ;;  %v29_v43 = vld [vmem:[%s1701_s0 + $0x78] sm:$0xff]  ;;  %v42_v44 = vld [vmem:[%s1701_s0 + $0xe0] sm:$0xff] }
  0x3e   :  { %615 = vmatprep.subr.mxu1 %v934_v8  ;;  %885 = vmatprep.subr.mxu0 %v182_v45  ;;  %v28_v45 = vld [vmem:[%s1701_s0 + $0x70] sm:$0xff] }
  0x3f   :  { %616 = vmatpush1.msra.mxu1 %v196_v46  ;;  %342 = vmatmul.mubr.f32.gmra.mxu0 %v54_v47  ;;  %v37_v46 = vld [vmem:[%s1701_s0 + $0xb8] sm:$0xff]  ;;  %v50_v47 = vld [vmem:[%s1701_s0 + $0x120] sm:$0xff] }
  0x40   :  { %617 = vmatprep.subr.mxu1 %v934_v8  ;;  %886 = vmatpush3.msra.mxu0 %v166_v48  ;;  %v36_v48 = vld [vmem:[%s1701_s0 + $0xb0] sm:$0xff] }
  0x41   :  { %456 = vmatprep.mubr.f32.mxu1 %v57_v49  ;;  %887 = vmatprep.subr.mxu0 %v181_v50  ;;  %v59_v49 = vld [vmem:[%s1701_s0 + $0x168] sm:$0xff]  ;;  %v45_v50 = vld [vmem:[%s1701_s0 + $0xf8] sm:$0xff] }
  0x42   :  { %618 = vmatpush1.msra.mxu1 %v195_v51  ;;  %888 = vmatpush3.msra.mxu0 %v165_v53  ;;  %v58_v51 = vld [vmem:[%s1701_s0 + $0x160] sm:$0xff]  ;;  %v67_v53 = vld [vmem:[%s1701_s0 + $0x1a8] sm:$0xff] }
  0x43   :  { %457 = vmatmul.mubr.f32.gmra.mxu1 %v56_v52  ;;  %619 = vmatprep.subr.mxu1 %v934_v8  ;;  %v44_v52 = vld [vmem:[%s1701_s0 + $0xf0] sm:$0xff] }
  0x44   :  { %346 = vmatprep.mubr.f32.mxu0 %v63_v54  ;;  %620 = vmatpush1.msra.mxu1 %v194_v55  ;;  %v53_v54 = vld [vmem:[%s1701_s0 + $0x138] sm:$0xff]  ;;  %v66_v55 = vld [vmem:[%s1701_s0 + $0x1a0] sm:$0xff] }
  0x45   :  { %347 = vmatmul.mubr.f32.gmra.mxu0 %v62_v56  ;;  %889 = vmatprep.subr.mxu0 %v180_v57  ;;  %v52_v56 = vld [vmem:[%s1701_s0 + $0x130] sm:$0xff]  ;;  %v75_v57 = vld [vmem:[%s1701_s0 + $0x1e8] sm:$0xff] }
  0x46   :  { %621 = vmatprep.subr.mxu1 %v934_v8  ;;  %461 = vmatprep.mubr.f32.mxu1 %v65_v58  ;;  %v61_v58 = vld [vmem:[%s1701_s0 + $0x178] sm:$0xff] }
  0x47   :  { %890 = vmatpush3.msra.mxu0 %v164_v59  ;;  %622 = vmatpush1.msra.mxu1 %v193_v60  ;;  %v74_v59 = vld [vmem:[%s1701_s0 + $0x1e0] sm:$0xff]  ;;  %v60_v60 = vld [vmem:[%s1701_s0 + $0x170] sm:$0xff] }
  0x48   :  { %891 = vmatprep.subr.mxu0 %v179_v61  ;;  %462 = vmatmul.mubr.f32.gmra.mxu1 %v64_v62  ;;  %v83_v61 = vld [vmem:[%s1701_s0 + $0x228] sm:$0xff]  ;;  %v69_v62 = vld [vmem:[%s1701_s0 + $0x1b8] sm:$0xff] }
  0x49   :  { %623 = vmatprep.subr.mxu1 %v934_v8  ;;  %351 = vmatprep.mubr.f32.mxu0 %v71_v63  ;;  %v82_v63 = vld [vmem:[%s1701_s0 + $0x220] sm:$0xff] }
  0x4a   :  { %892 = vmatpush3.msra.mxu0 %v163_v0  ;;  %624 = vmatpush1.msra.mxu1 %v192_v1  ;;  %v68_v0 = vld [vmem:[%s1701_s0 + $0x1b0] sm:$0xff]  ;;  %v91_v1 = vld [vmem:[%s1701_s0 + $0x268] sm:$0xff] }
  0x4b   :  { %352 = vmatmul.mubr.f32.gmra.mxu0 %v70_v2  ;;  %625 = vmatprep.subr.mxu1 %v934_v8  ;;  %v77_v2 = vld [vmem:[%s1701_s0 + $0x1f8] sm:$0xff] }
  0x4c   :  { %466 = vmatprep.mubr.f32.mxu1 %v73_v3  ;;  %893 = vmatprep.subr.mxu0 %v178_v4  ;;  %v90_v3 = vld [vmem:[%s1701_s0 + $0x260] sm:$0xff]  ;;  %v76_v4 = vld [vmem:[%s1701_s0 + $0x1f0] sm:$0xff] }
  0x4d   :  { %626 = vmatpush1.msra.mxu1 %v191_v5  ;;  %894 = vmatpush3.msra.mxu0 %v162_v7  ;;  %v85_v5 = vld [vmem:[%s1701_s0 + $0x238] sm:$0xff] }
  0x4e   :  { %467 = vmatmul.mubr.f32.gmra.mxu1 %v72_v6  ;;  %627 = vmatprep.subr.mxu1 %v934_v8  ;;  %v84_v6 = vld [vmem:[%s1701_s0 + $0x230] sm:$0xff]  ;;  %v93_v7 = vld [vmem:[%s1701_s0 + $0x278] sm:$0xff] }
  0x4f   :  { %356 = vmatprep.mubr.f32.mxu0 %v79_v9  ;;  %895 = vmatprep.subr.mxu0 %v177_v10  ;;  %v92_v9 = vld [vmem:[%s1701_s0 + $0x270] sm:$0xff] }
  0x50   :  { %628 = vmatpush1.msra.mxu1 %v190_v11  ;;  %357 = vmatmul.mubr.f32.gmra.mxu0 %v78_v12 }
  0x51   :  { %645 = vmatprep.subr.mxu1 %v934_v8  ;;  %896 = vmatpush3.msra.mxu0 %v161_v13 }
  0x52   :  { %471 = vmatprep.mubr.f32.mxu1 %v81_v14  ;;  %646 = vmatpush2.msra.mxu1 %v213_v15 }
  0x53   :  { %897 = vmatprep.subr.mxu0 %v176_v16  ;;  %472 = vmatmul.mubr.f32.gmra.mxu1 %v80_v17 }
  0x54   :  { %647 = vmatprep.subr.mxu1 %v934_v8  ;;  %361 = vmatprep.mubr.f32.mxu0 %v87_v18 }
  0x55   :  { %898 = vmatpush3.msra.mxu0 %v160_v19  ;;  %648 = vmatpush2.msra.mxu1 %v212_v20 }
  0x56   :  { %362 = vmatmul.mubr.f32.gmra.mxu0 %v86_v21  ;;  %899 = vmatprep.subr.mxu0 %v175_v22 }
  0x57   :  { %649 = vmatprep.subr.mxu1 %v934_v8  ;;  %476 = vmatprep.mubr.f32.mxu1 %v89_v23 }
  0x58   :  { %900 = vmatpush3.msra.mxu0 %v159_v24  ;;  %650 = vmatpush2.msra.mxu1 %v211_v25 }
  0x59   :  { %901 = vmatprep.subr.mxu0 %v174_v26  ;;  %477 = vmatmul.mubr.f32.gmra.mxu1 %v88_v27 }
  0x5a   :  { %651 = vmatprep.subr.mxu1 %v934_v8  ;;  %902 = vmatpush3.msra.mxu0 %v158_v28 }
  0x5b   :  { %546 = vmatprep.mubr.f32.mxu0 %v19_v29  ;;  %652 = vmatpush2.msra.mxu1 %v210_v30 }
  0x5c   :  { %547 = vmatmul.mubr.f32.vlgmr.msra.gmra.mxu0 %v18_v31  ;;  %653 = vmatprep.subr.mxu1 %v934_v8 }
  0x5d   :  { %551 = vmatprep.mubr.f32.mxu0 %v27_v32  ;;  %654 = vmatpush2.msra.mxu1 %v209_v33 }
  0x5e   :  { %737 = vmatprep.mubr.msk.f32.mxu1 %vm221_vm0, %v21_v34  ;;  %655 = vmatprep.subr.mxu1 %v934_v8 }
  0x5f   :  { %656 = vmatpush2.msra.mxu1 %v208_v35 }
  0x60   :  { %552 = vmatmul.mubr.f32.gmra.mxu0 %v26_v36  ;;  %657 = vmatprep.subr.mxu1 %v934_v8 }
  0x61   :  { %556 = vmatprep.mubr.f32.mxu0 %v35_v37  ;;  %658 = vmatpush2.msra.mxu1 %v207_v38 }
  0x62   :  { %659 = vmatprep.subr.mxu1 %v934_v8  ;;  %v51_v8 = vld [vmem:[%s1701_s0 + $0x128] sm:$0xff] }
  0x63   :  { %660 = vmatpush2.msra.mxu1 %v206_v39 }
  0x64   :  { %557 = vmatmul.mubr.f32.gmra.mxu0 %v34_v40  ;;  %662 = vmatmul.mubr.f32.vlgmr.msra.gmra.mxu1 %v20_v41 }
  0x65   :  { %561 = vmatprep.mubr.f32.mxu0 %v43_v42  ;;  %738 = vmatprep.mubr.msk.f32.mxu1 %vm221_vm0, %v29_v43 }
  0x68   :  { %562 = vmatmul.mubr.f32.gmra.mxu0 %v42_v44  ;;  %667 = vmatmul.mubr.f32.gmra.mxu1 %v28_v45 }
  0x69   :  { %566 = vmatprep.mubr.f32.mxu0 %v51_v8  ;;  %739 = vmatprep.mubr.msk.f32.mxu1 %vm221_vm0, %v37_v46 }
  0x6c   :  { %567 = vmatmul.mubr.f32.gmra.mxu0 %v50_v47  ;;  %672 = vmatmul.mubr.f32.gmra.mxu1 %v36_v48  ;;  %v1630_v47 = vld [vmem:[%s1702_s2] ss:$0 sm:$0xff] }
  0x6d   :  { %571 = vmatprep.mubr.f32.mxu0 %v59_v49  ;;  %740 = vmatprep.mubr.msk.f32.mxu1 %vm221_vm0, %v45_v50 }
  0x70   :  { %572 = vmatmul.mubr.f32.gmra.mxu0 %v58_v51  ;;  %677 = vmatmul.mubr.f32.gmra.mxu1 %v44_v52 }
  0x71   :  { %576 = vmatprep.mubr.f32.mxu0 %v67_v53  ;;  %741 = vmatprep.mubr.msk.f32.mxu1 %vm221_vm0, %v53_v54 }
  0x74   :  { %577 = vmatmul.mubr.f32.gmra.mxu0 %v66_v55  ;;  %682 = vmatmul.mubr.f32.gmra.mxu1 %v52_v56 }
  0x75   :  { %581 = vmatprep.mubr.f32.mxu0 %v75_v57  ;;  %742 = vmatprep.mubr.msk.f32.mxu1 %vm221_vm0, %v61_v58 }
  0x78   :  { %582 = vmatmul.mubr.f32.gmra.mxu0 %v74_v59  ;;  %687 = vmatmul.mubr.f32.gmra.mxu1 %v60_v60 }
  0x79   :  { %586 = vmatprep.mubr.f32.mxu0 %v83_v61  ;;  %743 = vmatprep.mubr.msk.f32.mxu1 %vm221_vm0, %v69_v62 }
  0x7c   :  { %587 = vmatmul.mubr.f32.gmra.mxu0 %v82_v63  ;;  %692 = vmatmul.mubr.f32.gmra.mxu1 %v68_v0 }
  0x7d   :  { %591 = vmatprep.mubr.f32.mxu0 %v91_v1  ;;  %744 = vmatprep.mubr.msk.f32.mxu1 %vm221_vm0, %v77_v2 }
  0x80   :  { %592 = vmatmul.mubr.f32.gmra.mxu0 %v90_v3  ;;  %697 = vmatmul.mubr.f32.gmra.mxu1 %v76_v4 }
  0x81   :  { %745 = vmatprep.mubr.msk.f32.mxu1 %vm221_vm0, %v85_v5 }
  0x84   :  { %702 = vmatmul.mubr.f32.gmra.mxu1 %v84_v6 }
  0x85   :  { %746 = vmatprep.mubr.msk.f32.mxu1 %vm221_vm0, %v93_v7 }
  0x88   :  { %707 = vmatmul.mubr.f32.gmra.mxu1 %v92_v9 }
  0xe4   :  { %v779_v10 = vpop.f32.mrf.mxu0 }
  0xe5   :  { %v841_v11 = vpop.f32.mrf.mxu1 }
  0xe6   :  { %v780_v12 = vpop.f32.mrf.mxu0 }
  0xe7   :  { %v842_v14 = vpop.f32.mrf.mxu1  ;;  %v781_v46 = vadd.f32 %v780_v12, %v779_v10 }
  0xe8   :  { %v843_v54 = vadd.f32 %v842_v14, %v841_v11 }
  0xe9   :  { %v782_v13 = vpop.f32.mrf.mxu0  ;;  %v319_v51 = vadd.f32 %v781_v46, %v1630_v47 }
  0xeb   :  { %v783_v15 = vpop.f32.mrf.mxu0  ;;  %v434_v59 = vadd.f32 %v843_v54, %v319_v51 }
  0xec   :  { %v844_v16 = vpop.f32.mrf.mxu1  ;;  %v784_v50 = vadd.f32 %v783_v15, %v782_v13 }
  0xee   :  { %v845_v18 = vpop.f32.mrf.mxu1  ;;  %v324_v57 = vadd.f32 %v784_v50, %v1630_v47 }
  0xef   :  { %v785_v17 = vpop.f32.mrf.mxu0  ;;  %v846_v58 = vadd.f32 %v845_v18, %v844_v16 }
  0xf1   :  { %v786_v19 = vpop.f32.mrf.mxu0  ;;  %v439_v2 = vadd.f32 %v846_v58, %v324_v57 }
  0xf2   :  { %v847_v20 = vpop.f32.mrf.mxu1  ;;  %v787_v60 = vadd.f32 %v786_v19, %v785_v17 }
  0xf4   :  { %v848_v21 = vpop.f32.mrf.mxu1  ;;  %v788_v22 = vpop.f32.mrf.mxu0  ;;  %v329_v4 = vadd.f32 %v787_v60, %v1630_v47 }
  0xf5   :  { %v849_v5 = vadd.f32 %v848_v21, %v847_v20 }
  0xf6   :  { %v789_v23 = vpop.f32.mrf.mxu0 }
  0xf7   :  { %v850_v24 = vpop.f32.mrf.mxu1  ;;  %v790_v6 = vadd.f32 %v789_v23, %v788_v22  ;;  %v444_v17 = vadd.f32 %v849_v5, %v329_v4 }
  0xf9   :  { %v851_v26 = vpop.f32.mrf.mxu1  ;;  %v334_v18 = vadd.f32 %v790_v6, %v1630_v47 }
  0xfa   :  { %v791_v25 = vpop.f32.mrf.mxu0  ;;  %v852_v19 = vadd.f32 %v851_v26, %v850_v24 }
  0xfc   :  { %v792_v27 = vpop.f32.mrf.mxu0 }
  0xfd   :  { %v1589_v28 = vpop.f32.mrf.mxu1  ;;  %v793_v15 = vadd.f32 %v792_v27, %v791_v25 }
  0xff   :  { %v1591_v29 = vpop.f32.mrf.mxu0  ;;  %v1593_v30 = vpop.f32.mrf.mxu1  ;;  %v339_v51 = vadd.f32 %v793_v15, %v1630_v47 }
 0x100   :  { %v855_v25 = vadd.f32 %v1593_v30, %v1589_v28 }
 0x101   :  { %v1595_v31 = vpop.f32.mrf.mxu0 }
 0x102   :  { %v796_v24 = vadd.f32 %v1595_v31, %v1591_v29  ;;  %v454_v60 = vadd.f32 %v855_v25, %v339_v51 }
 0x103   :  { %v1597_v32 = vpop.f32.mrf.mxu1 }
 0x104   :  { %v344_v28 = vadd.f32 %v796_v24, %v1630_v47 }
 0x105   :  { %v1599_v33 = vpop.f32.mrf.mxu0  ;;  %v1601_v34 = vpop.f32.mrf.mxu1 }
 0x106   :  { %v858_v30 = vadd.f32 %v1601_v34, %v1597_v32 }
 0x107   :  { %v1603_v35 = vpop.f32.mrf.mxu0 }
 0x108   :  { %v1605_v36 = vpop.f32.mrf.mxu1  ;;  %v799_v29 = vadd.f32 %v1603_v35, %v1599_v33 }
 0x10a   :  { %v1609_v38 = vpop.f32.mrf.mxu1  ;;  %v349_v32 = vadd.f32 %v799_v29, %v1630_v47 }
 0x10b   :  { %v1607_v37 = vpop.f32.mrf.mxu0  ;;  %v861_v33 = vadd.f32 %v1609_v38, %v1605_v36 }
 0x10d   :  { %v1611_v39 = vpop.f32.mrf.mxu0  ;;  %v464_v15 = vadd.f32 %v861_v33, %v349_v32 }
 0x10e   :  { %v1613_v40 = vpop.f32.mrf.mxu1  ;;  %v802_v5 = vadd.f32 %v1611_v39, %v1607_v37 }
 0x110   :  { %v1615_v41 = vpop.f32.mrf.mxu0  ;;  %v1617_v42 = vpop.f32.mrf.mxu1  ;;  %v354_v37 = vadd.f32 %v802_v5, %v1630_v47 }
 0x111   :  { %v864_v39 = vadd.f32 %v1617_v42, %v1613_v40 }
 0x112   :  { %v1619_v43 = vpop.f32.mrf.mxu0 }
 0x113   :  { %v1623_v45 = vpop.f32.mrf.mxu1  ;;  %v805_v36 = vadd.f32 %v1619_v43, %v1615_v41 }
 0x115   :  { %v1632_v48 = vpop.f32.mrf.mxu1  ;;  %v359_v40 = vadd.f32 %v805_v36, %v1630_v47 }
 0x116   :  { %v1621_v44 = vpop.f32.mrf.mxu0  ;;  %v867_v42 = vadd.f32 %v1632_v48, %v1623_v45 }
 0x118   :  { %v1625_v8 = vpop.f32.mrf.mxu0  ;;  %v474_v24 = vadd.f32 %v867_v42, %v359_v40 }
 0x119   :  { %v1635_v53 = vpop.f32.mrf.mxu1  ;;  %v808_v41 = vadd.f32 %v1625_v8, %v1621_v44 }
 0x11b   :  { %v1638_v62 = vpop.f32.mrf.mxu1 }
 0x11c   :  { %v903_v49 = vpop.f32.mrf.mxu0  ;;  %v870_v45 = vadd.f32 %v1638_v62, %v1635_v53 }
 0x11e   :  { %v904_v52 = vpop.f32.mrf.mxu0 }
 0x11f   :  { %v905_v55 = vadd.f32 %v904_v52, %v903_v49  ;;  %v449_v52 = vadd.f32 %v852_v19, %v334_v18 }
 0x120   :  { %v906_v56 = vpop.f32.mrf.mxu0 }
 0x121   :  { %v549_v1 = vadd.f32 %v905_v55, %v434_v59 }
 0x122   :  { %v907_v61 = vpop.f32.mrf.mxu0 }
 0x123   :  { %v908_v63 = vadd.f32 %v907_v61, %v906_v56 }
 0x124   :  { %v909_v0 = vpop.f32.mrf.mxu0  ;;  %v663_v3 = vpop.f32.mrf.mxu1 }
 0x125   :  { %v664_v7 = vadd.f32 %v663_v3, %v549_v1  ;;  %v554_v14 = vadd.f32 %v908_v63, %v439_v2 }
 0x126   :  { %v910_v9 = vpop.f32.mrf.mxu0  ;;  %v665_v10 = vpop.f32.mrf.mxu1 }
 0x127   :  { %v712_v11 = vmax.f32 %v664_v7, 0.0  ;;  %v911_v12 = vadd.f32 %v910_v9, %v909_v0  ;;  %v459_v7 = vadd.f32 %v858_v30, %v344_v28 }
 0x128   :  { %v912_v13 = vpop.f32.mrf.mxu0  ;;  %v668_v16 = vpop.f32.mrf.mxu1 }
 0x129   :  { %722 = vst [vmem:[%s1703_s3] sm:$0xff] %v712_v11  ;;  %v669_v46 = vadd.f32 %v668_v16, %v554_v14  ;;  %v559_v50 = vadd.f32 %v911_v12, %v444_v17 }
 0x12a   :  { %v913_v20 = vpop.f32.mrf.mxu0  ;;  %v670_v21 = vpop.f32.mrf.mxu1 }
 0x12b   :  { %v713_v22 = vmax.f32 %v669_v46, 0.0  ;;  %v914_v23 = vadd.f32 %v913_v20, %v912_v13  ;;  %v469_v21 = vadd.f32 %v864_v39, %v354_v37 }
 0x12c   :  { %v915_v49 = vpop.f32.mrf.mxu0  ;;  %v673_v27 = vpop.f32.mrf.mxu1 }
 0x12d   :  { %723 = vst [vmem:[%s1703_s3 + $0x8] sm:$0xff] %v713_v22  ;;  %v674_v26 = vadd.f32 %v673_v27, %v559_v50  ;;  %v564_v59 = vadd.f32 %v914_v23, %v449_v52 }
 0x12e   :  { %v916_v54 = vpop.f32.mrf.mxu0  ;;  %v675_v55 = vpop.f32.mrf.mxu1 }
 0x12f   :  { %v714_v56 = vmax.f32 %v674_v26, 0.0  ;;  %v917_v57 = vadd.f32 %v916_v54, %v915_v49  ;;  %v364_v26 = vadd.f32 %v808_v41, %v1630_v47 }
 0x130   :  { %v918_v58 = vpop.f32.mrf.mxu0  ;;  %v678_v61 = vpop.f32.mrf.mxu1 }
 0x131   :  { %724 = vst [vmem:[%s1703_s3 + $0x10] sm:$0xff] %v714_v56  ;;  %v679_v31 = vadd.f32 %v678_v61, %v564_v59  ;;  %v569_v4 = vadd.f32 %v917_v57, %v454_v60 }
 0x132   :  { %v919_v63 = vpop.f32.mrf.mxu0  ;;  %v680_v0 = vpop.f32.mrf.mxu1 }
 0x133   :  { %v715_v1 = vmax.f32 %v679_v31, 0.0  ;;  %v920_v2 = vadd.f32 %v919_v63, %v918_v58  ;;  %v479_v58 = vadd.f32 %v870_v45, %v364_v26 }
 0x134   :  { %v921_v3 = vpop.f32.mrf.mxu0  ;;  %v683_v6 = vpop.f32.mrf.mxu1 }
 0x135   :  { %725 = vst [vmem:[%s1703_s3 + $0x18] sm:$0xff] %v715_v1  ;;  %v684_v34 = vadd.f32 %v683_v6, %v569_v4  ;;  %v574_v13 = vadd.f32 %v920_v2, %v459_v7 }
 0x136   :  { %v922_v35 = vpop.f32.mrf.mxu0  ;;  %v685_v9 = vpop.f32.mrf.mxu1 }
 0x137   :  { %v716_v10 = vmax.f32 %v684_v34, 0.0  ;;  %v923_v11 = vadd.f32 %v922_v35, %v921_v3 }
 0x138   :  { %v924_v12 = vpop.f32.mrf.mxu0  ;;  %v688_v14 = vpop.f32.mrf.mxu1 }
 0x139   :  { %726 = vst [vmem:[%s1703_s3 + $0x20] sm:$0xff] %v716_v10  ;;  %v689_v38 = vadd.f32 %v688_v14, %v574_v13  ;;  %v579_v20 = vadd.f32 %v923_v11, %v464_v15 }
 0x13a   :  { %v925_v16 = vpop.f32.mrf.mxu0  ;;  %v690_v17 = vpop.f32.mrf.mxu1 }
 0x13b   :  { %v717_v18 = vmax.f32 %v689_v38, 0.0  ;;  %v926_v19 = vadd.f32 %v925_v16, %v924_v12 }
 0x13c   :  { %v927_v46 = vpop.f32.mrf.mxu0  ;;  %v693_v22 = vpop.f32.mrf.mxu1 }
 0x13d   :  { %727 = vst [vmem:[%s1703_s3 + $0x28] sm:$0xff] %v717_v18  ;;  %v694_v43 = vadd.f32 %v693_v22, %v579_v20  ;;  %v584_v27 = vadd.f32 %v926_v19, %v469_v21 }
 0x13e   :  { %v928_v23 = vpop.f32.mrf.mxu0  ;;  %v695_v49 = vpop.f32.mrf.mxu1 }
 0x13f   :  { %v718_v50 = vmax.f32 %v694_v43, 0.0  ;;  %v929_v51 = vadd.f32 %v928_v23, %v927_v46 }
 0x140   :  { %v930_v25 = vpop.f32.mrf.mxu0  ;;  %v698_v52 = vpop.f32.mrf.mxu1 }
 0x141   :  { %728 = vst [vmem:[%s1703_s3 + $0x30] sm:$0xff] %v718_v50  ;;  %v699_v44 = vadd.f32 %v698_v52, %v584_v27  ;;  %v589_v56 = vadd.f32 %v929_v51, %v474_v24 }
 0x142   :  { %v931_v8 = vpop.f32.mrf.mxu0  ;;  %v700_v48 = vpop.f32.mrf.mxu1 }
 0x143   :  { %v719_v54 = vmax.f32 %v699_v44, 0.0  ;;  %v932_v55 = vadd.f32 %v931_v8, %v930_v25 }
 0x144   :  { %v703_v57 = vpop.f32.mrf.mxu1 }
 0x145   :  { %729 = vst [vmem:[%s1703_s3 + $0x38] sm:$0xff] %v719_v54  ;;  %v704_v47 = vadd.f32 %v703_v57, %v589_v56  ;;  %v594_v53 = vadd.f32 %v932_v55, %v479_v58 }
 0x146   :  { %v705_v59 = vpop.f32.mrf.mxu1 }
 0x147   :  { %v720_v60 = vmax.f32 %v704_v47, 0.0 }
 0x148   :  { %v708_v62 = vpop.f32.mrf.mxu1 }
 0x149   :  { %730 = vst [vmem:[%s1703_s3 + $0x40] sm:$0xff] %v720_v60  ;;  %v709_v61 = vadd.f32 %v708_v62, %v594_v53 }
 0x14a   :  { %v710_v28 = vpop.f32.mrf.mxu1 }
 0x14b   :  { %v721_v30 = vmax.f32 %v709_v61, 0.0 }
 0x14d   :  { %731 = vst [vmem:[%s1703_s3 + $0x48] sm:$0xff] %v721_v30 }

// kernel: _lambda_.20
= control target key start
LH: loop header
LB: loop body
LE: loop exit
PB: predicated region body
PF: predicated region fallthrough
CT: control target
= control target key end

     0   :  { %s257_s1 = inlined_call_operand.vmem [shape: f32[128,128], index: 1, kind: input, shape index: {}]   ;;  %s258_s0 = inlined_call_operand.vmem [shape: f32[16,128], index: 0, kind: input, shape index: {}]   ;;  %s259_s2 = inlined_call_operand.vmem [shape: f32[1,128], index: 2, kind: input, shape index: {}]   ;;  %s260_s3 = inlined_call_operand.vmem [shape: f32[16,128], index: 3, kind: output, shape index: {}]  }
   0x1   :  { %v31_v0 = vld [vmem:[%s257_s1 + $0x78] sm:$0xff]  ;;  %v30_v1 = vld [vmem:[%s257_s1 + $0x70] sm:$0xff]  ;;  %v29_v2 = vld [vmem:[%s257_s1 + $0x68] sm:$0xff] }
   0x2   :  { %139 = vmatprep.subr.mxu0 %v31_v0  ;;  %v28_v3 = vld [vmem:[%s257_s1 + $0x60] sm:$0xff]  ;;  %v27_v5 = vld [vmem:[%s257_s1 + $0x58] sm:$0xff]  ;;  %v26_v6 = vld [vmem:[%s257_s1 + $0x50] sm:$0xff] }
   0x3   :  { %140 = vmatpush3.msra.mxu0 %v31_v0  ;;  %v14_v4 = vld [vmem:[%s258_s0] sm:$0xff]  ;;  %v25_v7 = vld [vmem:[%s257_s1 + $0x48] sm:$0xff]  ;;  %v23_v9 = vld [vmem:[%s257_s1 + $0x38] sm:$0xff] }
   0x4   :  { %141 = vmatprep.subr.mxu0 %v30_v1  ;;  %171 = vmatprep.mubr.f32.mxu0 %v14_v4  ;;  %v24_v8 = vld [vmem:[%s257_s1 + $0x40] sm:$0xff]  ;;  %v22_v10 = vld [vmem:[%s257_s1 + $0x30] sm:$0xff]  ;;  %v21_v11 = vld [vmem:[%s257_s1 + $0x28] sm:$0xff] }
   0x5   :  { %142 = vmatpush3.msra.mxu0 %v30_v1  ;;  %v20_v12 = vld [vmem:[%s257_s1 + $0x20] sm:$0xff]  ;;  %v19_v13 = vld [vmem:[%s257_s1 + $0x18] sm:$0xff]  ;;  %v18_v14 = vld [vmem:[%s257_s1 + $0x10] sm:$0xff] }
   0x6   :  { %143 = vmatprep.subr.mxu0 %v29_v2  ;;  %v17_v15 = vld [vmem:[%s257_s1 + $0x8] sm:$0xff]  ;;  %v16_v16 = vld [vmem:[%s257_s1] sm:$0xff] }
   0x7   :  { %144 = vmatpush3.msra.mxu0 %v29_v2  ;;  %v15_v17 = vld [vmem:[%s258_s0 + $0x8] sm:$0xff]  ;;  %v120_v18 = vld [vmem:[%s259_s2] ss:$0 sm:$0xff] }
   0x8   :  { %145 = vmatprep.subr.mxu0 %v28_v3 }
   0x9   :  { %146 = vmatpush3.msra.mxu0 %v28_v3 }
   0xa   :  { %147 = vmatprep.subr.mxu0 %v27_v5 }
   0xb   :  { %148 = vmatpush3.msra.mxu0 %v27_v5 }
   0xc   :  { %149 = vmatprep.subr.mxu0 %v26_v6 }
   0xd   :  { %150 = vmatpush3.msra.mxu0 %v26_v6 }
   0xe   :  { %151 = vmatprep.subr.mxu0 %v25_v7 }
   0xf   :  { %152 = vmatpush3.msra.mxu0 %v25_v7 }
  0x10   :  { %153 = vmatprep.subr.mxu0 %v24_v8 }
  0x11   :  { %154 = vmatpush3.msra.mxu0 %v24_v8 }
  0x12   :  { %155 = vmatprep.subr.mxu0 %v23_v9 }
  0x13   :  { %156 = vmatpush3.msra.mxu0 %v23_v9 }
  0x14   :  { %157 = vmatprep.subr.mxu0 %v22_v10 }
  0x15   :  { %158 = vmatpush3.msra.mxu0 %v22_v10 }
  0x16   :  { %159 = vmatprep.subr.mxu0 %v21_v11 }
  0x17   :  { %160 = vmatpush3.msra.mxu0 %v21_v11 }
  0x18   :  { %161 = vmatprep.subr.mxu0 %v20_v12 }
  0x19   :  { %162 = vmatpush3.msra.mxu0 %v20_v12 }
  0x1a   :  { %163 = vmatprep.subr.mxu0 %v19_v13 }
  0x1b   :  { %164 = vmatpush3.msra.mxu0 %v19_v13 }
  0x1c   :  { %165 = vmatprep.subr.mxu0 %v18_v14 }
  0x1d   :  { %166 = vmatpush3.msra.mxu0 %v18_v14 }
  0x1e   :  { %167 = vmatprep.subr.mxu0 %v17_v15 }
  0x1f   :  { %168 = vmatpush3.msra.mxu0 %v17_v15 }
  0x20   :  { %169 = vmatprep.subr.mxu0 %v16_v16 }
  0x21   :  { %170 = vmatpush3.msra.mxu0 %v16_v16 }
  0x22   :  { %172 = vmatmul.mubr.f32.vlgmr.msra.gmra.mxu0 %v15_v17 }
  0xe2   :  { %v173_v19 = vpop.f32.mrf.mxu0 }
  0xe3   :  { %v111_v20 = vadd.f32 %v173_v19, %v120_v18 }
  0xe4   :  { %v105_v21 = vpop.f32.mrf.mxu0 }
  0xe5   :  { %115 = vst [vmem:[%s260_s3 + $0x8] sm:$0xff] %v111_v20  ;;  %v106_v22 = vadd.f32 %v120_v18, %v105_v21 }
  0xe7   :  { %114 = vst [vmem:[%s260_s3] sm:$0xff] %v106_v22 }

// kernel: _lambda_.19
= control target key start
LH: loop header
LB: loop body
LE: loop exit
PB: predicated region body
PF: predicated region fallthrough
CT: control target
= control target key end

     0   :  { %s898_s1 = inlined_call_operand.vmem [shape: f32[640,128], index: 1, kind: input, shape index: {}]   ;;  %s899_s0 = inlined_call_operand.vmem [shape: f32[16,640], index: 0, kind: input, shape index: {}]   ;;  %s900_s2 = inlined_call_operand.vmem [shape: f32[1,128], index: 2, kind: input, shape index: {}]   ;;  %s901_s4 = inlined_call_operand.vmem [shape: f32[1,128], index: 4, kind: input, shape index: {}]   ;;  %s902_s5 = inlined_call_operand.vmem [shape: f32[1,128], index: 5, kind: input, shape index: {}]   ;;  %s903_s3 = inlined_call_operand.vmem [shape: f32[16,128], index: 3, kind: input, shape index: {}]   ;;  %s904_s6 = inlined_call_operand.vmem [shape: f32[16,128], index: 6, kind: output, shape index: {}]  }
   0x1   :  { %v64_v0 = vld [vmem:[%s898_s1 + $0xf8] sm:$0xff]  ;;  %v63_v2 = vld [vmem:[%s898_s1 + $0xf0] sm:$0xff]  ;;  %v62_v6 = vld [vmem:[%s898_s1 + $0xe8] sm:$0xff] }
   0x2   :  { %v48_v1 = vld [vmem:[%s898_s1 + $0x78] sm:$0xff]  ;;  %431 = vmatprep.subr.mxu0 %v64_v0  ;;  %v47_v4 = vld [vmem:[%s898_s1 + $0x70] sm:$0xff]  ;;  %v46_v8 = vld [vmem:[%s898_s1 + $0x68] sm:$0xff] }
   0x3   :  { %v96_v3 = vld [vmem:[%s898_s1 + $0x1f8] sm:$0xff]  ;;  %432 = vmatpush3.msra.mxu0 %v48_v1  ;;  %v95_v7 = vld [vmem:[%s898_s1 + $0x1f0] sm:$0xff]  ;;  %v94_v10 = vld [vmem:[%s898_s1 + $0x1e8] sm:$0xff] }
   0x4   :  { %v80_v5 = vld [vmem:[%s898_s1 + $0x178] sm:$0xff]  ;;  %469 = vmatprep.subr.mxu1 %v96_v3  ;;  %433 = vmatprep.subr.mxu0 %v63_v2  ;;  %v79_v9 = vld [vmem:[%s898_s1 + $0x170] sm:$0xff]  ;;  %v61_v11 = vld [vmem:[%s898_s1 + $0xe0] sm:$0xff] }
   0x5   :  { %470 = vmatpush3.msra.mxu1 %v80_v5  ;;  %434 = vmatpush3.msra.mxu0 %v47_v4  ;;  %v78_v12 = vld [vmem:[%s898_s1 + $0x168] sm:$0xff]  ;;  %v45_v13 = vld [vmem:[%s898_s1 + $0x60] sm:$0xff]  ;;  %v60_v15 = vld [vmem:[%s898_s1 + $0xd8] sm:$0xff] }
   0x6   :  { %471 = vmatprep.subr.mxu1 %v95_v7  ;;  %435 = vmatprep.subr.mxu0 %v62_v6  ;;  %v93_v14 = vld [vmem:[%s898_s1 + $0x1e0] sm:$0xff]  ;;  %v44_v17 = vld [vmem:[%s898_s1 + $0x58] sm:$0xff]  ;;  %v59_v19 = vld [vmem:[%s898_s1 + $0xd0] sm:$0xff] }
   0x7   :  { %472 = vmatpush3.msra.mxu1 %v79_v9  ;;  %436 = vmatpush3.msra.mxu0 %v46_v8  ;;  %v77_v16 = vld [vmem:[%s898_s1 + $0x160] sm:$0xff]  ;;  %v92_v18 = vld [vmem:[%s898_s1 + $0x1d8] sm:$0xff]  ;;  %v43_v21 = vld [vmem:[%s898_s1 + $0x50] sm:$0xff] }
   0x8   :  { %473 = vmatprep.subr.mxu1 %v94_v10  ;;  %437 = vmatprep.subr.mxu0 %v61_v11  ;;  %v76_v20 = vld [vmem:[%s898_s1 + $0x158] sm:$0xff]  ;;  %v91_v22 = vld [vmem:[%s898_s1 + $0x1d0] sm:$0xff]  ;;  %v58_v23 = vld [vmem:[%s898_s1 + $0xc8] sm:$0xff] }
   0x9   :  { %474 = vmatpush3.msra.mxu1 %v78_v12  ;;  %438 = vmatpush3.msra.mxu0 %v45_v13  ;;  %v75_v24 = vld [vmem:[%s898_s1 + $0x150] sm:$0xff]  ;;  %v42_v25 = vld [vmem:[%s898_s1 + $0x48] sm:$0xff]  ;;  %v57_v27 = vld [vmem:[%s898_s1 + $0xc0] sm:$0xff] }
   0xa   :  { %475 = vmatprep.subr.mxu1 %v93_v14  ;;  %439 = vmatprep.subr.mxu0 %v60_v15  ;;  %v90_v26 = vld [vmem:[%s898_s1 + $0x1c8] sm:$0xff]  ;;  %v41_v29 = vld [vmem:[%s898_s1 + $0x40] sm:$0xff]  ;;  %v56_v31 = vld [vmem:[%s898_s1 + $0xb8] sm:$0xff] }
   0xb   :  { %476 = vmatpush3.msra.mxu1 %v77_v16  ;;  %440 = vmatpush3.msra.mxu0 %v44_v17  ;;  %v74_v28 = vld [vmem:[%s898_s1 + $0x148] sm:$0xff]  ;;  %v89_v30 = vld [vmem:[%s898_s1 + $0x1c0] sm:$0xff]  ;;  %v40_v33 = vld [vmem:[%s898_s1 + $0x38] sm:$0xff] }
   0xc   :  { %477 = vmatprep.subr.mxu1 %v92_v18  ;;  %441 = vmatprep.subr.mxu0 %v59_v19  ;;  %v73_v32 = vld [vmem:[%s898_s1 + $0x140] sm:$0xff]  ;;  %v88_v34 = vld [vmem:[%s898_s1 + $0x1b8] sm:$0xff]  ;;  %v55_v35 = vld [vmem:[%s898_s1 + $0xb0] sm:$0xff] }
   0xd   :  { %478 = vmatpush3.msra.mxu1 %v76_v20  ;;  %442 = vmatpush3.msra.mxu0 %v43_v21  ;;  %v72_v36 = vld [vmem:[%s898_s1 + $0x138] sm:$0xff]  ;;  %v39_v37 = vld [vmem:[%s898_s1 + $0x30] sm:$0xff]  ;;  %v54_v39 = vld [vmem:[%s898_s1 + $0xa8] sm:$0xff] }
   0xe   :  { %479 = vmatprep.subr.mxu1 %v91_v22  ;;  %443 = vmatprep.subr.mxu0 %v58_v23  ;;  %v87_v38 = vld [vmem:[%s898_s1 + $0x1b0] sm:$0xff]  ;;  %v38_v41 = vld [vmem:[%s898_s1 + $0x28] sm:$0xff]  ;;  %v53_v43 = vld [vmem:[%s898_s1 + $0xa0] sm:$0xff] }
   0xf   :  { %480 = vmatpush3.msra.mxu1 %v75_v24  ;;  %444 = vmatpush3.msra.mxu0 %v42_v25  ;;  %v71_v40 = vld [vmem:[%s898_s1 + $0x130] sm:$0xff]  ;;  %v86_v42 = vld [vmem:[%s898_s1 + $0x1a8] sm:$0xff]  ;;  %v37_v45 = vld [vmem:[%s898_s1 + $0x20] sm:$0xff] }
  0x10   :  { %481 = vmatprep.subr.mxu1 %v90_v26  ;;  %445 = vmatprep.subr.mxu0 %v57_v27  ;;  %v70_v44 = vld [vmem:[%s898_s1 + $0x128] sm:$0xff]  ;;  %v85_v46 = vld [vmem:[%s898_s1 + $0x1a0] sm:$0xff]  ;;  %v52_v47 = vld [vmem:[%s898_s1 + $0x98] sm:$0xff] }
  0x11   :  { %482 = vmatpush3.msra.mxu1 %v74_v28  ;;  %446 = vmatpush3.msra.mxu0 %v41_v29  ;;  %v69_v48 = vld [vmem:[%s898_s1 + $0x120] sm:$0xff]  ;;  %v36_v49 = vld [vmem:[%s898_s1 + $0x18] sm:$0xff]  ;;  %v51_v51 = vld [vmem:[%s898_s1 + $0x90] sm:$0xff] }
  0x12   :  { %483 = vmatprep.subr.mxu1 %v89_v30  ;;  %447 = vmatprep.subr.mxu0 %v56_v31  ;;  %v84_v50 = vld [vmem:[%s898_s1 + $0x198] sm:$0xff]  ;;  %v35_v53 = vld [vmem:[%s898_s1 + $0x10] sm:$0xff]  ;;  %v50_v55 = vld [vmem:[%s898_s1 + $0x88] sm:$0xff] }
  0x13   :  { %484 = vmatpush3.msra.mxu1 %v73_v32  ;;  %448 = vmatpush3.msra.mxu0 %v40_v33  ;;  %v68_v52 = vld [vmem:[%s898_s1 + $0x118] sm:$0xff]  ;;  %v83_v54 = vld [vmem:[%s898_s1 + $0x190] sm:$0xff]  ;;  %v34_v57 = vld [vmem:[%s898_s1 + $0x8] sm:$0xff] }
  0x14   :  { %485 = vmatprep.subr.mxu1 %v88_v34  ;;  %449 = vmatprep.subr.mxu0 %v55_v35  ;;  %v67_v56 = vld [vmem:[%s898_s1 + $0x110] sm:$0xff]  ;;  %v82_v58 = vld [vmem:[%s898_s1 + $0x188] sm:$0xff]  ;;  %v49_v59 = vld [vmem:[%s898_s1 + $0x80] sm:$0xff] }
  0x15   :  { %486 = vmatpush3.msra.mxu1 %v72_v36  ;;  %450 = vmatpush3.msra.mxu0 %v39_v37  ;;  %v24_v60 = vld [vmem:[%s899_s0 + $0x8] sm:$0xff]  ;;  %v33_v61 = vld [vmem:[%s898_s1] sm:$0xff]  ;;  %v112_v1 = vld [vmem:[%s898_s1 + $0x278] sm:$0xff] }
  0x16   :  { %487 = vmatprep.subr.mxu1 %v87_v38  ;;  %451 = vmatprep.subr.mxu0 %v54_v39  ;;  %v66_v62 = vld [vmem:[%s898_s1 + $0x108] sm:$0xff]  ;;  %v23_v63 = vld [vmem:[%s899_s0] sm:$0xff]  ;;  %v26_v3 = vld [vmem:[%s899_s0 + $0x18] sm:$0xff] }
  0x17   :  { %488 = vmatpush3.msra.mxu1 %v71_v40  ;;  %452 = vmatpush3.msra.mxu0 %v38_v41  ;;  %v81_v0 = vld [vmem:[%s898_s1 + $0x180] sm:$0xff]  ;;  %v25_v4 = vld [vmem:[%s899_s0 + $0x10] sm:$0xff]  ;;  %v110_v7 = vld [vmem:[%s898_s1 + $0x268] sm:$0xff] }
  0x18   :  { %489 = vmatprep.subr.mxu1 %v86_v42  ;;  %453 = vmatprep.subr.mxu0 %v53_v43  ;;  %v65_v2 = vld [vmem:[%s898_s1 + $0x100] sm:$0xff]  ;;  %v111_v5 = vld [vmem:[%s898_s1 + $0x270] sm:$0xff]  ;;  %v28_v8 = vld [vmem:[%s899_s0 + $0x28] sm:$0xff] }
  0x19   :  { %490 = vmatpush3.msra.mxu1 %v70_v44  ;;  %454 = vmatpush3.msra.mxu0 %v37_v45  ;;  %v29_v6 = vld [vmem:[%s899_s0 + $0x30] sm:$0xff]  ;;  %v31_v9 = vld [vmem:[%s899_s0 + $0x40] sm:$0xff]  ;;  %v30_v11 = vld [vmem:[%s899_s0 + $0x38] sm:$0xff] }
  0x1a   :  { %491 = vmatprep.subr.mxu1 %v85_v46  ;;  %455 = vmatprep.subr.mxu0 %v52_v47  ;;  %v109_v10 = vld [vmem:[%s898_s1 + $0x260] sm:$0xff]  ;;  %v108_v13 = vld [vmem:[%s898_s1 + $0x258] sm:$0xff]  ;;  %v107_v14 = vld [vmem:[%s898_s1 + $0x250] sm:$0xff]  ;;  %v355_v47 = vlaneseq }
  0x1b   :  { %492 = vmatpush3.msra.mxu1 %v69_v48  ;;  %456 = vmatpush3.msra.mxu0 %v36_v49  ;;  %v27_v12 = vld [vmem:[%s899_s0 + $0x20] sm:$0xff]  ;;  %v106_v15 = vld [vmem:[%s898_s1 + $0x248] sm:$0xff]  ;;  %v104_v17 = vld [vmem:[%s898_s1 + $0x238] sm:$0xff] }
  0x1c   :  { %493 = vmatprep.subr.mxu1 %v84_v50  ;;  %457 = vmatprep.subr.mxu0 %v51_v51  ;;  %v105_v16 = vld [vmem:[%s898_s1 + $0x240] sm:$0xff]  ;;  %v103_v18 = vld [vmem:[%s898_s1 + $0x230] sm:$0xff]  ;;  %v102_v19 = vld [vmem:[%s898_s1 + $0x228] sm:$0xff]  ;;  %v356_v48 = vand.u32 127, %v355_v47 }
  0x1d   :  { %494 = vmatpush3.msra.mxu1 %v68_v52  ;;  %458 = vmatpush3.msra.mxu0 %v35_v53  ;;  %v101_v20 = vld [vmem:[%s898_s1 + $0x220] sm:$0xff]  ;;  %v100_v21 = vld [vmem:[%s898_s1 + $0x218] sm:$0xff]  ;;  %v99_v22 = vld [vmem:[%s898_s1 + $0x210] sm:$0xff] }
  0x1e   :  { %495 = vmatprep.subr.mxu1 %v83_v54  ;;  %459 = vmatprep.subr.mxu0 %v50_v55  ;;  %v98_v23 = vld [vmem:[%s898_s1 + $0x208] sm:$0xff]  ;;  %v97_v24 = vld [vmem:[%s898_s1 + $0x200] sm:$0xff]  ;;  %vm357_vm0 = vcmp.lt.s32.totalorder %v356_v48, 32 }
  0x1f   :  { %496 = vmatpush3.msra.mxu1 %v67_v56  ;;  %460 = vmatpush3.msra.mxu0 %v34_v57  ;;  %v32_v25 = vld [vmem:[%s899_s0 + $0x48] sm:$0xff]  ;;  %v428_v34 = vld [vmem:[%s900_s2] ss:$0 sm:$0xff] }
  0x20   :  { %497 = vmatprep.subr.mxu1 %v82_v58  ;;  %461 = vmatprep.subr.mxu0 %v49_v59 }
  0x21   :  { %184 = vmatprep.mubr.f32.mxu0 %v24_v60  ;;  %462 = vmatpush3.msra.mxu0 %v33_v61 }
  0x22   :  { %498 = vmatpush3.msra.mxu1 %v66_v62  ;;  %185 = vmatmul.mubr.f32.vlgmr.msra.gmra.mxu0 %v23_v63 }
  0x23   :  { %499 = vmatprep.subr.mxu1 %v81_v0  ;;  %525 = vmatprep.subr.mxu0 %v112_v1 }
  0x24   :  { %500 = vmatpush3.msra.mxu1 %v65_v2  ;;  %259 = vmatprep.mubr.f32.mxu1 %v26_v3  ;;  %v429_v2 = vld [vmem:[%s901_s4] ss:$0 sm:$0xff] }
  0x25   :  { %526 = vmatpush3.msra.mxu0 %v112_v1  ;;  %260 = vmatmul.mubr.f32.vlgmr.msra.gmra.mxu1 %v25_v4  ;;  %v430_v4 = vld [vmem:[%s902_s5] ss:$0 sm:$0xff] }
  0x26   :  { %527 = vmatprep.subr.mxu0 %v111_v5  ;;  %189 = vmatprep.mubr.f32.mxu0 %v29_v6 }
  0x27   :  { %528 = vmatpush3.msra.mxu0 %v111_v5  ;;  %264 = vmatprep.mubr.f32.mxu1 %v31_v9 }
  0x28   :  { %529 = vmatprep.subr.mxu0 %v110_v7  ;;  %190 = vmatmul.mubr.f32.gmra.mxu0 %v28_v8 }
  0x29   :  { %530 = vmatpush3.msra.mxu0 %v110_v7  ;;  %265 = vmatmul.mubr.f32.gmra.mxu1 %v30_v11  ;;  %v390_v7 = vld [vmem:[%s903_s3] sm:$0xff] }
  0x2a   :  { %531 = vmatprep.subr.mxu0 %v109_v10  ;;  %557 = vmatprep.mubr.f32.mxu0 %v27_v12  ;;  %v391_v12 = vld [vmem:[%s903_s3 + $0x8] sm:$0xff] }
  0x2b   :  { %532 = vmatpush3.msra.mxu0 %v109_v10 }
  0x2c   :  { %533 = vmatprep.subr.mxu0 %v108_v13 }
  0x2d   :  { %534 = vmatpush3.msra.mxu0 %v108_v13 }
  0x2e   :  { %535 = vmatprep.subr.mxu0 %v107_v14 }
  0x2f   :  { %536 = vmatpush3.msra.mxu0 %v107_v14 }
  0x30   :  { %537 = vmatprep.subr.mxu0 %v106_v15 }
  0x31   :  { %538 = vmatpush3.msra.mxu0 %v106_v15 }
  0x32   :  { %539 = vmatprep.subr.mxu0 %v105_v16 }
  0x33   :  { %540 = vmatpush3.msra.mxu0 %v105_v16 }
  0x34   :  { %541 = vmatprep.subr.mxu0 %v104_v17 }
  0x35   :  { %542 = vmatpush3.msra.mxu0 %v104_v17 }
  0x36   :  { %543 = vmatprep.subr.mxu0 %v103_v18 }
  0x37   :  { %544 = vmatpush3.msra.mxu0 %v103_v18 }
  0x38   :  { %545 = vmatprep.subr.mxu0 %v102_v19 }
  0x39   :  { %546 = vmatpush3.msra.mxu0 %v102_v19 }
  0x3a   :  { %547 = vmatprep.subr.mxu0 %v101_v20 }
  0x3b   :  { %548 = vmatpush3.msra.mxu0 %v101_v20 }
  0x3c   :  { %549 = vmatprep.subr.mxu0 %v100_v21 }
  0x3d   :  { %550 = vmatpush3.msra.mxu0 %v100_v21 }
  0x3e   :  { %551 = vmatprep.subr.mxu0 %v99_v22 }
  0x3f   :  { %552 = vmatpush3.msra.mxu0 %v99_v22 }
  0x40   :  { %553 = vmatprep.subr.mxu0 %v98_v23 }
  0x41   :  { %554 = vmatpush3.msra.mxu0 %v98_v23 }
  0x42   :  { %555 = vmatprep.subr.mxu0 %v97_v24 }
  0x43   :  { %556 = vmatpush3.msra.mxu0 %v97_v24 }
  0x44   :  { %558 = vmatmul.mubr.f32.vlgmr.msra.gmra.mxu0 %v32_v25 }
  0xe2   :  { %v463_v26 = vpop.f32.mrf.mxu0 }
  0xe4   :  { %v464_v27 = vpop.f32.mrf.mxu0 }
  0xe5   :  { %v501_v28 = vpop.f32.mrf.mxu1  ;;  %v465_v33 = vadd.f32 %v464_v27, %v463_v26 }
  0xe7   :  { %v502_v30 = vpop.f32.mrf.mxu1  ;;  %v187_v37 = vadd.f32 %v465_v33, %v428_v34 }
  0xe8   :  { %v466_v29 = vpop.f32.mrf.mxu0  ;;  %v503_v38 = vadd.f32 %v502_v30, %v501_v28 }
  0xe9   :  { %v504_v32 = vpop.f32.mrf.mxu1 }
  0xea   :  { %v467_v31 = vpop.f32.mrf.mxu0  ;;  %v262_v42 = vadd.f32 %v503_v38, %v187_v37 }
  0xeb   :  { %v468_v35 = vadd.f32 %v467_v31, %v466_v29  ;;  %v505_v36 = vpop.f32.mrf.mxu1 }
  0xec   :  { %v506_v40 = vadd.f32 %v505_v36, %v504_v32 }
  0xed   :  { %v192_v39 = vadd.f32 %v468_v35, %v428_v34 }
  0xef   :  { %v267_v44 = vadd.f32 %v506_v40, %v192_v39 }
 0x104   :  { %v559_v41 = vpop.f32.mrf.mxu0 }
 0x105   :  { %v342_v46 = vadd.f32 %v559_v41, %v267_v44 }
 0x106   :  { %v336_v43 = vpop.f32.mrf.mxu0 }
 0x107   :  { %v337_v45 = vadd.f32 %v336_v43, %v262_v42 }
 0x109   :  { %347 = vadd.xlane.f32.xlu0 %v337_v45 }
 0x10d   :  { %349 = vadd.xlane.f32.xlu0 %v342_v46 }
 0x192   :  { %v348_v49 = vpop.xlane.xlu0 %347 }
 0x193   :  { %v351_v50 = vmul.f32 0.03125, %v348_v49 }
 0x195   :  { %v353_v51 = vsub.f32 %v337_v45, %v351_v50 }
 0x196   :  { %v350_v52 = vpop.xlane.xlu0 %349 }
 0x197   :  { %v352_v53 = vmul.f32 0.03125, %v350_v52  ;;  %v358_v54 = vsel %vm357_vm0, %v353_v51, 0.0 }
 0x198   :  { %v360_v55 = vmul.f32 %v358_v54, %v358_v54 }
 0x199   :  { %v354_v56 = vsub.f32 %v342_v46, %v352_v53 }
 0x19a   :  { %362 = vadd.xlane.f32.xlu1 %v360_v55 }
 0x19b   :  { %v359_v57 = vsel %vm357_vm0, %v354_v56, 0.0 }
 0x19c   :  { %v361_v58 = vmul.f32 %v359_v57, %v359_v57 }
 0x19e   :  { %364 = vadd.xlane.f32.xlu1 %v361_v58 }
 0x223   :  { %v363_v59 = vpop.xlane.xlu1 %362 }
 0x224   :  { %v366_v60 = vmul.f32 0.03125, %v363_v59 }
 0x226   :  { %v368_v61 = vadd.f32 1e-12, %v366_v60 }
 0x227   :  { %v365_v62 = vpop.xlane.xlu1 %364 }
 0x228   :  { %560 = vrsqrt.f32 %v368_v61  ;;  %v367_v63 = vmul.f32 0.03125, %v365_v62 }
 0x22a   :  { %v369_v0 = vadd.f32 1e-12, %v367_v63 }
 0x22c   :  { %562 = vrsqrt.f32 %v369_v0 }
 0x235   :  { %v561_v1 = vpop.eup %560 }
 0x236   :  { %v372_v3 = vmul.f32 %v561_v1, %v358_v54 }
 0x238   :  { %v380_v5 = vmul.f32 %v429_v2, %v372_v3 }
 0x239   :  { %v563_v6 = vpop.eup %562 }
 0x23a   :  { %v388_v8 = vadd.f32 %v430_v4, %v380_v5  ;;  %v373_v9 = vmul.f32 %v563_v6, %v359_v57 }
 0x23c   :  { %v392_v10 = vadd.f32 %v390_v7, %v388_v8  ;;  %v381_v11 = vmul.f32 %v429_v2, %v373_v9 }
 0x23e   :  { %394 = vadd.xlane.f32.xlu0 %v392_v10  ;;  %v389_v13 = vadd.f32 %v430_v4, %v381_v11 }
 0x240   :  { %v393_v14 = vadd.f32 %v391_v12, %v389_v13 }
 0x242   :  { %396 = vadd.xlane.f32.xlu1 %v393_v14 }
 0x2c7   :  { %v395_v15 = vpop.xlane.xlu0 %394 }
 0x2c8   :  { %v398_v16 = vmul.f32 0.03125, %v395_v15 }
 0x2ca   :  { %v400_v17 = vsub.f32 %v392_v10, %v398_v16 }
 0x2cb   :  { %v397_v18 = vpop.xlane.xlu1 %396 }
 0x2cc   :  { %v399_v19 = vmul.f32 0.03125, %v397_v18  ;;  %v402_v20 = vsel %vm357_vm0, %v400_v17, 0.0 }
 0x2cd   :  { %v404_v21 = vmul.f32 %v402_v20, %v402_v20 }
 0x2ce   :  { %v401_v22 = vsub.f32 %v393_v14, %v399_v19 }
 0x2cf   :  { %406 = vadd.xlane.f32.xlu0 %v404_v21 }
 0x2d0   :  { %v403_v23 = vsel %vm357_vm0, %v401_v22, 0.0 }
 0x2d1   :  { %v405_v24 = vmul.f32 %v403_v23, %v403_v23 }
 0x2d3   :  { %408 = vadd.xlane.f32.xlu1 %v405_v24 }
 0x358   :  { %v407_v25 = vpop.xlane.xlu0 %406 }
 0x359   :  { %v410_v26 = vmul.f32 0.03125, %v407_v25 }
 0x35b   :  { %v412_v27 = vadd.f32 1e-12, %v410_v26 }
 0x35c   :  { %v409_v28 = vpop.xlane.xlu1 %408 }
 0x35d   :  { %564 = vrsqrt.f32 %v412_v27  ;;  %v411_v29 = vmul.f32 0.03125, %v409_v28 }
 0x35f   :  { %v413_v30 = vadd.f32 1e-12, %v411_v29 }
 0x361   :  { %566 = vrsqrt.f32 %v413_v30 }
 0x36a   :  { %v565_v31 = vpop.eup %564 }
 0x36b   :  { %v416_v32 = vmul.f32 %v565_v31, %v402_v20 }
 0x36d   :  { %v418_v33 = vmul.f32 %v429_v2, %v416_v32 }
 0x36e   :  { %v567_v34 = vpop.eup %566 }
 0x36f   :  { %v420_v35 = vadd.f32 %v430_v4, %v418_v33  ;;  %v417_v36 = vmul.f32 %v567_v34, %v403_v23 }
 0x371   :  { %422 = vst [vmem:[%s904_s6] sm:$0xff] %v420_v35  ;;  %v419_v37 = vmul.f32 %v429_v2, %v417_v36 }
 0x373   :  { %v421_v38 = vadd.f32 %v430_v4, %v419_v37 }
 0x375   :  { %423 = vst [vmem:[%s904_s6 + $0x8] sm:$0xff] %v421_v38 }

// kernel: _lambda_.21
= control target key start
LH: loop header
LB: loop body
LE: loop exit
PB: predicated region body
PF: predicated region fallthrough
CT: control target
= control target key end

     0   :  { %s1098_s12 = smov 0   ;;  %s1175_s0 = inlined_call_operand.vmem [shape: f32[8,8,8], index: 0, kind: input, shape index: {}]   ;;  %s1176_s1 = inlined_call_operand.vmem [shape: f32[8,8,8], index: 1, kind: input, shape index: {}]   ;;  %s1177_s2 = inlined_call_operand.vmem [shape: f32[8,8,8], index: 2, kind: input, shape index: {}]   ;;  %s1178_s3 = inlined_call_operand.vmem [shape: f32[8,8,8], index: 3, kind: output, shape index: {}]  }
   0x1 LB: > { %s959_s13 = sadd.s32 4294967295, %s1074_s12   ;;  %p963_p0 = scmp.ge.s32.totalorder %s1074_s12, 1  ;;  %s1074_s12 = sphi %s1098_s12, %s13_s12  }
   0x2   : > { %p160_p1 = scmp.lt.s32.totalorder %s1074_s12, 3 }
   0x4   : > { %p161_p2 = pnand %p963_p0, %p160_p1 }
   0x5   : > { %s964_s14 = sshll.u32 (!%p161_p2), %s959_s13, 2 }
   0x6   : > { %164 = sbr.rel (%p161_p2) target bundleno = 726 (0x2d6), region = 32  ;;  %p195_p3 = scmp.lt.s32.totalorder (!%p161_p2), %s964_s14, 7 }
   0xb   : > { %v1076_v0 = vmov 0.0   ;;  %vm1077_vm0 = vmmov 0   ;;  %s1180_s14 = smov (!%p195_p3, %s964_s14), 7  ;;  %vm234_vm1 = vcmask 64512  }
   0xc   : > { %1002 = vmatprep.subr.mxu0 %v1076_v0  ;;  %1004 = vmatprep.mubr.msk.f32.mxu0 %vm1077_vm0, %v1076_v0  ;;  %s1112_s15 = sshll.u32 %s1180_s14, 3 }
   0xd   : > { %1007 = vmatprep.subr.mxu1 %v1076_v0  ;;  %1009 = vmatprep.mubr.msk.f32.mxu1 %vm1077_vm0, %v1076_v0  ;;  %s204_s18 = scalar_lea.vmem %s1176_s1, %s1112_s15  ;;  %s198_s21 = scalar_lea.vmem %s1175_s0, %s1112_s15 }
   0xe   : > { %v226_v1 = vld [vmem:[%s204_s18] sm:$0xff]  ;;  %v227_v3 = vld [vmem:[%s204_s18 + $0x8] sm:$0xff]  ;;  %v220_v6 = vld [vmem:[%s198_s21 + $0x10] sm:$0xff]  ;;  %s210_s24 = scalar_lea.vmem %s1177_s2, %s1112_s15  ;;  %s216_s27 = scalar_lea.vmem %s1178_s3, %s1112_s15 }
   0xf   : > { %v218_v2 = vld [vmem:[%s198_s21] sm:$0xff]  ;;  %1003 = vmatpush3.xpose.msk.msra.mxu0 %vm234_vm1, %v226_v1  ;;  %1008 = vmatpush3.xpose.msk.msra.mxu1 %vm234_vm1, %v227_v3  ;;  %v219_v5 = vld [vmem:[%s198_s21 + $0x8] sm:$0xff]  ;;  %v228_v7 = vld [vmem:[%s204_s18 + $0x10] sm:$0xff]  ;;  %v224_v11 = vmul.f32 0.35355338, %v220_v6 }
  0x10   : > { %v222_v4 = vmul.f32 0.35355338, %v218_v2  ;;  %1012 = vmatprep.subr.mxu0 %v1076_v0  ;;  %v223_v8 = vmul.f32 0.35355338, %v219_v5  ;;  %1017 = vmatprep.subr.mxu1 %v1076_v0  ;;  %v221_v9 = vld [vmem:[%s198_s21 + $0x18] sm:$0xff]  ;;  %v230_v45 = vld [vmem:[%s210_s24] sm:$0xff] }
  0x11   : > { %v229_v10 = vld [vmem:[%s204_s18 + $0x18] sm:$0xff]  ;;  %v225_v12 = vmul.f32 0.35355338, %v221_v9  ;;  %v231_v46 = vld [vmem:[%s210_s24 + $0x8] sm:$0xff]  ;;  %v232_v53 = vld [vmem:[%s210_s24 + $0x10] sm:$0xff] }
  0x12   : > { %1005 = vmatmul.mubr.msk.f32.vlgmr.msra.gmra.mxu0 %vm234_vm1, %v222_v4  ;;  %1010 = vmatmul.mubr.msk.f32.vlgmr.msra.gmra.mxu1 %vm234_vm1, %v223_v8  ;;  %v233_v57 = vld [vmem:[%s210_s24 + $0x18] sm:$0xff] }
  0x13   : > { %1013 = vmatpush3.xpose.msk.msra.mxu0 %vm234_vm1, %v228_v7  ;;  %1014 = vmatprep.mubr.msk.f32.mxu0 %vm1077_vm0, %v1076_v0 }
  0x14   : > { %1018 = vmatpush3.xpose.msk.msra.mxu1 %vm234_vm1, %v229_v10  ;;  %1019 = vmatprep.mubr.msk.f32.mxu1 %vm1077_vm0, %v1076_v0 }
  0x15   : > { %1022 = vmatprep.subr.mxu0 %v1076_v0  ;;  %1027 = vmatprep.subr.mxu1 %v1076_v0 }
  0x16   : > { %1015 = vmatmul.mubr.msk.f32.vlgmr.msra.gmra.mxu0 %vm234_vm1, %v224_v11 }
  0x17   : > { %1020 = vmatmul.mubr.msk.f32.vlgmr.msra.gmra.mxu1 %vm234_vm1, %v225_v12  ;;  %1024 = vmatprep.mubr.msk.f32.mxu0 %vm1077_vm0, %v1076_v0 }
  0x18   : > { %1029 = vmatprep.mubr.msk.f32.mxu1 %vm1077_vm0, %v1076_v0  ;;  %1023 = vmatpush3.msra.mxu0 %v230_v45 }
  0x19   : > { %1032 = vmatprep.subr.mxu0 %v1076_v0  ;;  %1028 = vmatpush3.msra.mxu1 %v231_v46 }
  0x1a   : > { %1037 = vmatprep.subr.mxu1 %v1076_v0 }
  0xd2   : > { %v307_v13 = vpop.f32.mrf.mxu0  ;;  %v383_v14 = vpop.f32.mrf.mxu1 }
  0xd3   : > { %v539_v15 = vsel %vm234_vm1, %v307_v13, -inf  ;;  %v542_v18 = vsel %vm234_vm1, %v383_v14, -inf }
  0xd4   : > { %540 = vmax.xlane.f32.xlu0 %v539_v15  ;;  %v1006_v16 = vpop.f32.mrf.mxu0  ;;  %v1011_v17 = vpop.f32.mrf.mxu1 }
  0xd6   : > { %v459_v19 = vpop.f32.mrf.mxu0 }
  0xd7   : > { %v545_v20 = vsel %vm234_vm1, %v459_v19, -inf  ;;  %v535_v21 = vpop.f32.mrf.mxu1 }
  0xd8   : > { %543 = vmax.xlane.f32.xlu0 %v542_v18  ;;  %546 = vmax.xlane.f32.xlu1 %v545_v20  ;;  %v1016_v22 = vpop.f32.mrf.mxu0  ;;  %v548_v24 = vsel %vm234_vm1, %v535_v21, -inf }
  0xd9   : > { %v1021_v23 = vpop.f32.mrf.mxu1 }
  0xdc   : > { %549 = vmax.xlane.f32.xlu1 %v548_v24 }
 0x15d   : > { %v541_v25 = vpop.xlane.xlu0 %540 }
 0x15e   : > { %v551_v26 = vsub.f32 %v307_v13, %v541_v25 }
 0x160   : > { %v555_v27 = vmul.f32 1.442695, %v551_v26 }
 0x161   : > { %v544_v28 = vpop.xlane.xlu0 %543  ;;  %v547_v29 = vpop.xlane.xlu1 %546 }
 0x162   : > { %1052 = vpow2.f32 %v555_v27  ;;  %v552_v30 = vsub.f32 %v383_v14, %v544_v28  ;;  %v553_v31 = vsub.f32 %v459_v19, %v547_v29 }
 0x164   : > { %v557_v32 = vmul.f32 1.442695, %v552_v30  ;;  %v559_v33 = vmul.f32 1.442695, %v553_v31 }
 0x165   : > { %v550_v34 = vpop.xlane.xlu1 %549 }
 0x166   : > { %1054 = vpow2.f32 %v557_v32  ;;  %v554_v35 = vsub.f32 %v535_v21, %v550_v34 }
 0x167   : > { %1056 = vpow2.f32 %v559_v33 }
 0x168   : > { %v561_v36 = vmul.f32 1.442695, %v554_v35 }
 0x16a   : > { %1058 = vpow2.f32 %v561_v36 }
 0x16f   : > { %v1053_v37 = vpop.eup %1052 }
 0x170   : > { %v563_v38 = vsel %vm234_vm1, %v1053_v37, 0.0 }
 0x171   : > { %564 = vadd.xlane.f32.xlu0 %v563_v38 }
 0x173   : > { %v1055_v39 = vpop.eup %1054 }
 0x174   : > { %v1057_v40 = vpop.eup %1056  ;;  %v566_v41 = vsel %vm234_vm1, %v1055_v39, 0.0 }
 0x175   : > { %567 = vadd.xlane.f32.xlu1 %v566_v41  ;;  %v569_v42 = vsel %vm234_vm1, %v1057_v40, 0.0 }
 0x176   : > { %570 = vadd.xlane.f32.xlu0 %v569_v42 }
 0x177   : > { %v1059_v43 = vpop.eup %1058 }
 0x178   : > { %v572_v44 = vsel %vm234_vm1, %v1059_v43, 0.0 }
 0x179   : > { %573 = vadd.xlane.f32.xlu1 %v572_v44 }
 0x1fa   : > { %v565_v47 = vpop.xlane.xlu0 %564 }
 0x1fb   : > { %1060 = vrcp.f32 %v565_v47 }
 0x1fe   : > { %v568_v48 = vpop.xlane.xlu1 %567 }
 0x1ff   : > { %v571_v49 = vpop.xlane.xlu0 %570  ;;  %1062 = vrcp.f32 %v568_v48 }
 0x200   : > { %1064 = vrcp.f32 %v571_v49 }
 0x202   : > { %v574_v50 = vpop.xlane.xlu1 %573 }
 0x203   : > { %1066 = vrcp.f32 %v574_v50 }
 0x208   : > { %v1061_v51 = vpop.eup %1060 }
 0x209   : > { %v579_v52 = vmul.f32 %v1061_v51, %v1053_v37 }
 0x20b   : > { %1025 = vmatmul.mubr.msk.f32.vlgmr.msra.gmra.mxu0 %vm234_vm1, %v579_v52 }
 0x20c   : > { %v1063_v54 = vpop.eup %1062  ;;  %1033 = vmatpush3.msra.mxu0 %v232_v53  ;;  %1034 = vmatprep.mubr.msk.f32.mxu0 %vm1077_vm0, %v1076_v0 }
 0x20d   : > { %v1065_v55 = vpop.eup %1064  ;;  %v580_v56 = vmul.f32 %v1063_v54, %v1055_v39 }
 0x20e   : > { %v581_v58 = vmul.f32 %v1065_v55, %v1057_v40 }
 0x20f   : > { %1030 = vmatmul.mubr.msk.f32.vlgmr.msra.gmra.mxu1 %vm234_vm1, %v580_v56 }
 0x210   : > { %v1067_v59 = vpop.eup %1066  ;;  %1035 = vmatmul.mubr.msk.f32.vlgmr.msra.gmra.mxu0 %vm234_vm1, %v581_v58  ;;  %1038 = vmatpush3.msra.mxu1 %v233_v57 }
 0x211   : > { %1039 = vmatprep.mubr.msk.f32.mxu1 %vm1077_vm0, %v1076_v0  ;;  %v582_v60 = vmul.f32 %v1067_v59, %v1059_v43 }
 0x213   : > { %1040 = vmatmul.mubr.msk.f32.vlgmr.msra.gmra.mxu1 %vm234_vm1, %v582_v60 }
 0x2cb   : > { %v652_v61 = vpop.f32.mrf.mxu0 }
 0x2cc   : > { %875 = vst.msk [vmem:[%s216_s27] sm:$0xff] %vm234_vm1, %v652_v61 }
 0x2cd   : > { %v1026_v62 = vpop.f32.mrf.mxu0 }
 0x2cf   : > { %v725_v63 = vpop.f32.mrf.mxu1 }
 0x2d0   : > { %876 = vst.msk [vmem:[%s216_s27 + $0x8] sm:$0xff] %vm234_vm1, %v725_v63  ;;  %v798_v1 = vpop.f32.mrf.mxu0 }
 0x2d1   : > { %877 = vst.msk [vmem:[%s216_s27 + $0x10] sm:$0xff] %vm234_vm1, %v798_v1  ;;  %v1031_v2 = vpop.f32.mrf.mxu1 }
 0x2d2   : > { %v1036_v3 = vpop.f32.mrf.mxu0 }
 0x2d3   : > { %v871_v0 = vpop.f32.mrf.mxu1 }
 0x2d4   : > { %878 = vst.msk [vmem:[%s216_s27 + $0x18] sm:$0xff] %vm234_vm1, %v871_v0 }
 0x2d5   : > { %v1041_v4 = vpop.f32.mrf.mxu1 }
 0x2d6 PF: > { %s13_s12 = sadd.s32 1, %s1074_s12  }
 0x2d7   : > { %p10_p4 = scmp.ge.s32.totalorder %s13_s12, 4  }
 0x2d9   :  { %12 = sbr.rel (!%p10_p4) target bundleno = 1 (0x1), region = 68 }

// kernel: _lambda_.23
= control target key start
LH: loop header
LB: loop body
LE: loop exit
PB: predicated region body
PF: predicated region fallthrough
CT: control target
= control target key end

     0   :  { %s279_s1 = inlined_call_operand.vmem [shape: f32[128,128], index: 1, kind: input, shape index: {}]   ;;  %s280_s0 = inlined_call_operand.vmem [shape: f32[16,128], index: 0, kind: input, shape index: {}]   ;;  %s281_s2 = inlined_call_operand.vmem [shape: f32[1,128], index: 2, kind: input, shape index: {}]   ;;  %s282_s3 = inlined_call_operand.vmem [shape: f32[16,128], index: 3, kind: output, shape index: {}]  }
   0x1   :  { %v31_v0 = vld [vmem:[%s279_s1 + $0x78] sm:$0xff]  ;;  %v30_v1 = vld [vmem:[%s279_s1 + $0x70] sm:$0xff]  ;;  %v29_v2 = vld [vmem:[%s279_s1 + $0x68] sm:$0xff] }
   0x2   :  { %157 = vmatprep.subr.mxu0 %v31_v0  ;;  %v28_v3 = vld [vmem:[%s279_s1 + $0x60] sm:$0xff]  ;;  %v27_v5 = vld [vmem:[%s279_s1 + $0x58] sm:$0xff]  ;;  %v26_v6 = vld [vmem:[%s279_s1 + $0x50] sm:$0xff] }
   0x3   :  { %158 = vmatpush3.msra.mxu0 %v31_v0  ;;  %v14_v4 = vld [vmem:[%s280_s0] sm:$0xff]  ;;  %v25_v7 = vld [vmem:[%s279_s1 + $0x48] sm:$0xff]  ;;  %v23_v9 = vld [vmem:[%s279_s1 + $0x38] sm:$0xff] }
   0x4   :  { %159 = vmatprep.subr.mxu0 %v30_v1  ;;  %189 = vmatprep.mubr.f32.mxu0 %v14_v4  ;;  %v24_v8 = vld [vmem:[%s279_s1 + $0x40] sm:$0xff]  ;;  %v22_v10 = vld [vmem:[%s279_s1 + $0x30] sm:$0xff]  ;;  %v21_v11 = vld [vmem:[%s279_s1 + $0x28] sm:$0xff] }
   0x5   :  { %160 = vmatpush3.msra.mxu0 %v30_v1  ;;  %v20_v12 = vld [vmem:[%s279_s1 + $0x20] sm:$0xff]  ;;  %v19_v13 = vld [vmem:[%s279_s1 + $0x18] sm:$0xff]  ;;  %v18_v14 = vld [vmem:[%s279_s1 + $0x10] sm:$0xff] }
   0x6   :  { %161 = vmatprep.subr.mxu0 %v29_v2  ;;  %v17_v15 = vld [vmem:[%s279_s1 + $0x8] sm:$0xff]  ;;  %v16_v16 = vld [vmem:[%s279_s1] sm:$0xff] }
   0x7   :  { %162 = vmatpush3.msra.mxu0 %v29_v2  ;;  %v15_v17 = vld [vmem:[%s280_s0 + $0x8] sm:$0xff]  ;;  %v138_v18 = vld [vmem:[%s281_s2] ss:$0 sm:$0xff] }
   0x8   :  { %163 = vmatprep.subr.mxu0 %v28_v3 }
   0x9   :  { %164 = vmatpush3.msra.mxu0 %v28_v3 }
   0xa   :  { %165 = vmatprep.subr.mxu0 %v27_v5 }
   0xb   :  { %166 = vmatpush3.msra.mxu0 %v27_v5 }
   0xc   :  { %167 = vmatprep.subr.mxu0 %v26_v6 }
   0xd   :  { %168 = vmatpush3.msra.mxu0 %v26_v6 }
   0xe   :  { %169 = vmatprep.subr.mxu0 %v25_v7 }
   0xf   :  { %170 = vmatpush3.msra.mxu0 %v25_v7 }
  0x10   :  { %171 = vmatprep.subr.mxu0 %v24_v8 }
  0x11   :  { %172 = vmatpush3.msra.mxu0 %v24_v8 }
  0x12   :  { %173 = vmatprep.subr.mxu0 %v23_v9 }
  0x13   :  { %174 = vmatpush3.msra.mxu0 %v23_v9 }
  0x14   :  { %175 = vmatprep.subr.mxu0 %v22_v10 }
  0x15   :  { %176 = vmatpush3.msra.mxu0 %v22_v10 }
  0x16   :  { %177 = vmatprep.subr.mxu0 %v21_v11 }
  0x17   :  { %178 = vmatpush3.msra.mxu0 %v21_v11 }
  0x18   :  { %179 = vmatprep.subr.mxu0 %v20_v12 }
  0x19   :  { %180 = vmatpush3.msra.mxu0 %v20_v12 }
  0x1a   :  { %181 = vmatprep.subr.mxu0 %v19_v13 }
  0x1b   :  { %182 = vmatpush3.msra.mxu0 %v19_v13 }
  0x1c   :  { %183 = vmatprep.subr.mxu0 %v18_v14 }
  0x1d   :  { %184 = vmatpush3.msra.mxu0 %v18_v14 }
  0x1e   :  { %185 = vmatprep.subr.mxu0 %v17_v15 }
  0x1f   :  { %186 = vmatpush3.msra.mxu0 %v17_v15 }
  0x20   :  { %187 = vmatprep.subr.mxu0 %v16_v16 }
  0x21   :  { %188 = vmatpush3.msra.mxu0 %v16_v16 }
  0x22   :  { %190 = vmatmul.mubr.f32.vlgmr.msra.gmra.mxu0 %v15_v17 }
  0xe2   :  { %v191_v19 = vpop.f32.mrf.mxu0 }
  0xe3   :  { %v111_v20 = vadd.f32 %v191_v19, %v138_v18 }
  0xe4   :  { %v105_v21 = vpop.f32.mrf.mxu0 }
  0xe5   :  { %v115_v22 = vmul.f32 %v111_v20, %v111_v20  ;;  %v106_v23 = vadd.f32 %v138_v18, %v105_v21 }
  0xe7   :  { %v117_v24 = vmul.f32 %v115_v22, %v111_v20  ;;  %v114_v25 = vmul.f32 %v106_v23, %v106_v23 }
  0xe9   :  { %v119_v26 = vmul.f32 0.044715, %v117_v24  ;;  %v116_v27 = vmul.f32 %v114_v25, %v106_v23 }
  0xeb   :  { %v121_v28 = vadd.f32 %v119_v26, %v111_v20  ;;  %v118_v29 = vmul.f32 0.044715, %v116_v27 }
  0xed   :  { %v123_v30 = vmul.f32 0.7978846, %v121_v28  ;;  %v120_v31 = vadd.f32 %v118_v29, %v106_v23 }
  0xef   :  { %192 = vtanh.f32 %v123_v30  ;;  %v122_v32 = vmul.f32 0.7978846, %v120_v31 }
  0xf1   :  { %194 = vtanh.f32 %v122_v32 }
  0xfc   :  { %v193_v33 = vpop.eup %192 }
  0xfd   :  { %v127_v34 = vadd.f32 1.0, %v193_v33 }
  0xfe   :  { %v195_v35 = vpop.eup %194 }
  0xff   :  { %v129_v36 = vmul.f32 0.5, %v127_v34  ;;  %v126_v37 = vadd.f32 1.0, %v195_v35 }
 0x101   :  { %v131_v38 = vmul.f32 %v129_v36, %v111_v20  ;;  %v128_v39 = vmul.f32 0.5, %v126_v37 }
 0x103   :  { %133 = vst [vmem:[%s282_s3 + $0x8] sm:$0xff] %v131_v38  ;;  %v130_v40 = vmul.f32 %v128_v39, %v106_v23 }
 0x105   :  { %132 = vst [vmem:[%s282_s3] sm:$0xff] %v130_v40 }

// kernel: _lambda_.22
= control target key start
LH: loop header
LB: loop body
LE: loop exit
PB: predicated region body
PF: predicated region fallthrough
CT: control target
= control target key end

     0   :  { %vm36_vm0 = vcmask 261120   ;;  %v132_v15 = vlaneseq  ;;  %s275_s1 = inlined_call_operand.vmem [shape: f32[32,128], index: 1, kind: input, shape index: {}]   ;;  %s276_s0 = inlined_call_operand.vmem [shape: f32[16,32], index: 0, kind: input, shape index: {}]   ;;  %s277_s2 = inlined_call_operand.vmem [shape: f32[1,128], index: 2, kind: input, shape index: {}]   ;;  %s278_s3 = inlined_call_operand.vmem [shape: f32[16,128], index: 3, kind: input, shape index: {}]   ;;  %s279_s4 = inlined_call_operand.vmem [shape: f32[1,128], index: 4, kind: input, shape index: {}]   ;;  %s280_s5 = inlined_call_operand.vmem [shape: f32[1,128], index: 5, kind: input, shape index: {}]   ;;  %s281_s6 = inlined_call_operand.vmem [shape: f32[16,128], index: 6, kind: output, shape index: {}]  }
   0x1   :  { %v28_v0 = vld [vmem:[%s275_s1 + $0x18] sm:$0xff]  ;;  %v27_v1 = vld [vmem:[%s275_s1 + $0x10] sm:$0xff]  ;;  %v23_v2 = vld [vmem:[%s276_s0] sm:$0xff] }
   0x2   :  { %184 = vmatprep.subr.mxu0 %v28_v0  ;;  %v26_v3 = vld [vmem:[%s275_s1 + $0x8] sm:$0xff]  ;;  %192 = vmatprep.mubr.msk.f32.mxu0 %vm36_vm0, %v23_v2  ;;  %v25_v4 = vld [vmem:[%s275_s1] sm:$0xff]  ;;  %v133_v16 = vand.u32 127, %v132_v15 }
   0x3   :  { %185 = vmatpush3.msra.mxu0 %v28_v0  ;;  %v24_v5 = vld [vmem:[%s276_s0 + $0x8] sm:$0xff]  ;;  %v173_v7 = vld [vmem:[%s277_s2] ss:$0 sm:$0xff] }
   0x4   :  { %186 = vmatprep.subr.mxu0 %v27_v1  ;;  %v118_v9 = vld [vmem:[%s278_s3] sm:$0xff]  ;;  %v119_v13 = vld [vmem:[%s278_s3 + $0x8] sm:$0xff]  ;;  %vm134_vm1 = vcmp.lt.s32.totalorder %v133_v16, 32 }
   0x5   :  { %187 = vmatpush3.msra.mxu0 %v27_v1  ;;  %v176_v34 = vld [vmem:[%s279_s4] ss:$0 sm:$0xff] }
   0x6   :  { %188 = vmatprep.subr.mxu0 %v26_v3  ;;  %v177_v36 = vld [vmem:[%s280_s5] ss:$0 sm:$0xff] }
   0x7   :  { %189 = vmatpush3.msra.mxu0 %v26_v3 }
   0x8   :  { %190 = vmatprep.subr.mxu0 %v25_v4 }
   0x9   :  { %191 = vmatpush3.msra.mxu0 %v25_v4 }
   0xa   :  { %193 = vmatmul.mubr.msk.f32.vlgmr.msra.gmra.mxu0 %vm36_vm0, %v24_v5 }
  0xca   :  { %v194_v6 = vpop.f32.mrf.mxu0 }
  0xcb   :  { %v115_v11 = vadd.f32 %v194_v6, %v173_v7 }
  0xcc   :  { %v109_v8 = vpop.f32.mrf.mxu0 }
  0xcd   :  { %v110_v10 = vadd.f32 %v173_v7, %v109_v8  ;;  %v121_v14 = vadd.f32 %v119_v13, %v115_v11 }
  0xcf   :  { %v120_v12 = vadd.f32 %v118_v9, %v110_v10 }
  0xd1   :  { %124 = vadd.xlane.f32.xlu0 %v120_v12 }
  0xd5   :  { %126 = vadd.xlane.f32.xlu0 %v121_v14 }
 0x15a   :  { %v125_v17 = vpop.xlane.xlu0 %124 }
 0x15b   :  { %v128_v18 = vmul.f32 0.03125, %v125_v17 }
 0x15d   :  { %v130_v19 = vsub.f32 %v120_v12, %v128_v18 }
 0x15e   :  { %v127_v20 = vpop.xlane.xlu0 %126 }
 0x15f   :  { %v129_v21 = vmul.f32 0.03125, %v127_v20  ;;  %v135_v22 = vsel %vm134_vm1, %v130_v19, 0.0 }
 0x160   :  { %v137_v23 = vmul.f32 %v135_v22, %v135_v22 }
 0x161   :  { %v131_v24 = vsub.f32 %v121_v14, %v129_v21 }
 0x162   :  { %139 = vadd.xlane.f32.xlu1 %v137_v23 }
 0x163   :  { %v136_v25 = vsel %vm134_vm1, %v131_v24, 0.0 }
 0x164   :  { %v138_v26 = vmul.f32 %v136_v25, %v136_v25 }
 0x166   :  { %141 = vadd.xlane.f32.xlu1 %v138_v26 }
 0x1eb   :  { %v140_v27 = vpop.xlane.xlu1 %139 }
 0x1ec   :  { %v143_v28 = vmul.f32 0.03125, %v140_v27 }
 0x1ee   :  { %v145_v29 = vadd.f32 1e-05, %v143_v28 }
 0x1ef   :  { %v142_v30 = vpop.xlane.xlu1 %141 }
 0x1f0   :  { %195 = vrsqrt.f32 %v145_v29  ;;  %v144_v31 = vmul.f32 0.03125, %v142_v30 }
 0x1f2   :  { %v146_v32 = vadd.f32 1e-05, %v144_v31 }
 0x1f4   :  { %197 = vrsqrt.f32 %v146_v32 }
 0x1fd   :  { %v196_v33 = vpop.eup %195 }
 0x1fe   :  { %v149_v35 = vmul.f32 %v196_v33, %v135_v22 }
 0x200   :  { %v157_v37 = vmul.f32 %v176_v34, %v149_v35 }
 0x201   :  { %v198_v38 = vpop.eup %197 }
 0x202   :  { %v165_v39 = vadd.f32 %v177_v36, %v157_v37  ;;  %v150_v40 = vmul.f32 %v198_v38, %v136_v25 }
 0x204   :  { %167 = vst [vmem:[%s281_s6] sm:$0xff] %v165_v39  ;;  %v158_v41 = vmul.f32 %v176_v34, %v150_v40 }
 0x206   :  { %v166_v42 = vadd.f32 %v177_v36, %v158_v41 }
 0x208   :  { %168 = vst [vmem:[%s281_s6 + $0x8] sm:$0xff] %v166_v42 }

// kernel: _lambda_.24
= control target key start
LH: loop header
LB: loop body
LE: loop exit
PB: predicated region body
PF: predicated region fallthrough
CT: control target
= control target key end

     0   :  { %v137_v27 = vlaneseq  ;;  %s348_s1 = inlined_call_operand.vmem [shape: f32[128,128], index: 1, kind: input, shape index: {}]   ;;  %s349_s0 = inlined_call_operand.vmem [shape: f32[16,128], index: 0, kind: input, shape index: {}]   ;;  %s350_s2 = inlined_call_operand.vmem [shape: f32[1,128], index: 2, kind: input, shape index: {}]   ;;  %s351_s3 = inlined_call_operand.vmem [shape: f32[16,128], index: 3, kind: input, shape index: {}]   ;;  %s352_s4 = inlined_call_operand.vmem [shape: f32[1,128], index: 4, kind: input, shape index: {}]   ;;  %s353_s5 = inlined_call_operand.vmem [shape: f32[1,128], index: 5, kind: input, shape index: {}]   ;;  %s354_s6 = inlined_call_operand.vmem [shape: f32[16,128], index: 6, kind: output, shape index: {}]  }
   0x1   :  { %v40_v0 = vld [vmem:[%s348_s1 + $0x78] sm:$0xff]  ;;  %v39_v1 = vld [vmem:[%s348_s1 + $0x70] sm:$0xff]  ;;  %v38_v2 = vld [vmem:[%s348_s1 + $0x68] sm:$0xff] }
   0x2   :  { %199 = vmatprep.subr.mxu0 %v40_v0  ;;  %v37_v3 = vld [vmem:[%s348_s1 + $0x60] sm:$0xff]  ;;  %v36_v5 = vld [vmem:[%s348_s1 + $0x58] sm:$0xff]  ;;  %v35_v6 = vld [vmem:[%s348_s1 + $0x50] sm:$0xff]  ;;  %v138_v28 = vand.u32 127, %v137_v27 }
   0x3   :  { %200 = vmatpush3.msra.mxu0 %v40_v0  ;;  %v23_v4 = vld [vmem:[%s349_s0] sm:$0xff]  ;;  %v34_v7 = vld [vmem:[%s348_s1 + $0x48] sm:$0xff]  ;;  %v32_v9 = vld [vmem:[%s348_s1 + $0x38] sm:$0xff] }
   0x4   :  { %201 = vmatprep.subr.mxu0 %v39_v1  ;;  %231 = vmatprep.mubr.f32.mxu0 %v23_v4  ;;  %v33_v8 = vld [vmem:[%s348_s1 + $0x40] sm:$0xff]  ;;  %v31_v10 = vld [vmem:[%s348_s1 + $0x30] sm:$0xff]  ;;  %v30_v11 = vld [vmem:[%s348_s1 + $0x28] sm:$0xff]  ;;  %vm139_vm0 = vcmp.lt.s32.totalorder %v138_v28, 32 }
   0x5   :  { %202 = vmatpush3.msra.mxu0 %v39_v1  ;;  %v29_v12 = vld [vmem:[%s348_s1 + $0x20] sm:$0xff]  ;;  %v28_v13 = vld [vmem:[%s348_s1 + $0x18] sm:$0xff]  ;;  %v27_v14 = vld [vmem:[%s348_s1 + $0x10] sm:$0xff] }
   0x6   :  { %203 = vmatprep.subr.mxu0 %v38_v2  ;;  %v26_v15 = vld [vmem:[%s348_s1 + $0x8] sm:$0xff]  ;;  %v25_v16 = vld [vmem:[%s348_s1] sm:$0xff] }
   0x7   :  { %204 = vmatpush3.msra.mxu0 %v38_v2  ;;  %v24_v17 = vld [vmem:[%s349_s0 + $0x8] sm:$0xff]  ;;  %v178_v19 = vld [vmem:[%s350_s2] ss:$0 sm:$0xff] }
   0x8   :  { %205 = vmatprep.subr.mxu0 %v37_v3  ;;  %v123_v21 = vld [vmem:[%s351_s3] sm:$0xff]  ;;  %v124_v25 = vld [vmem:[%s351_s3 + $0x8] sm:$0xff] }
   0x9   :  { %206 = vmatpush3.msra.mxu0 %v37_v3  ;;  %v179_v46 = vld [vmem:[%s352_s4] ss:$0 sm:$0xff] }
   0xa   :  { %207 = vmatprep.subr.mxu0 %v36_v5  ;;  %v180_v48 = vld [vmem:[%s353_s5] ss:$0 sm:$0xff] }
   0xb   :  { %208 = vmatpush3.msra.mxu0 %v36_v5 }
   0xc   :  { %209 = vmatprep.subr.mxu0 %v35_v6 }
   0xd   :  { %210 = vmatpush3.msra.mxu0 %v35_v6 }
   0xe   :  { %211 = vmatprep.subr.mxu0 %v34_v7 }
   0xf   :  { %212 = vmatpush3.msra.mxu0 %v34_v7 }
  0x10   :  { %213 = vmatprep.subr.mxu0 %v33_v8 }
  0x11   :  { %214 = vmatpush3.msra.mxu0 %v33_v8 }
  0x12   :  { %215 = vmatprep.subr.mxu0 %v32_v9 }
  0x13   :  { %216 = vmatpush3.msra.mxu0 %v32_v9 }
  0x14   :  { %217 = vmatprep.subr.mxu0 %v31_v10 }
  0x15   :  { %218 = vmatpush3.msra.mxu0 %v31_v10 }
  0x16   :  { %219 = vmatprep.subr.mxu0 %v30_v11 }
  0x17   :  { %220 = vmatpush3.msra.mxu0 %v30_v11 }
  0x18   :  { %221 = vmatprep.subr.mxu0 %v29_v12 }
  0x19   :  { %222 = vmatpush3.msra.mxu0 %v29_v12 }
  0x1a   :  { %223 = vmatprep.subr.mxu0 %v28_v13 }
  0x1b   :  { %224 = vmatpush3.msra.mxu0 %v28_v13 }
  0x1c   :  { %225 = vmatprep.subr.mxu0 %v27_v14 }
  0x1d   :  { %226 = vmatpush3.msra.mxu0 %v27_v14 }
  0x1e   :  { %227 = vmatprep.subr.mxu0 %v26_v15 }
  0x1f   :  { %228 = vmatpush3.msra.mxu0 %v26_v15 }
  0x20   :  { %229 = vmatprep.subr.mxu0 %v25_v16 }
  0x21   :  { %230 = vmatpush3.msra.mxu0 %v25_v16 }
  0x22   :  { %232 = vmatmul.mubr.f32.vlgmr.msra.gmra.mxu0 %v24_v17 }
  0xe2   :  { %v233_v18 = vpop.f32.mrf.mxu0 }
  0xe3   :  { %v120_v23 = vadd.f32 %v233_v18, %v178_v19 }
  0xe4   :  { %v114_v20 = vpop.f32.mrf.mxu0 }
  0xe5   :  { %v115_v22 = vadd.f32 %v178_v19, %v114_v20  ;;  %v126_v26 = vadd.f32 %v124_v25, %v120_v23 }
  0xe7   :  { %v125_v24 = vadd.f32 %v123_v21, %v115_v22 }
  0xe9   :  { %129 = vadd.xlane.f32.xlu0 %v125_v24 }
  0xed   :  { %131 = vadd.xlane.f32.xlu0 %v126_v26 }
 0x172   :  { %v130_v29 = vpop.xlane.xlu0 %129 }
 0x173   :  { %v133_v30 = vmul.f32 0.03125, %v130_v29 }
 0x175   :  { %v135_v31 = vsub.f32 %v125_v24, %v133_v30 }
 0x176   :  { %v132_v32 = vpop.xlane.xlu0 %131 }
 0x177   :  { %v134_v33 = vmul.f32 0.03125, %v132_v32  ;;  %v140_v34 = vsel %vm139_vm0, %v135_v31, 0.0 }
 0x178   :  { %v142_v35 = vmul.f32 %v140_v34, %v140_v34 }
 0x179   :  { %v136_v36 = vsub.f32 %v126_v26, %v134_v33 }
 0x17a   :  { %144 = vadd.xlane.f32.xlu1 %v142_v35 }
 0x17b   :  { %v141_v37 = vsel %vm139_vm0, %v136_v36, 0.0 }
 0x17c   :  { %v143_v38 = vmul.f32 %v141_v37, %v141_v37 }
 0x17e   :  { %146 = vadd.xlane.f32.xlu1 %v143_v38 }
 0x203   :  { %v145_v39 = vpop.xlane.xlu1 %144 }
 0x204   :  { %v148_v40 = vmul.f32 0.03125, %v145_v39 }
 0x206   :  { %v150_v41 = vadd.f32 1e-05, %v148_v40 }
 0x207   :  { %v147_v42 = vpop.xlane.xlu1 %146 }
 0x208   :  { %234 = vrsqrt.f32 %v150_v41  ;;  %v149_v43 = vmul.f32 0.03125, %v147_v42 }
 0x20a   :  { %v151_v44 = vadd.f32 1e-05, %v149_v43 }
 0x20c   :  { %236 = vrsqrt.f32 %v151_v44 }
 0x215   :  { %v235_v45 = vpop.eup %234 }
 0x216   :  { %v154_v47 = vmul.f32 %v235_v45, %v140_v34 }
 0x218   :  { %v162_v49 = vmul.f32 %v179_v46, %v154_v47 }
 0x219   :  { %v237_v50 = vpop.eup %236 }
 0x21a   :  { %v170_v51 = vadd.f32 %v180_v48, %v162_v49  ;;  %v155_v52 = vmul.f32 %v237_v50, %v141_v37 }
 0x21c   :  { %172 = vst [vmem:[%s354_s6] sm:$0xff] %v170_v51  ;;  %v163_v53 = vmul.f32 %v179_v46, %v155_v52 }
 0x21e   :  { %v171_v54 = vadd.f32 %v180_v48, %v163_v53 }
 0x220   :  { %173 = vst [vmem:[%s354_s6 + $0x8] sm:$0xff] %v171_v54 }

</bundles_post_ra>
